<compile_context>
chip_gen: v7x
topology: tpu7x:2x2x1
jax: 0.10.0
libtpu: 0.0.40
codegen_flags: <defaults>
</compile_context>

<pallas_src>
import functools
import math

import jax
import jax.numpy as jnp
from jax.experimental import pallas as pl
from jax.experimental.pallas import tpu as pltpu


# --------------------------------------------------------------------------
# Fused decoder-layer kernel: self-attn + cross-attn + FFN (+ residual/LN)
# --------------------------------------------------------------------------

def _decoder_layer_kernel(
    seq_ref, cond_ref,
    wqkv_s_ref, wh_s_ref, bh_s_ref, ln1_g_ref, ln1_b_ref,
    wq_c_ref, wkv_c_ref, wh_c_ref, bh_c_ref, ln2_g_ref, ln2_b_ref,
    w1_ref, b1_ref, w2_ref, b2_ref, ln3_g_ref, ln3_b_ref,
    out_ref,
    yw_scr,
    *, num_heads, eps):
  x = seq_ref[0]                       # (S, D)   D on the lane axis
  cond = cond_ref[0]                   # (Tc, D)
  S, D = x.shape
  H = num_heads
  Dh = D // H
  scale = 1.0 / math.sqrt(D / H)       # torch: / sqrt(D / num_heads)

  def attention(q, k, v, *, causal):
    # Per-head attention; heads are static lane slices of the (.., D) slabs.
    Tk = k.shape[0]
    for h in range(H):
      qh = q[:, h * Dh:(h + 1) * Dh] * scale      # scale Q, not the scores
      kh = k[:, h * Dh:(h + 1) * Dh]
      vh = v[:, h * Dh:(h + 1) * Dh]
      s = jax.lax.dot_general(qh, kh, (((1,), (1,)), ((), ())),
                              preferred_element_type=jnp.float32)
      if causal:
        row = jax.lax.broadcasted_iota(jnp.int32, (S, Tk), 0)
        col = jax.lax.broadcasted_iota(jnp.int32, (S, Tk), 1)
        # reference: dot_product.masked_fill(mask == 0, -1e8)
        s = jnp.where(col <= row, s, -100000000.0)
      m = jnp.max(s, axis=-1, keepdims=True)
      p = jnp.exp(s - m)
      denom = jnp.sum(p, axis=-1, keepdims=True)
      yh = jnp.dot(p, vh, preferred_element_type=jnp.float32)
      yh = yh * pl.reciprocal(denom, approx=True)   # EUP reciprocal
      # Reproduce the reference's y.reshape(N, S, -1) applied to the
      # (H, S, Dh) head stack (heads are NOT transposed back):
      # element (h, s, :) lands at row (h*S+s)//H, lane block ((h*S+s)%H)*Dh.
      for sq in range(S):
        flat = h * S + sq
        r, c = flat // H, (flat % H) * Dh
        yw_scr[r:r + 1, c:c + Dh] = yh[sq:sq + 1, :]
    return yw_scr[...]                              # (S, D)

  def add_ln(a, b, g, beta):
    z = a + b
    mu = jnp.mean(z, axis=-1, keepdims=True)
    var = jnp.mean((z - mu) * (z - mu), axis=-1, keepdims=True)
    return (z - mu) * jax.lax.rsqrt(var + eps) * g + beta

  # ---- self-attention block (fused QKV matmul, causal mask in-kernel) ----
  qkv = jnp.dot(x, wqkv_s_ref[...], preferred_element_type=jnp.float32)
  y = attention(qkv[:, :D], qkv[:, D:2 * D], qkv[:, 2 * D:], causal=True)
  attn = jnp.dot(y, wh_s_ref[...],
                 preferred_element_type=jnp.float32) + bh_s_ref[...]
  out1 = add_ln(x, attn, ln1_g_ref[...], ln1_b_ref[...])

  # ---- cross-attention block (fused KV matmul, no mask) ----
  qc = jnp.dot(out1, wq_c_ref[...], preferred_element_type=jnp.float32)
  kvc = jnp.dot(cond, wkv_c_ref[...], preferred_element_type=jnp.float32)
  yc = attention(qc, kvc[:, :D], kvc[:, D:], causal=False)
  cattn = jnp.dot(yc, wh_c_ref[...],
                  preferred_element_type=jnp.float32) + bh_c_ref[...]
  out2 = add_ln(out1, cattn, ln2_g_ref[...], ln2_b_ref[...])

  # ---- feed-forward block ----
  hid = jnp.dot(out2, w1_ref[...],
                preferred_element_type=jnp.float32) + b1_ref[...]
  hid = jnp.maximum(hid, 0.0)           # ReLU
  ff = jnp.dot(hid, w2_ref[...],
               preferred_element_type=jnp.float32) + b2_ref[...]
  out_ref[0] = add_ln(out2, ff, ln3_g_ref[...], ln3_b_ref[...])


def decoder_layer(p, seq, cond, num_heads, eps=1e-5):
  N, S, D = seq.shape
  Tc = cond.shape[1]
  assert S % num_heads == 0 and D % num_heads == 0

  def vec(a):                    # 1-D params -> lane-major (1, X) 2-D slabs
    return a.reshape(1, -1)

  args = (seq, cond,
          p["wqkv_s"], p["wh_s"], vec(p["bh_s"]),
          vec(p["ln1_g"]), vec(p["ln1_b"]),
          p["wq_c"], p["wkv_c"], p["wh_c"], vec(p["bh_c"]),
          vec(p["ln2_g"]), vec(p["ln2_b"]),
          p["w1"], vec(p["b1"]), p["w2"], vec(p["b2"]),
          vec(p["ln3_g"]), vec(p["ln3_b"]))

  # Layer weights: constant index_map -> fetched once, stay VMEM-resident.
  weight_specs = [pl.BlockSpec(a.shape, lambda n: (0, 0)) for a in args[2:]]
  in_specs = [pl.BlockSpec((1, S, D), lambda n: (n, 0, 0)),
              pl.BlockSpec((1, Tc, D), lambda n: (n, 0, 0))] + weight_specs

  kernel = functools.partial(_decoder_layer_kernel,
                             num_heads=num_heads, eps=eps)
  return pl.pallas_call(
      kernel,
      out_shape=jax.ShapeDtypeStruct((N, S, D), jnp.float32),
      grid=(N,),                  # batch axis: parallel (v7x: 2 TensorCores)
      in_specs=in_specs,
      out_specs=pl.BlockSpec((1, S, D), lambda n: (n, 0, 0)),
      scratch_shapes=[pltpu.VMEM((S, D), jnp.float32)],
      compiler_params=pltpu.CompilerParams(
          dimension_semantics=("parallel",)),
  )(*args)


# --------------------------------------------------------------------------
# Tiled linear for the final vocabulary projection
# --------------------------------------------------------------------------

def _linear_kernel(x_ref, w_ref, b_ref, o_ref):
  o_ref[...] = (jnp.dot(x_ref[...], w_ref[...],
                        preferred_element_type=jnp.float32) + b_ref[...])


def linear(x2d, w, b, *, tile_m=256, tile_n=512):
  """y = x2d @ w + b, tiled over rows and lane-dense output columns."""
  M, K = x2d.shape
  N = w.shape[1]
  tm = M if M <= tile_m else tile_m
  tn = N if N <= tile_n else tile_n
  return pl.pallas_call(
      _linear_kernel,
      out_shape=jax.ShapeDtypeStruct((M, N), jnp.float32),
      grid=(pl.cdiv(M, tm), pl.cdiv(N, tn)),
      in_specs=[pl.BlockSpec((tm, K), lambda i, j: (i, 0)),
                pl.BlockSpec((K, tn), lambda i, j: (0, j)),
                pl.BlockSpec((1, tn), lambda i, j: (0, j))],
      out_specs=pl.BlockSpec((tm, tn), lambda i, j: (i, j)),
      compiler_params=pltpu.CompilerParams(
          dimension_semantics=("parallel", "parallel")),
  )(x2d, w, b.reshape(1, N))


# --------------------------- model glue (plain JAX) ------------------------

def transformer_decoder_forward(params, features, captions, num_heads):
  N, T = captions.shape
  D = params["caption_embedding"].shape[1]
  # Tiny (N, input_dim) @ (input_dim, D) feature embedding: plain XLA
  # (not worth a kernel launch), then unsqueeze -> (N, 1, D).
  feat = (features @ params["w_feat"] + params["b_feat"])[:, None, :]
  # Caption embedding + learned positional encoding (dropout = identity).
  cap = params["caption_embedding"][captions] + params["pos_embedding"][:T][None]
  out = cap
  for lp in params["layers"]:
    out = decoder_layer(lp, out, feat, num_heads)  # causal mask built in-kernel
  V = params["w_score"].shape[1]
  scores = linear(out.reshape(N * T, D), params["w_score"],
                  params["b_score"]).reshape(N, T, V)
  return scores


def init_params(key, *, vocab_size, input_dim, embed_dim, num_heads,
                num_layers, max_length, dim_feedforward=2048):
  def nrm(k, shape):
    return 0.02 * jax.random.normal(k, shape, jnp.float32)

  D = embed_dim
  keys = iter(jax.random.split(key, 4 + num_layers * 7))
  params = {
      "caption_embedding": nrm(next(keys), (vocab_size, D)),
      "pos_embedding": nrm(next(keys), (max_length, D)),
      "w_feat": nrm(next(keys), (input_dim, D)),
      "b_feat": jnp.zeros((D,), jnp.float32),
      "w_score": nrm(next(keys), (D, vocab_size)),
      "b_score": jnp.zeros((vocab_size,), jnp.float32),
      "layers": [],
  }
  for _ in range(num_layers):
    lp = {
        # self-attention: q|k|v projections fused into one (D, 3D) weight
        "wqkv_s": nrm(next(keys), (D, 3 * D)),
        "wh_s": nrm(next(keys), (D, D)),
        "bh_s": jnp.zeros((D,), jnp.float32),
        "ln1_g": jnp.ones((D,), jnp.float32),
        "ln1_b": jnp.zeros((D,), jnp.float32),
        # cross-attention: k|v projections fused into one (D, 2D) weight
        "wq_c": nrm(next(keys), (D, D)),
        "wkv_c": nrm(next(keys), (D, 2 * D)),
        "wh_c": nrm(next(keys), (D, D)),
        "bh_c": jnp.zeros((D,), jnp.float32),
        "ln2_g": jnp.ones((D,), jnp.float32),
        "ln2_b": jnp.zeros((D,), jnp.float32),
        # feed-forward
        "w1": nrm(next(keys), (D, dim_feedforward)),
        "b1": jnp.zeros((dim_feedforward,), jnp.float32),
        "w2": nrm(next(keys), (dim_feedforward, D)),
        "b2": jnp.zeros((D,), jnp.float32),
        "ln3_g": jnp.ones((D,), jnp.float32),
        "ln3_b": jnp.zeros((D,), jnp.float32),
    }
    params["layers"].append(lp)
  return params


if __name__ == "__main__":
  # Vocabulary: '<NULL>' -> 0, '<START>' -> 1
  words = ["<NULL>", "<START>", "<END>"] + [f"w{i}" for i in range(13)]
  word_to_idx = {w: i for i, w in enumerate(words)}
  vocab_size = len(word_to_idx)          # 16

  input_dim = 16
  embed_dim = 32
  num_heads = 4
  num_layers = 2
  max_length = 16

  N, T = 2, 8

  key = jax.random.PRNGKey(0)
  pkey, fkey, ckey = jax.random.split(key, 3)
  params = init_params(pkey, vocab_size=vocab_size, input_dim=input_dim,
                       embed_dim=embed_dim, num_heads=num_heads,
                       num_layers=num_layers, max_length=max_length)

  features = jax.random.normal(fkey, (N, input_dim), jnp.float32)
  captions = jax.random.randint(ckey, (N, T), 0, vocab_size)

  fwd = jax.jit(transformer_decoder_forward, static_argnums=3)
  scores = fwd(params, features, captions, num_heads)
  scores = jax.block_until_ready(scores)
  assert scores.shape == (N, T, vocab_size)
  assert scores.dtype == jnp.float32
  print("KERNEL_OK")
</pallas_src>

<mosaic_0001>
module attributes {stable_mosaic.version = 11 : i64} {
  func.func @_linear_kernel(%arg0: i32, %arg1: i32, %arg2: memref<16x32xf32, #tpu.memory_space<vmem>>, %arg3: memref<32x16xf32, #tpu.memory_space<vmem>>, %arg4: memref<1x16xf32, #tpu.memory_space<vmem>>, %arg5: memref<16x16xf32, #tpu.memory_space<vmem>>) attributes {dimension_semantics = [#tpu.dimension_semantics<parallel>, #tpu.dimension_semantics<parallel>], iteration_bounds = array<i64: 1, 1>, scalar_prefetch = 0 : i64, scratch_operands = 0 : i64, tpu.core_type = #tpu.core_type<tc>, window_params = [{transform_indices = @transform_0, window_bounds = array<i64: 16, 32>}, {transform_indices = @transform_1, window_bounds = array<i64: 32, 16>}, {transform_indices = @transform_2, window_bounds = array<i64: 1, 16>}, {transform_indices = @transform_3, window_bounds = array<i64: 16, 16>}]} {
    %c0 = arith.constant 0 : index
    %c0_0 = arith.constant 0 : index
    %0 = vector.load %arg2[%c0, %c0_0] : memref<16x32xf32, #tpu.memory_space<vmem>>, vector<16x32xf32>
    %c0_1 = arith.constant 0 : index
    %c0_2 = arith.constant 0 : index
    %1 = vector.load %arg3[%c0_1, %c0_2] : memref<32x16xf32, #tpu.memory_space<vmem>>, vector<32x16xf32>
    %cst = arith.constant dense<0.000000e+00> : vector<16x16xf32>
    %2 = tpu.matmul %0, %1, %cst {dimension_numbers = #tpu.dot_dimension_numbers<[1], [0], [0], [1], [0, 0, 1, 1], [], []>} : vector<16x32xf32>, vector<32x16xf32>, vector<16x16xf32> -> vector<16x16xf32>
    %c0_3 = arith.constant 0 : index
    %c0_4 = arith.constant 0 : index
    %3 = vector.load %arg4[%c0_3, %c0_4] : memref<1x16xf32, #tpu.memory_space<vmem>>, vector<1x16xf32>
    %4 = vector.broadcast %3 : vector<1x16xf32> to vector<16x16xf32>
    %5 = arith.addf %2, %4 : vector<16x16xf32>
    %c0_5 = arith.constant 0 : index
    %c0_6 = arith.constant 0 : index
    %6 = vector.load %arg5[%c0_5, %c0_6] : memref<16x16xf32, #tpu.memory_space<vmem>>, vector<16x16xf32>
    tpu.vector_store %arg5[%c0_5, %c0_6], %5 {strides = array<i32>} : memref<16x16xf32, #tpu.memory_space<vmem>>, vector<16x16xf32>,
    return
  }
  func.func @transform_0(%arg0: i32, %arg1: i32) -> (i32, i32) {
    %c0_i32 = arith.constant 0 : i32
    %c0_i32_0 = arith.constant 0 : i32
    return %arg0, %c0_i32 : i32, i32
  }
  func.func @transform_1(%arg0: i32, %arg1: i32) -> (i32, i32) {
    %c0_i32 = arith.constant 0 : i32
    %c0_i32_0 = arith.constant 0 : i32
    return %c0_i32, %arg1 : i32, i32
  }
  func.func @transform_2(%arg0: i32, %arg1: i32) -> (i32, i32) {
    %c0_i32 = arith.constant 0 : i32
    %c0_i32_0 = arith.constant 0 : i32
    return %c0_i32, %arg1 : i32, i32
  }
  func.func @transform_3(%arg0: i32, %arg1: i32) -> (i32, i32) {
    %c0_i32 = arith.constant 0 : i32
    return %arg0, %arg1 : i32, i32
  }
}

module attributes {stable_mosaic.version = 11 : i64} {
  func.func @_decoder_layer_kernel(%arg0: i32, %arg1: memref<1x8x32xf32, #tpu.memory_space<vmem>>, %arg2: memref<1x1x32xf32, #tpu.memory_space<vmem>>, %arg3: memref<32x96xf32, #tpu.memory_space<vmem>>, %arg4: memref<32x32xf32, #tpu.memory_space<vmem>>, %arg5: memref<1x32xf32, #tpu.memory_space<vmem>>, %arg6: memref<1x32xf32, #tpu.memory_space<vmem>>, %arg7: memref<1x32xf32, #tpu.memory_space<vmem>>, %arg8: memref<32x32xf32, #tpu.memory_space<vmem>>, %arg9: memref<32x64xf32, #tpu.memory_space<vmem>>, %arg10: memref<32x32xf32, #tpu.memory_space<vmem>>, %arg11: memref<1x32xf32, #tpu.memory_space<vmem>>, %arg12: memref<1x32xf32, #tpu.memory_space<vmem>>, %arg13: memref<1x32xf32, #tpu.memory_space<vmem>>, %arg14: memref<32x2048xf32, #tpu.memory_space<vmem>>, %arg15: memref<1x2048xf32, #tpu.memory_space<vmem>>, %arg16: memref<2048x32xf32, #tpu.memory_space<vmem>>, %arg17: memref<1x32xf32, #tpu.memory_space<vmem>>, %arg18: memref<1x32xf32, #tpu.memory_space<vmem>>, %arg19: memref<1x32xf32, #tpu.memory_space<vmem>>, %arg20: memref<1x8x32xf32, #tpu.memory_space<vmem>>, %arg21: memref<8x32xf32, #tpu.memory_space<vmem>>) attributes {dimension_semantics = [#tpu.dimension_semantics<parallel>], iteration_bounds = array<i64: 2>, scalar_prefetch = 0 : i64, scratch_operands = 1 : i64, tpu.core_type = #tpu.core_type<tc>, window_params = [{transform_indices = @transform_0, window_bounds = array<i64: 1, 8, 32>}, {transform_indices = @transform_1, window_bounds = array<i64: 1, 1, 32>}, {pipeline_mode = #tpu.pipeline_mode<synchronous>, transform_indices = @transform_2, window_bounds = array<i64: 32, 96>}, {pipeline_mode = #tpu.pipeline_mode<synchronous>, transform_indices = @transform_3, window_bounds = array<i64: 32, 32>}, {pipeline_mode = #tpu.pipeline_mode<synchronous>, transform_indices = @transform_4, window_bounds = array<i64: 1, 32>}, {pipeline_mode = #tpu.pipeline_mode<synchronous>, transform_indices = @transform_5, window_bounds = array<i64: 1, 32>}, {pipeline_mode = #tpu.pipeline_mode<synchronous>, transform_indices = @transform_6, window_bounds = array<i64: 1, 32>}, {pipeline_mode = #tpu.pipeline_mode<synchronous>, transform_indices = @transform_7, window_bounds = array<i64: 32, 32>}, {pipeline_mode = #tpu.pipeline_mode<synchronous>, transform_indices = @transform_8, window_bounds = array<i64: 32, 64>}, {pipeline_mode = #tpu.pipeline_mode<synchronous>, transform_indices = @transform_9, window_bounds = array<i64: 32, 32>}, {pipeline_mode = #tpu.pipeline_mode<synchronous>, transform_indices = @transform_10, window_bounds = array<i64: 1, 32>}, {pipeline_mode = #tpu.pipeline_mode<synchronous>, transform_indices = @transform_11, window_bounds = array<i64: 1, 32>}, {pipeline_mode = #tpu.pipeline_mode<synchronous>, transform_indices = @transform_12, window_bounds = array<i64: 1, 32>}, {pipeline_mode = #tpu.pipeline_mode<synchronous>, transform_indices = @transform_13, window_bounds = array<i64: 32, 2048>}, {pipeline_mode = #tpu.pipeline_mode<synchronous>, transform_indices = @transform_14, window_bounds = array<i64: 1, 2048>}, {pipeline_mode = #tpu.pipeline_mode<synchronous>, transform_indices = @transform_15, window_bounds = array<i64: 2048, 32>}, {pipeline_mode = #tpu.pipeline_mode<synchronous>, transform_indices = @transform_16, window_bounds = array<i64: 1, 32>}, {pipeline_mode = #tpu.pipeline_mode<synchronous>, transform_indices = @transform_17, window_bounds = array<i64: 1, 32>}, {pipeline_mode = #tpu.pipeline_mode<synchronous>, transform_indices = @transform_18, window_bounds = array<i64: 1, 32>}, {transform_indices = @transform_19, window_bounds = array<i64: 1, 8, 32>}]} {
    %c0 = arith.constant 0 : index
    %c0_0 = arith.constant 0 : index
    %c0_1 = arith.constant 0 : index
    %0 = vector.load %arg1[%c0, %c0_0, %c0_1] : memref<1x8x32xf32, #tpu.memory_space<vmem>>, vector<1x8x32xf32>
    %1 = vector.shape_cast %0 : vector<1x8x32xf32> to vector<8x32xf32>
    %c0_2 = arith.constant 0 : index
    %c0_3 = arith.constant 0 : index
    %c0_4 = arith.constant 0 : index
    %2 = vector.load %arg2[%c0_2, %c0_3, %c0_4] : memref<1x1x32xf32, #tpu.memory_space<vmem>>, vector<1x1x32xf32>
    %3 = vector.shape_cast %2 : vector<1x1x32xf32> to vector<1x32xf32>
    %c0_5 = arith.constant 0 : index
    %c0_6 = arith.constant 0 : index
    %4 = vector.load %arg3[%c0_5, %c0_6] : memref<32x96xf32, #tpu.memory_space<vmem>>, vector<32x96xf32>
    %cst = arith.constant dense<0.000000e+00> : vector<8x96xf32>
    %5 = tpu.matmul %1, %4, %cst {dimension_numbers = #tpu.dot_dimension_numbers<[1], [0], [0], [1], [0, 0, 1, 1], [], []>} : vector<8x32xf32>, vector<32x96xf32>, vector<8x96xf32> -> vector<8x96xf32>
    %6 = vector.extract_strided_slice %5 {offsets = [0, 0], sizes = [8, 32], strides = [1, 1]} : vector<8x96xf32> to vector<8x32xf32>
    %7 = vector.extract_strided_slice %5 {offsets = [0, 32], sizes = [8, 32], strides = [1, 1]} : vector<8x96xf32> to vector<8x32xf32>
    %8 = vector.extract_strided_slice %5 {offsets = [0, 64], sizes = [8, 32], strides = [1, 1]} : vector<8x96xf32> to vector<8x32xf32>
    %9 = vector.extract_strided_slice %6 {offsets = [0, 0], sizes = [8, 8], strides = [1, 1]} : vector<8x32xf32> to vector<8x8xf32>
    %cst_7 = arith.constant 0.353553385 : f32
    %10 = vector.broadcast %cst_7 : f32 to vector<8x8xf32>
    %11 = arith.mulf %9, %10 : vector<8x8xf32>
    %12 = vector.extract_strided_slice %7 {offsets = [0, 0], sizes = [8, 8], strides = [1, 1]} : vector<8x32xf32> to vector<8x8xf32>
    %13 = vector.extract_strided_slice %8 {offsets = [0, 0], sizes = [8, 8], strides = [1, 1]} : vector<8x32xf32> to vector<8x8xf32>
    %cst_8 = arith.constant dense<0.000000e+00> : vector<8x8xf32>
    %14 = tpu.matmul %11, %12, %cst_8 {dimension_numbers = #tpu.dot_dimension_numbers<[1], [1], [0], [0], [0, 0, 1, 0], [], []>} : vector<8x8xf32>, vector<8x8xf32>, vector<8x8xf32> -> vector<8x8xf32>
    %15 = tpu.iota {dimensions = array<i32: 0>} : vector<8x8xi32>
    %16 = tpu.iota {dimensions = array<i32: 1>} : vector<8x8xi32>
    %17 = arith.cmpi sle, %16, %15 : vector<8x8xi32>
    %cst_9 = arith.constant -1.000000e+08 : f32
    %18 = vector.broadcast %cst_9 : f32 to vector<8x8xf32>
    %19 = arith.select %17, %14, %18 : vector<8x8xi1>, vector<8x8xf32>
    %cst_10 = arith.constant dense<0xFF800000> : vector<8xf32>
    %20 = vector.multi_reduction <maximumf>, %19, %cst_10 [1] : vector<8x8xf32> to vector<8xf32>
    %21 = vector.shape_cast %20 : vector<8xf32> to vector<8x1xf32>
    %22 = vector.broadcast %21 : vector<8x1xf32> to vector<8x8xf32>
    %23 = arith.subf %19, %22 : vector<8x8xf32>
    %24 = math.exp %23 : vector<8x8xf32>
    %cst_11 = arith.constant dense<0.000000e+00> : vector<8xf32>
    %25 = vector.multi_reduction <add>, %24, %cst_11 [1] : vector<8x8xf32> to vector<8xf32>
    %26 = vector.shape_cast %25 : vector<8xf32> to vector<8x1xf32>
    %cst_12 = arith.constant dense<0.000000e+00> : vector<8x8xf32>
    %27 = tpu.matmul %24, %13, %cst_12 {dimension_numbers = #tpu.dot_dimension_numbers<[1], [0], [0], [1], [0, 0, 1, 1], [], []>} : vector<8x8xf32>, vector<8x8xf32>, vector<8x8xf32> -> vector<8x8xf32>
    %28 = tpu.reciprocal %26 {approx = true} : vector<8x1xf32> -> vector<8x1xf32>
    %29 = vector.broadcast %28 : vector<8x1xf32> to vector<8x8xf32>
    %30 = arith.mulf %27, %29 : vector<8x8xf32>
    %31 = vector.extract_strided_slice %30 {offsets = [0, 0], sizes = [1, 8], strides = [1, 1]} : vector<8x8xf32> to vector<1x8xf32>
    %c0_13 = arith.constant 0 : index
    %c0_14 = arith.constant 0 : index
    %32 = vector.load %arg21[%c0_13, %c0_14] : memref<8x32xf32, #tpu.memory_space<vmem>>, vector<1x8xf32>
    tpu.vector_store %arg21[%c0_13, %c0_14], %31 {strides = array<i32>} : memref<8x32xf32, #tpu.memory_space<vmem>>, vector<1x8xf32>,
    %33 = vector.extract_strided_slice %30 {offsets = [1, 0], sizes = [1, 8], strides = [1, 1]} : vector<8x8xf32> to vector<1x8xf32>
    %c0_15 = arith.constant 0 : index
    %c8 = arith.constant 8 : index
    %34 = vector.load %arg21[%c0_15, %c8] : memref<8x32xf32, #tpu.memory_space<vmem>>, vector<1x8xf32>
    tpu.vector_store %arg21[%c0_15, %c8], %33 {strides = array<i32>} : memref<8x32xf32, #tpu.memory_space<vmem>>, vector<1x8xf32>,
    %35 = vector.extract_strided_slice %30 {offsets = [2, 0], sizes = [1, 8], strides = [1, 1]} : vector<8x8xf32> to vector<1x8xf32>
    %c0_16 = arith.constant 0 : index
    %c16 = arith.constant 16 : index
    %36 = vector.load %arg21[%c0_16, %c16] : memref<8x32xf32, #tpu.memory_space<vmem>>, vector<1x8xf32>
    tpu.vector_store %arg21[%c0_16, %c16], %35 {strides = array<i32>} : memref<8x32xf32, #tpu.memory_space<vmem>>, vector<1x8xf32>,
    %37 = vector.extract_strided_slice %30 {offsets = [3, 0], sizes = [1, 8], strides = [1, 1]} : vector<8x8xf32> to vector<1x8xf32>
    %c0_17 = arith.constant 0 : index
    %c24 = arith.constant 24 : index
    %38 = vector.load %arg21[%c0_17, %c24] : memref<8x32xf32, #tpu.memory_space<vmem>>, vector<1x8xf32>
    tpu.vector_store %arg21[%c0_17, %c24], %37 {strides = array<i32>} : memref<8x32xf32, #tpu.memory_space<vmem>>, vector<1x8xf32>,
    %39 = vector.extract_strided_slice %30 {offsets = [4, 0], sizes = [1, 8], strides = [1, 1]} : vector<8x8xf32> to vector<1x8xf32>
    %c1 = arith.constant 1 : index
    %c0_18 = arith.constant 0 : index
    %40 = vector.load %arg21[%c1, %c0_18] : memref<8x32xf32, #tpu.memory_space<vmem>>, vector<1x8xf32>
    tpu.vector_store %arg21[%c1, %c0_18], %39 {strides = array<i32>} : memref<8x32xf32, #tpu.memory_space<vmem>>, vector<1x8xf32>,
    %41 = vector.extract_strided_slice %30 {offsets = [5, 0], sizes = [1, 8], strides = [1, 1]} : vector<8x8xf32> to vector<1x8xf32>
    %c1_19 = arith.constant 1 : index
    %c8_20 = arith.constant 8 : index
    %42 = vector.load %arg21[%c1_19, %c8_20] : memref<8x32xf32, #tpu.memory_space<vmem>>, vector<1x8xf32>
    tpu.vector_store %arg21[%c1_19, %c8_20], %41 {strides = array<i32>} : memref<8x32xf32, #tpu.memory_space<vmem>>, vector<1x8xf32>,
    %43 = vector.extract_strided_slice %30 {offsets = [6, 0], sizes = [1, 8], strides = [1, 1]} : vector<8x8xf32> to vector<1x8xf32>
    %c1_21 = arith.constant 1 : index
    %c16_22 = arith.constant 16 : index
    %44 = vector.load %arg21[%c1_21, %c16_22] : memref<8x32xf32, #tpu.memory_space<vmem>>, vector<1x8xf32>
    tpu.vector_store %arg21[%c1_21, %c16_22], %43 {strides = array<i32>} : memref<8x32xf32, #tpu.memory_space<vmem>>, vector<1x8xf32>,
    %45 = vector.extract_strided_slice %30 {offsets = [7, 0], sizes = [1, 8], strides = [1, 1]} : vector<8x8xf32> to vector<1x8xf32>
    %c1_23 = arith.constant 1 : index
    %c24_24 = arith.constant 24 : index
    %46 = vector.load %arg21[%c1_23, %c24_24] : memref<8x32xf32, #tpu.memory_space<vmem>>, vector<1x8xf32>
    tpu.vector_store %arg21[%c1_23, %c24_24], %45 {strides = array<i32>} : memref<8x32xf32, #tpu.memory_space<vmem>>, vector<1x8xf32>,
    %47 = vector.extract_strided_slice %6 {offsets = [0, 8], sizes = [8, 8], strides = [1, 1]} : vector<8x32xf32> to vector<8x8xf32>
    %cst_25 = arith.constant 0.353553385 : f32
    %48 = vector.broadcast %cst_25 : f32 to vector<8x8xf32>
    %49 = arith.mulf %47, %48 : vector<8x8xf32>
    %50 = vector.extract_strided_slice %7 {offsets = [0, 8], sizes = [8, 8], strides = [1, 1]} : vector<8x32xf32> to vector<8x8xf32>
    %51 = vector.extract_strided_slice %8 {offsets = [0, 8], sizes = [8, 8], strides = [1, 1]} : vector<8x32xf32> to vector<8x8xf32>
    %cst_26 = arith.constant dense<0.000000e+00> : vector<8x8xf32>
    %52 = tpu.matmul %49, %50, %cst_26 {dimension_numbers = #tpu.dot_dimension_numbers<[1], [1], [0], [0], [0, 0, 1, 0], [], []>} : vector<8x8xf32>, vector<8x8xf32>, vector<8x8xf32> -> vector<8x8xf32>
    %53 = tpu.iota {dimensions = array<i32: 0>} : vector<8x8xi32>
    %54 = tpu.iota {dimensions = array<i32: 1>} : vector<8x8xi32>
    %55 = arith.cmpi sle, %54, %53 : vector<8x8xi32>
    %cst_27 = arith.constant -1.000000e+08 : f32
    %56 = vector.broadcast %cst_27 : f32 to vector<8x8xf32>
    %57 = arith.select %55, %52, %56 : vector<8x8xi1>, vector<8x8xf32>
    %cst_28 = arith.constant dense<0xFF800000> : vector<8xf32>
    %58 = vector.multi_reduction <maximumf>, %57, %cst_28 [1] : vector<8x8xf32> to vector<8xf32>
    %59 = vector.shape_cast %58 : vector<8xf32> to vector<8x1xf32>
    %60 = vector.broadcast %59 : vector<8x1xf32> to vector<8x8xf32>
    %61 = arith.subf %57, %60 : vector<8x8xf32>
    %62 = math.exp %61 : vector<8x8xf32>
    %cst_29 = arith.constant dense<0.000000e+00> : vector<8xf32>
    %63 = vector.multi_reduction <add>, %62, %cst_29 [1] : vector<8x8xf32> to vector<8xf32>
    %64 = vector.shape_cast %63 : vector<8xf32> to vector<8x1xf32>
    %cst_30 = arith.constant dense<0.000000e+00> : vector<8x8xf32>
    %65 = tpu.matmul %62, %51, %cst_30 {dimension_numbers = #tpu.dot_dimension_numbers<[1], [0], [0], [1], [0, 0, 1, 1], [], []>} : vector<8x8xf32>, vector<8x8xf32>, vector<8x8xf32> -> vector<8x8xf32>
    %66 = tpu.reciprocal %64 {approx = true} : vector<8x1xf32> -> vector<8x1xf32>
    %67 = vector.broadcast %66 : vector<8x1xf32> to vector<8x8xf32>
    %68 = arith.mulf %65, %67 : vector<8x8xf32>
    %69 = vector.extract_strided_slice %68 {offsets = [0, 0], sizes = [1, 8], strides = [1, 1]} : vector<8x8xf32> to vector<1x8xf32>
    %c2 = arith.constant 2 : index
    %c0_31 = arith.constant 0 : index
    %70 = vector.load %arg21[%c2, %c0_31] : memref<8x32xf32, #tpu.memory_space<vmem>>, vector<1x8xf32>
    tpu.vector_store %arg21[%c2, %c0_31], %69 {strides = array<i32>} : memref<8x32xf32, #tpu.memory_space<vmem>>, vector<1x8xf32>,
    %71 = vector.extract_strided_slice %68 {offsets = [1, 0], sizes = [1, 8], strides = [1, 1]} : vector<8x8xf32> to vector<1x8xf32>
    %c2_32 = arith.constant 2 : index
    %c8_33 = arith.constant 8 : index
    %72 = vector.load %arg21[%c2_32, %c8_33] : memref<8x32xf32, #tpu.memory_space<vmem>>, vector<1x8xf32>
    tpu.vector_store %arg21[%c2_32, %c8_33], %71 {strides = array<i32>} : memref<8x32xf32, #tpu.memory_space<vmem>>, vector<1x8xf32>,
    %73 = vector.extract_strided_slice %68 {offsets = [2, 0], sizes = [1, 8], strides = [1, 1]} : vector<8x8xf32> to vector<1x8xf32>
    %c2_34 = arith.constant 2 : index
    %c16_35 = arith.constant 16 : index
    %74 = vector.load %arg21[%c2_34, %c16_35] : memref<8x32xf32, #tpu.memory_space<vmem>>, vector<1x8xf32>
    tpu.vector_store %arg21[%c2_34, %c16_35], %73 {strides = array<i32>} : memref<8x32xf32, #tpu.memory_space<vmem>>, vector<1x8xf32>,
    %75 = vector.extract_strided_slice %68 {offsets = [3, 0], sizes = [1, 8], strides = [1, 1]} : vector<8x8xf32> to vector<1x8xf32>
    %c2_36 = arith.constant 2 : index
    %c24_37 = arith.constant 24 : index
    %76 = vector.load %arg21[%c2_36, %c24_37] : memref<8x32xf32, #tpu.memory_space<vmem>>, vector<1x8xf32>
    tpu.vector_store %arg21[%c2_36, %c24_37], %75 {strides = array<i32>} : memref<8x32xf32, #tpu.memory_space<vmem>>, vector<1x8xf32>,
    %77 = vector.extract_strided_slice %68 {offsets = [4, 0], sizes = [1, 8], strides = [1, 1]} : vector<8x8xf32> to vector<1x8xf32>
    %c3 = arith.constant 3 : index
    %c0_38 = arith.constant 0 : index
    %78 = vector.load %arg21[%c3, %c0_38] : memref<8x32xf32, #tpu.memory_space<vmem>>, vector<1x8xf32>
    tpu.vector_store %arg21[%c3, %c0_38], %77 {strides = array<i32>} : memref<8x32xf32, #tpu.memory_space<vmem>>, vector<1x8xf32>,
    %79 = vector.extract_strided_slice %68 {offsets = [5, 0], sizes = [1, 8], strides = [1, 1]} : vector<8x8xf32> to vector<1x8xf32>
    %c3_39 = arith.constant 3 : index
    %c8_40 = arith.constant 8 : index
    %80 = vector.load %arg21[%c3_39, %c8_40] : memref<8x32xf32, #tpu.memory_space<vmem>>, vector<1x8xf32>
    tpu.vector_store %arg21[%c3_39, %c8_40], %79 {strides = array<i32>} : memref<8x32xf32, #tpu.memory_space<vmem>>, vector<1x8xf32>,
    %81 = vector.extract_strided_slice %68 {offsets = [6, 0], sizes = [1, 8], strides = [1, 1]} : vector<8x8xf32> to vector<1x8xf32>
    %c3_41 = arith.constant 3 : index
    %c16_42 = arith.constant 16 : index
    %82 = vector.load %arg21[%c3_41, %c16_42] : memref<8x32xf32, #tpu.memory_space<vmem>>, vector<1x8xf32>
    tpu.vector_store %arg21[%c3_41, %c16_42], %81 {strides = array<i32>} : memref<8x32xf32, #tpu.memory_space<vmem>>, vector<1x8xf32>,
    %83 = vector.extract_strided_slice %68 {offsets = [7, 0], sizes = [1, 8], strides = [1, 1]} : vector<8x8xf32> to vector<1x8xf32>
    %c3_43 = arith.constant 3 : index
    %c24_44 = arith.constant 24 : index
    %84 = vector.load %arg21[%c3_43, %c24_44] : memref<8x32xf32, #tpu.memory_space<vmem>>, vector<1x8xf32>
    tpu.vector_store %arg21[%c3_43, %c24_44], %83 {strides = array<i32>} : memref<8x32xf32, #tpu.memory_space<vmem>>, vector<1x8xf32>,
    %85 = vector.extract_strided_slice %6 {offsets = [0, 16], sizes = [8, 8], strides = [1, 1]} : vector<8x32xf32> to vector<8x8xf32>
    %cst_45 = arith.constant 0.353553385 : f32
    %86 = vector.broadcast %cst_45 : f32 to vector<8x8xf32>
    %87 = arith.mulf %85, %86 : vector<8x8xf32>
    %88 = vector.extract_strided_slice %7 {offsets = [0, 16], sizes = [8, 8], strides = [1, 1]} : vector<8x32xf32> to vector<8x8xf32>
    %89 = vector.extract_strided_slice %8 {offsets = [0, 16], sizes = [8, 8], strides = [1, 1]} : vector<8x32xf32> to vector<8x8xf32>
    %cst_46 = arith.constant dense<0.000000e+00> : vector<8x8xf32>
    %90 = tpu.matmul %87, %88, %cst_46 {dimension_numbers = #tpu.dot_dimension_numbers<[1], [1], [0], [0], [0, 0, 1, 0], [], []>} : vector<8x8xf32>, vector<8x8xf32>, vector<8x8xf32> -> vector<8x8xf32>
    %91 = tpu.iota {dimensions = array<i32: 0>} : vector<8x8xi32>
    %92 = tpu.iota {dimensions = array<i32: 1>} : vector<8x8xi32>
    %93 = arith.cmpi sle, %92, %91 : vector<8x8xi32>
    %cst_47 = arith.constant -1.000000e+08 : f32
    %94 = vector.broadcast %cst_47 : f32 to vector<8x8xf32>
    %95 = arith.select %93, %90, %94 : vector<8x8xi1>, vector<8x8xf32>
    %cst_48 = arith.constant dense<0xFF800000> : vector<8xf32>
    %96 = vector.multi_reduction <maximumf>, %95, %cst_48 [1] : vector<8x8xf32> to vector<8xf32>
    %97 = vector.shape_cast %96 : vector<8xf32> to vector<8x1xf32>
    %98 = vector.broadcast %97 : vector<8x1xf32> to vector<8x8xf32>
    %99 = arith.subf %95, %98 : vector<8x8xf32>
    %100 = math.exp %99 : vector<8x8xf32>
    %cst_49 = arith.constant dense<0.000000e+00> : vector<8xf32>
    %101 = vector.multi_reduction <add>, %100, %cst_49 [1] : vector<8x8xf32> to vector<8xf32>
    %102 = vector.shape_cast %101 : vector<8xf32> to vector<8x1xf32>
    %cst_50 = arith.constant dense<0.000000e+00> : vector<8x8xf32>
    %103 = tpu.matmul %100, %89, %cst_50 {dimension_numbers = #tpu.dot_dimension_numbers<[1], [0], [0], [1], [0, 0, 1, 1], [], []>} : vector<8x8xf32>, vector<8x8xf32>, vector<8x8xf32> -> vector<8x8xf32>
    %104 = tpu.reciprocal %102 {approx = true} : vector<8x1xf32> -> vector<8x1xf32>
    %105 = vector.broadcast %104 : vector<8x1xf32> to vector<8x8xf32>
    %106 = arith.mulf %103, %105 : vector<8x8xf32>
    %107 = vector.extract_strided_slice %106 {offsets = [0, 0], sizes = [1, 8], strides = [1, 1]} : vector<8x8xf32> to vector<1x8xf32>
    %c4 = arith.constant 4 : index
    %c0_51 = arith.constant 0 : index
    %108 = vector.load %arg21[%c4, %c0_51] : memref<8x32xf32, #tpu.memory_space<vmem>>, vector<1x8xf32>
    tpu.vector_store %arg21[%c4, %c0_51], %107 {strides = array<i32>} : memref<8x32xf32, #tpu.memory_space<vmem>>, vector<1x8xf32>,
    %109 = vector.extract_strided_slice %106 {offsets = [1, 0], sizes = [1, 8], strides = [1, 1]} : vector<8x8xf32> to vector<1x8xf32>
    %c4_52 = arith.constant 4 : index
    %c8_53 = arith.constant 8 : index
    %110 = vector.load %arg21[%c4_52, %c8_53] : memref<8x32xf32, #tpu.memory_space<vmem>>, vector<1x8xf32>
    tpu.vector_store %arg21[%c4_52, %c8_53], %109 {strides = array<i32>} : memref<8x32xf32, #tpu.memory_space<vmem>>, vector<1x8xf32>,
    %111 = vector.extract_strided_slice %106 {offsets = [2, 0], sizes = [1, 8], strides = [1, 1]} : vector<8x8xf32> to vector<1x8xf32>
    %c4_54 = arith.constant 4 : index
    %c16_55 = arith.constant 16 : index
    %112 = vector.load %arg21[%c4_54, %c16_55] : memref<8x32xf32, #tpu.memory_space<vmem>>, vector<1x8xf32>
    tpu.vector_store %arg21[%c4_54, %c16_55], %111 {strides = array<i32>} : memref<8x32xf32, #tpu.memory_space<vmem>>, vector<1x8xf32>,
    %113 = vector.extract_strided_slice %106 {offsets = [3, 0], sizes = [1, 8], strides = [1, 1]} : vector<8x8xf32> to vector<1x8xf32>
    %c4_56 = arith.constant 4 : index
    %c24_57 = arith.constant 24 : index
    %114 = vector.load %arg21[%c4_56, %c24_57] : memref<8x32xf32, #tpu.memory_space<vmem>>, vector<1x8xf32>
    tpu.vector_store %arg21[%c4_56, %c24_57], %113 {strides = array<i32>} : memref<8x32xf32, #tpu.memory_space<vmem>>, vector<1x8xf32>,
    %115 = vector.extract_strided_slice %106 {offsets = [4, 0], sizes = [1, 8], strides = [1, 1]} : vector<8x8xf32> to vector<1x8xf32>
    %c5 = arith.constant 5 : index
    %c0_58 = arith.constant 0 : index
    %116 = vector.load %arg21[%c5, %c0_58] : memref<8x32xf32, #tpu.memory_space<vmem>>, vector<1x8xf32>
    tpu.vector_store %arg21[%c5, %c0_58], %115 {strides = array<i32>} : memref<8x32xf32, #tpu.memory_space<vmem>>, vector<1x8xf32>,
    %117 = vector.extract_strided_slice %106 {offsets = [5, 0], sizes = [1, 8], strides = [1, 1]} : vector<8x8xf32> to vector<1x8xf32>
    %c5_59 = arith.constant 5 : index
    %c8_60 = arith.constant 8 : index
    %118 = vector.load %arg21[%c5_59, %c8_60] : memref<8x32xf32, #tpu.memory_space<vmem>>, vector<1x8xf32>
    tpu.vector_store %arg21[%c5_59, %c8_60], %117 {strides = array<i32>} : memref<8x32xf32, #tpu.memory_space<vmem>>, vector<1x8xf32>,
    %119 = vector.extract_strided_slice %106 {offsets = [6, 0], sizes = [1, 8], strides = [1, 1]} : vector<8x8xf32> to vector<1x8xf32>
    %c5_61 = arith.constant 5 : index
    %c16_62 = arith.constant 16 : index
    %120 = vector.load %arg21[%c5_61, %c16_62] : memref<8x32xf32, #tpu.memory_space<vmem>>, vector<1x8xf32>
    tpu.vector_store %arg21[%c5_61, %c16_62], %119 {strides = array<i32>} : memref<8x32xf32, #tpu.memory_space<vmem>>, vector<1x8xf32>,
    %121 = vector.extract_strided_slice %106 {offsets = [7, 0], sizes = [1, 8], strides = [1, 1]} : vector<8x8xf32> to vector<1x8xf32>
    %c5_63 = arith.constant 5 : index
    %c24_64 = arith.constant 24 : index
    %122 = vector.load %arg21[%c5_63, %c24_64] : memref<8x32xf32, #tpu.memory_space<vmem>>, vector<1x8xf32>
    tpu.vector_store %arg21[%c5_63, %c24_64], %121 {strides = array<i32>} : memref<8x32xf32, #tpu.memory_space<vmem>>, vector<1x8xf32>,
    %123 = vector.extract_strided_slice %6 {offsets = [0, 24], sizes = [8, 8], strides = [1, 1]} : vector<8x32xf32> to vector<8x8xf32>
    %cst_65 = arith.constant 0.353553385 : f32
    %124 = vector.broadcast %cst_65 : f32 to vector<8x8xf32>
    %125 = arith.mulf %123, %124 : vector<8x8xf32>
    %126 = vector.extract_strided_slice %7 {offsets = [0, 24], sizes = [8, 8], strides = [1, 1]} : vector<8x32xf32> to vector<8x8xf32>
    %127 = vector.extract_strided_slice %8 {offsets = [0, 24], sizes = [8, 8], strides = [1, 1]} : vector<8x32xf32> to vector<8x8xf32>
    %cst_66 = arith.constant dense<0.000000e+00> : vector<8x8xf32>
    %128 = tpu.matmul %125, %126, %cst_66 {dimension_numbers = #tpu.dot_dimension_numbers<[1], [1], [0], [0], [0, 0, 1, 0], [], []>} : vector<8x8xf32>, vector<8x8xf32>, vector<8x8xf32> -> vector<8x8xf32>
    %129 = tpu.iota {dimensions = array<i32: 0>} : vector<8x8xi32>
    %130 = tpu.iota {dimensions = array<i32: 1>} : vector<8x8xi32>
    %131 = arith.cmpi sle, %130, %129 : vector<8x8xi32>
    %cst_67 = arith.constant -1.000000e+08 : f32
    %132 = vector.broadcast %cst_67 : f32 to vector<8x8xf32>
    %133 = arith.select %131, %128, %132 : vector<8x8xi1>, vector<8x8xf32>
    %cst_68 = arith.constant dense<0xFF800000> : vector<8xf32>
    %134 = vector.multi_reduction <maximumf>, %133, %cst_68 [1] : vector<8x8xf32> to vector<8xf32>
    %135 = vector.shape_cast %134 : vector<8xf32> to vector<8x1xf32>
    %136 = vector.broadcast %135 : vector<8x1xf32> to vector<8x8xf32>
    %137 = arith.subf %133, %136 : vector<8x8xf32>
    %138 = math.exp %137 : vector<8x8xf32>
    %cst_69 = arith.constant dense<0.000000e+00> : vector<8xf32>
    %139 = vector.multi_reduction <add>, %138, %cst_69 [1] : vector<8x8xf32> to vector<8xf32>
    %140 = vector.shape_cast %139 : vector<8xf32> to vector<8x1xf32>
    %cst_70 = arith.constant dense<0.000000e+00> : vector<8x8xf32>
    %141 = tpu.matmul %138, %127, %cst_70 {dimension_numbers = #tpu.dot_dimension_numbers<[1], [0], [0], [1], [0, 0, 1, 1], [], []>} : vector<8x8xf32>, vector<8x8xf32>, vector<8x8xf32> -> vector<8x8xf32>
    %142 = tpu.reciprocal %140 {approx = true} : vector<8x1xf32> -> vector<8x1xf32>
    %143 = vector.broadcast %142 : vector<8x1xf32> to vector<8x8xf32>
    %144 = arith.mulf %141, %143 : vector<8x8xf32>
    %145 = vector.extract_strided_slice %144 {offsets = [0, 0], sizes = [1, 8], strides = [1, 1]} : vector<8x8xf32> to vector<1x8xf32>
    %c6 = arith.constant 6 : index
    %c0_71 = arith.constant 0 : index
    %146 = vector.load %arg21[%c6, %c0_71] : memref<8x32xf32, #tpu.memory_space<vmem>>, vector<1x8xf32>
    tpu.vector_store %arg21[%c6, %c0_71], %145 {strides = array<i32>} : memref<8x32xf32, #tpu.memory_space<vmem>>, vector<1x8xf32>,
    %147 = vector.extract_strided_slice %144 {offsets = [1, 0], sizes = [1, 8], strides = [1, 1]} : vector<8x8xf32> to vector<1x8xf32>
    %c6_72 = arith.constant 6 : index
    %c8_73 = arith.constant 8 : index
    %148 = vector.load %arg21[%c6_72, %c8_73] : memref<8x32xf32, #tpu.memory_space<vmem>>, vector<1x8xf32>
    tpu.vector_store %arg21[%c6_72, %c8_73], %147 {strides = array<i32>} : memref<8x32xf32, #tpu.memory_space<vmem>>, vector<1x8xf32>,
    %149 = vector.extract_strided_slice %144 {offsets = [2, 0], sizes = [1, 8], strides = [1, 1]} : vector<8x8xf32> to vector<1x8xf32>
    %c6_74 = arith.constant 6 : index
    %c16_75 = arith.constant 16 : index
    %150 = vector.load %arg21[%c6_74, %c16_75] : memref<8x32xf32, #tpu.memory_space<vmem>>, vector<1x8xf32>
    tpu.vector_store %arg21[%c6_74, %c16_75], %149 {strides = array<i32>} : memref<8x32xf32, #tpu.memory_space<vmem>>, vector<1x8xf32>,
    %151 = vector.extract_strided_slice %144 {offsets = [3, 0], sizes = [1, 8], strides = [1, 1]} : vector<8x8xf32> to vector<1x8xf32>
    %c6_76 = arith.constant 6 : index
    %c24_77 = arith.constant 24 : index
    %152 = vector.load %arg21[%c6_76, %c24_77] : memref<8x32xf32, #tpu.memory_space<vmem>>, vector<1x8xf32>
    tpu.vector_store %arg21[%c6_76, %c24_77], %151 {strides = array<i32>} : memref<8x32xf32, #tpu.memory_space<vmem>>, vector<1x8xf32>,
    %153 = vector.extract_strided_slice %144 {offsets = [4, 0], sizes = [1, 8], strides = [1, 1]} : vector<8x8xf32> to vector<1x8xf32>
    %c7 = arith.constant 7 : index
    %c0_78 = arith.constant 0 : index
    %154 = vector.load %arg21[%c7, %c0_78] : memref<8x32xf32, #tpu.memory_space<vmem>>, vector<1x8xf32>
    tpu.vector_store %arg21[%c7, %c0_78], %153 {strides = array<i32>} : memref<8x32xf32, #tpu.memory_space<vmem>>, vector<1x8xf32>,
    %155 = vector.extract_strided_slice %144 {offsets = [5, 0], sizes = [1, 8], strides = [1, 1]} : vector<8x8xf32> to vector<1x8xf32>
    %c7_79 = arith.constant 7 : index
    %c8_80 = arith.constant 8 : index
    %156 = vector.load %arg21[%c7_79, %c8_80] : memref<8x32xf32, #tpu.memory_space<vmem>>, vector<1x8xf32>
    tpu.vector_store %arg21[%c7_79, %c8_80], %155 {strides = array<i32>} : memref<8x32xf32, #tpu.memory_space<vmem>>, vector<1x8xf32>,
    %157 = vector.extract_strided_slice %144 {offsets = [6, 0], sizes = [1, 8], strides = [1, 1]} : vector<8x8xf32> to vector<1x8xf32>
    %c7_81 = arith.constant 7 : index
    %c16_82 = arith.constant 16 : index
    %158 = vector.load %arg21[%c7_81, %c16_82] : memref<8x32xf32, #tpu.memory_space<vmem>>, vector<1x8xf32>
    tpu.vector_store %arg21[%c7_81, %c16_82], %157 {strides = array<i32>} : memref<8x32xf32, #tpu.memory_space<vmem>>, vector<1x8xf32>,
    %159 = vector.extract_strided_slice %144 {offsets = [7, 0], sizes = [1, 8], strides = [1, 1]} : vector<8x8xf32> to vector<1x8xf32>
    %c7_83 = arith.constant 7 : index
    %c24_84 = arith.constant 24 : index
    %160 = vector.load %arg21[%c7_83, %c24_84] : memref<8x32xf32, #tpu.memory_space<vmem>>, vector<1x8xf32>
    tpu.vector_store %arg21[%c7_83, %c24_84], %159 {strides = array<i32>} : memref<8x32xf32, #tpu.memory_space<vmem>>, vector<1x8xf32>,
    %c0_85 = arith.constant 0 : index
    %c0_86 = arith.constant 0 : index
    %161 = vector.load %arg21[%c0_85, %c0_86] : memref<8x32xf32, #tpu.memory_space<vmem>>, vector<8x32xf32>
    %c0_87 = arith.constant 0 : index
    %c0_88 = arith.constant 0 : index
    %162 = vector.load %arg4[%c0_87, %c0_88] : memref<32x32xf32, #tpu.memory_space<vmem>>, vector<32x32xf32>
    %cst_89 = arith.constant dense<0.000000e+00> : vector<8x32xf32>
    %163 = tpu.matmul %161, %162, %cst_89 {dimension_numbers = #tpu.dot_dimension_numbers<[1], [0], [0], [1], [0, 0, 1, 1], [], []>} : vector<8x32xf32>, vector<32x32xf32>, vector<8x32xf32> -> vector<8x32xf32>
    %c0_90 = arith.constant 0 : index
    %c0_91 = arith.constant 0 : index
    %164 = vector.load %arg5[%c0_90, %c0_91] : memref<1x32xf32, #tpu.memory_space<vmem>>, vector<1x32xf32>
    %165 = vector.broadcast %164 : vector<1x32xf32> to vector<8x32xf32>
    %166 = arith.addf %163, %165 : vector<8x32xf32>
    %c0_92 = arith.constant 0 : index
    %c0_93 = arith.constant 0 : index
    %167 = vector.load %arg6[%c0_92, %c0_93] : memref<1x32xf32, #tpu.memory_space<vmem>>, vector<1x32xf32>
    %c0_94 = arith.constant 0 : index
    %c0_95 = arith.constant 0 : index
    %168 = vector.load %arg7[%c0_94, %c0_95] : memref<1x32xf32, #tpu.memory_space<vmem>>, vector<1x32xf32>
    %169 = arith.addf %1, %166 : vector<8x32xf32>
    %cst_96 = arith.constant dense<0.000000e+00> : vector<8xf32>
    %170 = vector.multi_reduction <add>, %169, %cst_96 [1] : vector<8x32xf32> to vector<8xf32>
    %171 = vector.shape_cast %170 : vector<8xf32> to vector<8x1xf32>
    %cst_97 = arith.constant 3.200000e+01 : f32
    %172 = vector.broadcast %cst_97 : f32 to vector<8x1xf32>
    %173 = arith.divf %171, %172 : vector<8x1xf32>
    %174 = vector.broadcast %173 : vector<8x1xf32> to vector<8x32xf32>
    %175 = arith.subf %169, %174 : vector<8x32xf32>
    %176 = vector.broadcast %173 : vector<8x1xf32> to vector<8x32xf32>
    %177 = arith.subf %169, %176 : vector<8x32xf32>
    %178 = arith.mulf %175, %177 : vector<8x32xf32>
    %cst_98 = arith.constant dense<0.000000e+00> : vector<8xf32>
    %179 = vector.multi_reduction <add>, %178, %cst_98 [1] : vector<8x32xf32> to vector<8xf32>
    %180 = vector.shape_cast %179 : vector<8xf32> to vector<8x1xf32>
    %cst_99 = arith.constant 3.200000e+01 : f32
    %181 = vector.broadcast %cst_99 : f32 to vector<8x1xf32>
    %182 = arith.divf %180, %181 : vector<8x1xf32>
    %183 = vector.broadcast %173 : vector<8x1xf32> to vector<8x32xf32>
    %184 = arith.subf %169, %183 : vector<8x32xf32>
    %cst_100 = arith.constant 9.99999974E-6 : f32
    %185 = vector.broadcast %cst_100 : f32 to vector<8x1xf32>
    %186 = arith.addf %182, %185 : vector<8x1xf32>
    %187 = math.rsqrt %186 : vector<8x1xf32>
    %188 = vector.broadcast %187 : vector<8x1xf32> to vector<8x32xf32>
    %189 = arith.mulf %184, %188 : vector<8x32xf32>
    %190 = vector.broadcast %167 : vector<1x32xf32> to vector<8x32xf32>
    %191 = arith.mulf %189, %190 : vector<8x32xf32>
    %192 = vector.broadcast %168 : vector<1x32xf32> to vector<8x32xf32>
    %193 = arith.addf %191, %192 : vector<8x32xf32>
    %c0_101 = arith.constant 0 : index
    %c0_102 = arith.constant 0 : index
    %194 = vector.load %arg8[%c0_101, %c0_102] : memref<32x32xf32, #tpu.memory_space<vmem>>, vector<32x32xf32>
    %cst_103 = arith.constant dense<0.000000e+00> : vector<8x32xf32>
    %195 = tpu.matmul %193, %194, %cst_103 {dimension_numbers = #tpu.dot_dimension_numbers<[1], [0], [0], [1], [0, 0, 1, 1], [], []>} : vector<8x32xf32>, vector<32x32xf32>, vector<8x32xf32> -> vector<8x32xf32>
    %c0_104 = arith.constant 0 : index
    %c0_105 = arith.constant 0 : index
    %196 = vector.load %arg9[%c0_104, %c0_105] : memref<32x64xf32, #tpu.memory_space<vmem>>, vector<32x64xf32>
    %cst_106 = arith.constant dense<0.000000e+00> : vector<1x64xf32>
    %197 = tpu.matmul %3, %196, %cst_106 {dimension_numbers = #tpu.dot_dimension_numbers<[1], [0], [0], [1], [0, 0, 1, 1], [], []>} : vector<1x32xf32>, vector<32x64xf32>, vector<1x64xf32> -> vector<1x64xf32>
    %198 = vector.extract_strided_slice %197 {offsets = [0, 0], sizes = [1, 32], strides = [1, 1]} : vector<1x64xf32> to vector<1x32xf32>
    %199 = vector.extract_strided_slice %197 {offsets = [0, 32], sizes = [1, 32], strides = [1, 1]} : vector<1x64xf32> to vector<1x32xf32>
    %200 = vector.extract_strided_slice %195 {offsets = [0, 0], sizes = [8, 8], strides = [1, 1]} : vector<8x32xf32> to vector<8x8xf32>
    %cst_107 = arith.constant 0.353553385 : f32
    %201 = vector.broadcast %cst_107 : f32 to vector<8x8xf32>
    %202 = arith.mulf %200, %201 : vector<8x8xf32>
    %203 = vector.extract_strided_slice %198 {offsets = [0, 0], sizes = [1, 8], strides = [1, 1]} : vector<1x32xf32> to vector<1x8xf32>
    %204 = vector.extract_strided_slice %199 {offsets = [0, 0], sizes = [1, 8], strides = [1, 1]} : vector<1x32xf32> to vector<1x8xf32>
    %cst_108 = arith.constant dense<0.000000e+00> : vector<8x1xf32>
    %205 = tpu.matmul %202, %203, %cst_108 {dimension_numbers = #tpu.dot_dimension_numbers<[1], [1], [0], [0], [0, 0, 1, 0], [], []>} : vector<8x8xf32>, vector<1x8xf32>, vector<8x1xf32> -> vector<8x1xf32>
    %cst_109 = arith.constant dense<0xFF800000> : vector<8xf32>
    %206 = vector.multi_reduction <maximumf>, %205, %cst_109 [1] : vector<8x1xf32> to vector<8xf32>
    %207 = vector.shape_cast %206 : vector<8xf32> to vector<8x1xf32>
    %208 = arith.subf %205, %207 : vector<8x1xf32>
    %209 = math.exp %208 : vector<8x1xf32>
    %cst_110 = arith.constant dense<0.000000e+00> : vector<8xf32>
    %210 = vector.multi_reduction <add>, %209, %cst_110 [1] : vector<8x1xf32> to vector<8xf32>
    %211 = vector.shape_cast %210 : vector<8xf32> to vector<8x1xf32>
    %cst_111 = arith.constant dense<0.000000e+00> : vector<8x8xf32>
    %212 = tpu.matmul %209, %204, %cst_111 {dimension_numbers = #tpu.dot_dimension_numbers<[1], [0], [0], [1], [0, 0, 1, 1], [], []>} : vector<8x1xf32>, vector<1x8xf32>, vector<8x8xf32> -> vector<8x8xf32>
    %213 = tpu.reciprocal %211 {approx = true} : vector<8x1xf32> -> vector<8x1xf32>
    %214 = vector.broadcast %213 : vector<8x1xf32> to vector<8x8xf32>
    %215 = arith.mulf %212, %214 : vector<8x8xf32>
    %216 = vector.extract_strided_slice %215 {offsets = [0, 0], sizes = [1, 8], strides = [1, 1]} : vector<8x8xf32> to vector<1x8xf32>
    %c0_112 = arith.constant 0 : index
    %c0_113 = arith.constant 0 : index
    %217 = vector.load %arg21[%c0_112, %c0_113] : memref<8x32xf32, #tpu.memory_space<vmem>>, vector<1x8xf32>
    tpu.vector_store %arg21[%c0_112, %c0_113], %216 {strides = array<i32>} : memref<8x32xf32, #tpu.memory_space<vmem>>, vector<1x8xf32>,
    %218 = vector.extract_strided_slice %215 {offsets = [1, 0], sizes = [1, 8], strides = [1, 1]} : vector<8x8xf32> to vector<1x8xf32>
    %c0_114 = arith.constant 0 : index
    %c8_115 = arith.constant 8 : index
    %219 = vector.load %arg21[%c0_114, %c8_115] : memref<8x32xf32, #tpu.memory_space<vmem>>, vector<1x8xf32>
    tpu.vector_store %arg21[%c0_114, %c8_115], %218 {strides = array<i32>} : memref<8x32xf32, #tpu.memory_space<vmem>>, vector<1x8xf32>,
    %220 = vector.extract_strided_slice %215 {offsets = [2, 0], sizes = [1, 8], strides = [1, 1]} : vector<8x8xf32> to vector<1x8xf32>
    %c0_116 = arith.constant 0 : index
    %c16_117 = arith.constant 16 : index
    %221 = vector.load %arg21[%c0_116, %c16_117] : memref<8x32xf32, #tpu.memory_space<vmem>>, vector<1x8xf32>
    tpu.vector_store %arg21[%c0_116, %c16_117], %220 {strides = array<i32>} : memref<8x32xf32, #tpu.memory_space<vmem>>, vector<1x8xf32>,
    %222 = vector.extract_strided_slice %215 {offsets = [3, 0], sizes = [1, 8], strides = [1, 1]} : vector<8x8xf32> to vector<1x8xf32>
    %c0_118 = arith.constant 0 : index
    %c24_119 = arith.constant 24 : index
    %223 = vector.load %arg21[%c0_118, %c24_119] : memref<8x32xf32, #tpu.memory_space<vmem>>, vector<1x8xf32>
    tpu.vector_store %arg21[%c0_118, %c24_119], %222 {strides = array<i32>} : memref<8x32xf32, #tpu.memory_space<vmem>>, vector<1x8xf32>,
    %224 = vector.extract_strided_slice %215 {offsets = [4, 0], sizes = [1, 8], strides = [1, 1]} : vector<8x8xf32> to vector<1x8xf32>
    %c1_120 = arith.constant 1 : index
    %c0_121 = arith.constant 0 : index
    %225 = vector.load %arg21[%c1_120, %c0_121] : memref<8x32xf32, #tpu.memory_space<vmem>>, vector<1x8xf32>
    tpu.vector_store %arg21[%c1_120, %c0_121], %224 {strides = array<i32>} : memref<8x32xf32, #tpu.memory_space<vmem>>, vector<1x8xf32>,
    %226 = vector.extract_strided_slice %215 {offsets = [5, 0], sizes = [1, 8], strides = [1, 1]} : vector<8x8xf32> to vector<1x8xf32>
    %c1_122 = arith.constant 1 : index
    %c8_123 = arith.constant 8 : index
    %227 = vector.load %arg21[%c1_122, %c8_123] : memref<8x32xf32, #tpu.memory_space<vmem>>, vector<1x8xf32>
    tpu.vector_store %arg21[%c1_122, %c8_123], %226 {strides = array<i32>} : memref<8x32xf32, #tpu.memory_space<vmem>>, vector<1x8xf32>,
    %228 = vector.extract_strided_slice %215 {offsets = [6, 0], sizes = [1, 8], strides = [1, 1]} : vector<8x8xf32> to vector<1x8xf32>
    %c1_124 = arith.constant 1 : index
    %c16_125 = arith.constant 16 : index
    %229 = vector.load %arg21[%c1_124, %c16_125] : memref<8x32xf32, #tpu.memory_space<vmem>>, vector<1x8xf32>
    tpu.vector_store %arg21[%c1_124, %c16_125], %228 {strides = array<i32>} : memref<8x32xf32, #tpu.memory_space<vmem>>, vector<1x8xf32>,
    %230 = vector.extract_strided_slice %215 {offsets = [7, 0], sizes = [1, 8], strides = [1, 1]} : vector<8x8xf32> to vector<1x8xf32>
    %c1_126 = arith.constant 1 : index
    %c24_127 = arith.constant 24 : index
    %231 = vector.load %arg21[%c1_126, %c24_127] : memref<8x32xf32, #tpu.memory_space<vmem>>, vector<1x8xf32>
    tpu.vector_store %arg21[%c1_126, %c24_127], %230 {strides = array<i32>} : memref<8x32xf32, #tpu.memory_space<vmem>>, vector<1x8xf32>,
    %232 = vector.extract_strided_slice %195 {offsets = [0, 8], sizes = [8, 8], strides = [1, 1]} : vector<8x32xf32> to vector<8x8xf32>
    %cst_128 = arith.constant 0.353553385 : f32
    %233 = vector.broadcast %cst_128 : f32 to vector<8x8xf32>
    %234 = arith.mulf %232, %233 : vector<8x8xf32>
    %235 = vector.extract_strided_slice %198 {offsets = [0, 8], sizes = [1, 8], strides = [1, 1]} : vector<1x32xf32> to vector<1x8xf32>
    %236 = vector.extract_strided_slice %199 {offsets = [0, 8], sizes = [1, 8], strides = [1, 1]} : vector<1x32xf32> to vector<1x8xf32>
    %cst_129 = arith.constant dense<0.000000e+00> : vector<8x1xf32>
    %237 = tpu.matmul %234, %235, %cst_129 {dimension_numbers = #tpu.dot_dimension_numbers<[1], [1], [0], [0], [0, 0, 1, 0], [], []>} : vector<8x8xf32>, vector<1x8xf32>, vector<8x1xf32> -> vector<8x1xf32>
    %cst_130 = arith.constant dense<0xFF800000> : vector<8xf32>
    %238 = vector.multi_reduction <maximumf>, %237, %cst_130 [1] : vector<8x1xf32> to vector<8xf32>
    %239 = vector.shape_cast %238 : vector<8xf32> to vector<8x1xf32>
    %240 = arith.subf %237, %239 : vector<8x1xf32>
    %241 = math.exp %240 : vector<8x1xf32>
    %cst_131 = arith.constant dense<0.000000e+00> : vector<8xf32>
    %242 = vector.multi_reduction <add>, %241, %cst_131 [1] : vector<8x1xf32> to vector<8xf32>
    %243 = vector.shape_cast %242 : vector<8xf32> to vector<8x1xf32>
    %cst_132 = arith.constant dense<0.000000e+00> : vector<8x8xf32>
    %244 = tpu.matmul %241, %236, %cst_132 {dimension_numbers = #tpu.dot_dimension_numbers<[1], [0], [0], [1], [0, 0, 1, 1], [], []>} : vector<8x1xf32>, vector<1x8xf32>, vector<8x8xf32> -> vector<8x8xf32>
    %245 = tpu.reciprocal %243 {approx = true} : vector<8x1xf32> -> vector<8x1xf32>
    %246 = vector.broadcast %245 : vector<8x1xf32> to vector<8x8xf32>
    %247 = arith.mulf %244, %246 : vector<8x8xf32>
    %248 = vector.extract_strided_slice %247 {offsets = [0, 0], sizes = [1, 8], strides = [1, 1]} : vector<8x8xf32> to vector<1x8xf32>
    %c2_133 = arith.constant 2 : index
    %c0_134 = arith.constant 0 : index
    %249 = vector.load %arg21[%c2_133, %c0_134] : memref<8x32xf32, #tpu.memory_space<vmem>>, vector<1x8xf32>
    tpu.vector_store %arg21[%c2_133, %c0_134], %248 {strides = array<i32>} : memref<8x32xf32, #tpu.memory_space<vmem>>, vector<1x8xf32>,
    %250 = vector.extract_strided_slice %247 {offsets = [1, 0], sizes = [1, 8], strides = [1, 1]} : vector<8x8xf32> to vector<1x8xf32>
    %c2_135 = arith.constant 2 : index
    %c8_136 = arith.constant 8 : index
    %251 = vector.load %arg21[%c2_135, %c8_136] : memref<8x32xf32, #tpu.memory_space<vmem>>, vector<1x8xf32>
    tpu.vector_store %arg21[%c2_135, %c8_136], %250 {strides = array<i32>} : memref<8x32xf32, #tpu.memory_space<vmem>>, vector<1x8xf32>,
    %252 = vector.extract_strided_slice %247 {offsets = [2, 0], sizes = [1, 8], strides = [1, 1]} : vector<8x8xf32> to vector<1x8xf32>
    %c2_137 = arith.constant 2 : index
    %c16_138 = arith.constant 16 : index
    %253 = vector.load %arg21[%c2_137, %c16_138] : memref<8x32xf32, #tpu.memory_space<vmem>>, vector<1x8xf32>
    tpu.vector_store %arg21[%c2_137, %c16_138], %252 {strides = array<i32>} : memref<8x32xf32, #tpu.memory_space<vmem>>, vector<1x8xf32>,
    %254 = vector.extract_strided_slice %247 {offsets = [3, 0], sizes = [1, 8], strides = [1, 1]} : vector<8x8xf32> to vector<1x8xf32>
    %c2_139 = arith.constant 2 : index
    %c24_140 = arith.constant 24 : index
    %255 = vector.load %arg21[%c2_139, %c24_140] : memref<8x32xf32, #tpu.memory_space<vmem>>, vector<1x8xf32>
    tpu.vector_store %arg21[%c2_139, %c24_140], %254 {strides = array<i32>} : memref<8x32xf32, #tpu.memory_space<vmem>>, vector<1x8xf32>,
    %256 = vector.extract_strided_slice %247 {offsets = [4, 0], sizes = [1, 8], strides = [1, 1]} : vector<8x8xf32> to vector<1x8xf32>
    %c3_141 = arith.constant 3 : index
    %c0_142 = arith.constant 0 : index
    %257 = vector.load %arg21[%c3_141, %c0_142] : memref<8x32xf32, #tpu.memory_space<vmem>>, vector<1x8xf32>
    tpu.vector_store %arg21[%c3_141, %c0_142], %256 {strides = array<i32>} : memref<8x32xf32, #tpu.memory_space<vmem>>, vector<1x8xf32>,
    %258 = vector.extract_strided_slice %247 {offsets = [5, 0], sizes = [1, 8], strides = [1, 1]} : vector<8x8xf32> to vector<1x8xf32>
    %c3_143 = arith.constant 3 : index
    %c8_144 = arith.constant 8 : index
    %259 = vector.load %arg21[%c3_143, %c8_144] : memref<8x32xf32, #tpu.memory_space<vmem>>, vector<1x8xf32>
    tpu.vector_store %arg21[%c3_143, %c8_144], %258 {strides = array<i32>} : memref<8x32xf32, #tpu.memory_space<vmem>>, vector<1x8xf32>,
    %260 = vector.extract_strided_slice %247 {offsets = [6, 0], sizes = [1, 8], strides = [1, 1]} : vector<8x8xf32> to vector<1x8xf32>
    %c3_145 = arith.constant 3 : index
    %c16_146 = arith.constant 16 : index
    %261 = vector.load %arg21[%c3_145, %c16_146] : memref<8x32xf32, #tpu.memory_space<vmem>>, vector<1x8xf32>
    tpu.vector_store %arg21[%c3_145, %c16_146], %260 {strides = array<i32>} : memref<8x32xf32, #tpu.memory_space<vmem>>, vector<1x8xf32>,
    %262 = vector.extract_strided_slice %247 {offsets = [7, 0], sizes = [1, 8], strides = [1, 1]} : vector<8x8xf32> to vector<1x8xf32>
    %c3_147 = arith.constant 3 : index
    %c24_148 = arith.constant 24 : index
    %263 = vector.load %arg21[%c3_147, %c24_148] : memref<8x32xf32, #tpu.memory_space<vmem>>, vector<1x8xf32>
    tpu.vector_store %arg21[%c3_147, %c24_148], %262 {strides = array<i32>} : memref<8x32xf32, #tpu.memory_space<vmem>>, vector<1x8xf32>,
    %264 = vector.extract_strided_slice %195 {offsets = [0, 16], sizes = [8, 8], strides = [1, 1]} : vector<8x32xf32> to vector<8x8xf32>
    %cst_149 = arith.constant 0.353553385 : f32
    %265 = vector.broadcast %cst_149 : f32 to vector<8x8xf32>
    %266 = arith.mulf %264, %265 : vector<8x8xf32>
    %267 = vector.extract_strided_slice %198 {offsets = [0, 16], sizes = [1, 8], strides = [1, 1]} : vector<1x32xf32> to vector<1x8xf32>
    %268 = vector.extract_strided_slice %199 {offsets = [0, 16], sizes = [1, 8], strides = [1, 1]} : vector<1x32xf32> to vector<1x8xf32>
    %cst_150 = arith.constant dense<0.000000e+00> : vector<8x1xf32>
    %269 = tpu.matmul %266, %267, %cst_150 {dimension_numbers = #tpu.dot_dimension_numbers<[1], [1], [0], [0], [0, 0, 1, 0], [], []>} : vector<8x8xf32>, vector<1x8xf32>, vector<8x1xf32> -> vector<8x1xf32>
    %cst_151 = arith.constant dense<0xFF800000> : vector<8xf32>
    %270 = vector.multi_reduction <maximumf>, %269, %cst_151 [1] : vector<8x1xf32> to vector<8xf32>
    %271 = vector.shape_cast %270 : vector<8xf32> to vector<8x1xf32>
    %272 = arith.subf %269, %271 : vector<8x1xf32>
    %273 = math.exp %272 : vector<8x1xf32>
    %cst_152 = arith.constant dense<0.000000e+00> : vector<8xf32>
    %274 = vector.multi_reduction <add>, %273, %cst_152 [1] : vector<8x1xf32> to vector<8xf32>
    %275 = vector.shape_cast %274 : vector<8xf32> to vector<8x1xf32>
    %cst_153 = arith.constant dense<0.000000e+00> : vector<8x8xf32>
    %276 = tpu.matmul %273, %268, %cst_153 {dimension_numbers = #tpu.dot_dimension_numbers<[1], [0], [0], [1], [0, 0, 1, 1], [], []>} : vector<8x1xf32>, vector<1x8xf32>, vector<8x8xf32> -> vector<8x8xf32>
    %277 = tpu.reciprocal %275 {approx = true} : vector<8x1xf32> -> vector<8x1xf32>
    %278 = vector.broadcast %277 : vector<8x1xf32> to vector<8x8xf32>
    %279 = arith.mulf %276, %278 : vector<8x8xf32>
    %280 = vector.extract_strided_slice %279 {offsets = [0, 0], sizes = [1, 8], strides = [1, 1]} : vector<8x8xf32> to vector<1x8xf32>
    %c4_154 = arith.constant 4 : index
    %c0_155 = arith.constant 0 : index
    %281 = vector.load %arg21[%c4_154, %c0_155] : memref<8x32xf32, #tpu.memory_space<vmem>>, vector<1x8xf32>
    tpu.vector_store %arg21[%c4_154, %c0_155], %280 {strides = array<i32>} : memref<8x32xf32, #tpu.memory_space<vmem>>, vector<1x8xf32>,
    %282 = vector.extract_strided_slice %279 {offsets = [1, 0], sizes = [1, 8], strides = [1, 1]} : vector<8x8xf32> to vector<1x8xf32>
    %c4_156 = arith.constant 4 : index
    %c8_157 = arith.constant 8 : index
    %283 = vector.load %arg21[%c4_156, %c8_157] : memref<8x32xf32, #tpu.memory_space<vmem>>, vector<1x8xf32>
    tpu.vector_store %arg21[%c4_156, %c8_157], %282 {strides = array<i32>} : memref<8x32xf32, #tpu.memory_space<vmem>>, vector<1x8xf32>,
    %284 = vector.extract_strided_slice %279 {offsets = [2, 0], sizes = [1, 8], strides = [1, 1]} : vector<8x8xf32> to vector<1x8xf32>
    %c4_158 = arith.constant 4 : index
    %c16_159 = arith.constant 16 : index
    %285 = vector.load %arg21[%c4_158, %c16_159] : memref<8x32xf32, #tpu.memory_space<vmem>>, vector<1x8xf32>
    tpu.vector_store %arg21[%c4_158, %c16_159], %284 {strides = array<i32>} : memref<8x32xf32, #tpu.memory_space<vmem>>, vector<1x8xf32>,
    %286 = vector.extract_strided_slice %279 {offsets = [3, 0], sizes = [1, 8], strides = [1, 1]} : vector<8x8xf32> to vector<1x8xf32>
    %c4_160 = arith.constant 4 : index
    %c24_161 = arith.constant 24 : index
    %287 = vector.load %arg21[%c4_160, %c24_161] : memref<8x32xf32, #tpu.memory_space<vmem>>, vector<1x8xf32>
    tpu.vector_store %arg21[%c4_160, %c24_161], %286 {strides = array<i32>} : memref<8x32xf32, #tpu.memory_space<vmem>>, vector<1x8xf32>,
    %288 = vector.extract_strided_slice %279 {offsets = [4, 0], sizes = [1, 8], strides = [1, 1]} : vector<8x8xf32> to vector<1x8xf32>
    %c5_162 = arith.constant 5 : index
    %c0_163 = arith.constant 0 : index
    %289 = vector.load %arg21[%c5_162, %c0_163] : memref<8x32xf32, #tpu.memory_space<vmem>>, vector<1x8xf32>
    tpu.vector_store %arg21[%c5_162, %c0_163], %288 {strides = array<i32>} : memref<8x32xf32, #tpu.memory_space<vmem>>, vector<1x8xf32>,
    %290 = vector.extract_strided_slice %279 {offsets = [5, 0], sizes = [1, 8], strides = [1, 1]} : vector<8x8xf32> to vector<1x8xf32>
    %c5_164 = arith.constant 5 : index
    %c8_165 = arith.constant 8 : index
    %291 = vector.load %arg21[%c5_164, %c8_165] : memref<8x32xf32, #tpu.memory_space<vmem>>, vector<1x8xf32>
    tpu.vector_store %arg21[%c5_164, %c8_165], %290 {strides = array<i32>} : memref<8x32xf32, #tpu.memory_space<vmem>>, vector<1x8xf32>,
    %292 = vector.extract_strided_slice %279 {offsets = [6, 0], sizes = [1, 8], strides = [1, 1]} : vector<8x8xf32> to vector<1x8xf32>
    %c5_166 = arith.constant 5 : index
    %c16_167 = arith.constant 16 : index
    %293 = vector.load %arg21[%c5_166, %c16_167] : memref<8x32xf32, #tpu.memory_space<vmem>>, vector<1x8xf32>
    tpu.vector_store %arg21[%c5_166, %c16_167], %292 {strides = array<i32>} : memref<8x32xf32, #tpu.memory_space<vmem>>, vector<1x8xf32>,
    %294 = vector.extract_strided_slice %279 {offsets = [7, 0], sizes = [1, 8], strides = [1, 1]} : vector<8x8xf32> to vector<1x8xf32>
    %c5_168 = arith.constant 5 : index
    %c24_169 = arith.constant 24 : index
    %295 = vector.load %arg21[%c5_168, %c24_169] : memref<8x32xf32, #tpu.memory_space<vmem>>, vector<1x8xf32>
    tpu.vector_store %arg21[%c5_168, %c24_169], %294 {strides = array<i32>} : memref<8x32xf32, #tpu.memory_space<vmem>>, vector<1x8xf32>,
    %296 = vector.extract_strided_slice %195 {offsets = [0, 24], sizes = [8, 8], strides = [1, 1]} : vector<8x32xf32> to vector<8x8xf32>
    %cst_170 = arith.constant 0.353553385 : f32
    %297 = vector.broadcast %cst_170 : f32 to vector<8x8xf32>
    %298 = arith.mulf %296, %297 : vector<8x8xf32>
    %299 = vector.extract_strided_slice %198 {offsets = [0, 24], sizes = [1, 8], strides = [1, 1]} : vector<1x32xf32> to vector<1x8xf32>
    %300 = vector.extract_strided_slice %199 {offsets = [0, 24], sizes = [1, 8], strides = [1, 1]} : vector<1x32xf32> to vector<1x8xf32>
    %cst_171 = arith.constant dense<0.000000e+00> : vector<8x1xf32>
    %301 = tpu.matmul %298, %299, %cst_171 {dimension_numbers = #tpu.dot_dimension_numbers<[1], [1], [0], [0], [0, 0, 1, 0], [], []>} : vector<8x8xf32>, vector<1x8xf32>, vector<8x1xf32> -> vector<8x1xf32>
    %cst_172 = arith.constant dense<0xFF800000> : vector<8xf32>
    %302 = vector.multi_reduction <maximumf>, %301, %cst_172 [1] : vector<8x1xf32> to vector<8xf32>
    %303 = vector.shape_cast %302 : vector<8xf32> to vector<8x1xf32>
    %304 = arith.subf %301, %303 : vector<8x1xf32>
    %305 = math.exp %304 : vector<8x1xf32>
    %cst_173 = arith.constant dense<0.000000e+00> : vector<8xf32>
    %306 = vector.multi_reduction <add>, %305, %cst_173 [1] : vector<8x1xf32> to vector<8xf32>
    %307 = vector.shape_cast %306 : vector<8xf32> to vector<8x1xf32>
    %cst_174 = arith.constant dense<0.000000e+00> : vector<8x8xf32>
    %308 = tpu.matmul %305, %300, %cst_174 {dimension_numbers = #tpu.dot_dimension_numbers<[1], [0], [0], [1], [0, 0, 1, 1], [], []>} : vector<8x1xf32>, vector<1x8xf32>, vector<8x8xf32> -> vector<8x8xf32>
    %309 = tpu.reciprocal %307 {approx = true} : vector<8x1xf32> -> vector<8x1xf32>
    %310 = vector.broadcast %309 : vector<8x1xf32> to vector<8x8xf32>
    %311 = arith.mulf %308, %310 : vector<8x8xf32>
    %312 = vector.extract_strided_slice %311 {offsets = [0, 0], sizes = [1, 8], strides = [1, 1]} : vector<8x8xf32> to vector<1x8xf32>
    %c6_175 = arith.constant 6 : index
    %c0_176 = arith.constant 0 : index
    %313 = vector.load %arg21[%c6_175, %c0_176] : memref<8x32xf32, #tpu.memory_space<vmem>>, vector<1x8xf32>
    tpu.vector_store %arg21[%c6_175, %c0_176], %312 {strides = array<i32>} : memref<8x32xf32, #tpu.memory_space<vmem>>, vector<1x8xf32>,
    %314 = vector.extract_strided_slice %311 {offsets = [1, 0], sizes = [1, 8], strides = [1, 1]} : vector<8x8xf32> to vector<1x8xf32>
    %c6_177 = arith.constant 6 : index
    %c8_178 = arith.constant 8 : index
    %315 = vector.load %arg21[%c6_177, %c8_178] : memref<8x32xf32, #tpu.memory_space<vmem>>, vector<1x8xf32>
    tpu.vector_store %arg21[%c6_177, %c8_178], %314 {strides = array<i32>} : memref<8x32xf32, #tpu.memory_space<vmem>>, vector<1x8xf32>,
    %316 = vector.extract_strided_slice %311 {offsets = [2, 0], sizes = [1, 8], strides = [1, 1]} : vector<8x8xf32> to vector<1x8xf32>
    %c6_179 = arith.constant 6 : index
    %c16_180 = arith.constant 16 : index
    %317 = vector.load %arg21[%c6_179, %c16_180] : memref<8x32xf32, #tpu.memory_space<vmem>>, vector<1x8xf32>
    tpu.vector_store %arg21[%c6_179, %c16_180], %316 {strides = array<i32>} : memref<8x32xf32, #tpu.memory_space<vmem>>, vector<1x8xf32>,
    %318 = vector.extract_strided_slice %311 {offsets = [3, 0], sizes = [1, 8], strides = [1, 1]} : vector<8x8xf32> to vector<1x8xf32>
    %c6_181 = arith.constant 6 : index
    %c24_182 = arith.constant 24 : index
    %319 = vector.load %arg21[%c6_181, %c24_182] : memref<8x32xf32, #tpu.memory_space<vmem>>, vector<1x8xf32>
    tpu.vector_store %arg21[%c6_181, %c24_182], %318 {strides = array<i32>} : memref<8x32xf32, #tpu.memory_space<vmem>>, vector<1x8xf32>,
    %320 = vector.extract_strided_slice %311 {offsets = [4, 0], sizes = [1, 8], strides = [1, 1]} : vector<8x8xf32> to vector<1x8xf32>
    %c7_183 = arith.constant 7 : index
    %c0_184 = arith.constant 0 : index
    %321 = vector.load %arg21[%c7_183, %c0_184] : memref<8x32xf32, #tpu.memory_space<vmem>>, vector<1x8xf32>
    tpu.vector_store %arg21[%c7_183, %c0_184], %320 {strides = array<i32>} : memref<8x32xf32, #tpu.memory_space<vmem>>, vector<1x8xf32>,
    %322 = vector.extract_strided_slice %311 {offsets = [5, 0], sizes = [1, 8], strides = [1, 1]} : vector<8x8xf32> to vector<1x8xf32>
    %c7_185 = arith.constant 7 : index
    %c8_186 = arith.constant 8 : index
    %323 = vector.load %arg21[%c7_185, %c8_186] : memref<8x32xf32, #tpu.memory_space<vmem>>, vector<1x8xf32>
    tpu.vector_store %arg21[%c7_185, %c8_186], %322 {strides = array<i32>} : memref<8x32xf32, #tpu.memory_space<vmem>>, vector<1x8xf32>,
    %324 = vector.extract_strided_slice %311 {offsets = [6, 0], sizes = [1, 8], strides = [1, 1]} : vector<8x8xf32> to vector<1x8xf32>
    %c7_187 = arith.constant 7 : index
    %c16_188 = arith.constant 16 : index
    %325 = vector.load %arg21[%c7_187, %c16_188] : memref<8x32xf32, #tpu.memory_space<vmem>>, vector<1x8xf32>
    tpu.vector_store %arg21[%c7_187, %c16_188], %324 {strides = array<i32>} : memref<8x32xf32, #tpu.memory_space<vmem>>, vector<1x8xf32>,
    %326 = vector.extract_strided_slice %311 {offsets = [7, 0], sizes = [1, 8], strides = [1, 1]} : vector<8x8xf32> to vector<1x8xf32>
    %c7_189 = arith.constant 7 : index
    %c24_190 = arith.constant 24 : index
    %327 = vector.load %arg21[%c7_189, %c24_190] : memref<8x32xf32, #tpu.memory_space<vmem>>, vector<1x8xf32>
    tpu.vector_store %arg21[%c7_189, %c24_190], %326 {strides = array<i32>} : memref<8x32xf32, #tpu.memory_space<vmem>>, vector<1x8xf32>,
    %c0_191 = arith.constant 0 : index
    %c0_192 = arith.constant 0 : index
    %328 = vector.load %arg21[%c0_191, %c0_192] : memref<8x32xf32, #tpu.memory_space<vmem>>, vector<8x32xf32>
    %c0_193 = arith.constant 0 : index
    %c0_194 = arith.constant 0 : index
    %329 = vector.load %arg10[%c0_193, %c0_194] : memref<32x32xf32, #tpu.memory_space<vmem>>, vector<32x32xf32>
    %cst_195 = arith.constant dense<0.000000e+00> : vector<8x32xf32>
    %330 = tpu.matmul %328, %329, %cst_195 {dimension_numbers = #tpu.dot_dimension_numbers<[1], [0], [0], [1], [0, 0, 1, 1], [], []>} : vector<8x32xf32>, vector<32x32xf32>, vector<8x32xf32> -> vector<8x32xf32>
    %c0_196 = arith.constant 0 : index
    %c0_197 = arith.constant 0 : index
    %331 = vector.load %arg11[%c0_196, %c0_197] : memref<1x32xf32, #tpu.memory_space<vmem>>, vector<1x32xf32>
    %332 = vector.broadcast %331 : vector<1x32xf32> to vector<8x32xf32>
    %333 = arith.addf %330, %332 : vector<8x32xf32>
    %c0_198 = arith.constant 0 : index
    %c0_199 = arith.constant 0 : index
    %334 = vector.load %arg12[%c0_198, %c0_199] : memref<1x32xf32, #tpu.memory_space<vmem>>, vector<1x32xf32>
    %c0_200 = arith.constant 0 : index
    %c0_201 = arith.constant 0 : index
    %335 = vector.load %arg13[%c0_200, %c0_201] : memref<1x32xf32, #tpu.memory_space<vmem>>, vector<1x32xf32>
    %336 = arith.addf %193, %333 : vector<8x32xf32>
    %cst_202 = arith.constant dense<0.000000e+00> : vector<8xf32>
    %337 = vector.multi_reduction <add>, %336, %cst_202 [1] : vector<8x32xf32> to vector<8xf32>
    %338 = vector.shape_cast %337 : vector<8xf32> to vector<8x1xf32>
    %cst_203 = arith.constant 3.200000e+01 : f32
    %339 = vector.broadcast %cst_203 : f32 to vector<8x1xf32>
    %340 = arith.divf %338, %339 : vector<8x1xf32>
    %341 = vector.broadcast %340 : vector<8x1xf32> to vector<8x32xf32>
    %342 = arith.subf %336, %341 : vector<8x32xf32>
    %343 = vector.broadcast %340 : vector<8x1xf32> to vector<8x32xf32>
    %344 = arith.subf %336, %343 : vector<8x32xf32>
    %345 = arith.mulf %342, %344 : vector<8x32xf32>
    %cst_204 = arith.constant dense<0.000000e+00> : vector<8xf32>
    %346 = vector.multi_reduction <add>, %345, %cst_204 [1] : vector<8x32xf32> to vector<8xf32>
    %347 = vector.shape_cast %346 : vector<8xf32> to vector<8x1xf32>
    %cst_205 = arith.constant 3.200000e+01 : f32
    %348 = vector.broadcast %cst_205 : f32 to vector<8x1xf32>
    %349 = arith.divf %347, %348 : vector<8x1xf32>
    %350 = vector.broadcast %340 : vector<8x1xf32> to vector<8x32xf32>
    %351 = arith.subf %336, %350 : vector<8x32xf32>
    %cst_206 = arith.constant 9.99999974E-6 : f32
    %352 = vector.broadcast %cst_206 : f32 to vector<8x1xf32>
    %353 = arith.addf %349, %352 : vector<8x1xf32>
    %354 = math.rsqrt %353 : vector<8x1xf32>
    %355 = vector.broadcast %354 : vector<8x1xf32> to vector<8x32xf32>
    %356 = arith.mulf %351, %355 : vector<8x32xf32>
    %357 = vector.broadcast %334 : vector<1x32xf32> to vector<8x32xf32>
    %358 = arith.mulf %356, %357 : vector<8x32xf32>
    %359 = vector.broadcast %335 : vector<1x32xf32> to vector<8x32xf32>
    %360 = arith.addf %358, %359 : vector<8x32xf32>
    %c0_207 = arith.constant 0 : index
    %c0_208 = arith.constant 0 : index
    %361 = vector.load %arg14[%c0_207, %c0_208] : memref<32x2048xf32, #tpu.memory_space<vmem>>, vector<32x2048xf32>
    %cst_209 = arith.constant dense<0.000000e+00> : vector<8x2048xf32>
    %362 = tpu.matmul %360, %361, %cst_209 {dimension_numbers = #tpu.dot_dimension_numbers<[1], [0], [0], [1], [0, 0, 1, 1], [], []>} : vector<8x32xf32>, vector<32x2048xf32>, vector<8x2048xf32> -> vector<8x2048xf32>
    %c0_210 = arith.constant 0 : index
    %c0_211 = arith.constant 0 : index
    %363 = vector.load %arg15[%c0_210, %c0_211] : memref<1x2048xf32, #tpu.memory_space<vmem>>, vector<1x2048xf32>
    %364 = vector.broadcast %363 : vector<1x2048xf32> to vector<8x2048xf32>
    %365 = arith.addf %362, %364 : vector<8x2048xf32>
    %cst_212 = arith.constant 0.000000e+00 : f32
    %366 = vector.broadcast %cst_212 : f32 to vector<8x2048xf32>
    %367 = arith.maximumf %365, %366 : vector<8x2048xf32>
    %c0_213 = arith.constant 0 : index
    %c0_214 = arith.constant 0 : index
    %368 = vector.load %arg16[%c0_213, %c0_214] : memref<2048x32xf32, #tpu.memory_space<vmem>>, vector<2048x32xf32>
    %cst_215 = arith.constant dense<0.000000e+00> : vector<8x32xf32>
    %369 = tpu.matmul %367, %368, %cst_215 {dimension_numbers = #tpu.dot_dimension_numbers<[1], [0], [0], [1], [0, 0, 1, 1], [], []>} : vector<8x2048xf32>, vector<2048x32xf32>, vector<8x32xf32> -> vector<8x32xf32>
    %c0_216 = arith.constant 0 : index
    %c0_217 = arith.constant 0 : index
    %370 = vector.load %arg17[%c0_216, %c0_217] : memref<1x32xf32, #tpu.memory_space<vmem>>, vector<1x32xf32>
    %371 = vector.broadcast %370 : vector<1x32xf32> to vector<8x32xf32>
    %372 = arith.addf %369, %371 : vector<8x32xf32>
    %c0_218 = arith.constant 0 : index
    %c0_219 = arith.constant 0 : index
    %373 = vector.load %arg18[%c0_218, %c0_219] : memref<1x32xf32, #tpu.memory_space<vmem>>, vector<1x32xf32>
    %c0_220 = arith.constant 0 : index
    %c0_221 = arith.constant 0 : index
    %374 = vector.load %arg19[%c0_220, %c0_221] : memref<1x32xf32, #tpu.memory_space<vmem>>, vector<1x32xf32>
    %375 = arith.addf %360, %372 : vector<8x32xf32>
    %cst_222 = arith.constant dense<0.000000e+00> : vector<8xf32>
    %376 = vector.multi_reduction <add>, %375, %cst_222 [1] : vector<8x32xf32> to vector<8xf32>
    %377 = vector.shape_cast %376 : vector<8xf32> to vector<8x1xf32>
    %cst_223 = arith.constant 3.200000e+01 : f32
    %378 = vector.broadcast %cst_223 : f32 to vector<8x1xf32>
    %379 = arith.divf %377, %378 : vector<8x1xf32>
    %380 = vector.broadcast %379 : vector<8x1xf32> to vector<8x32xf32>
    %381 = arith.subf %375, %380 : vector<8x32xf32>
    %382 = vector.broadcast %379 : vector<8x1xf32> to vector<8x32xf32>
    %383 = arith.subf %375, %382 : vector<8x32xf32>
    %384 = arith.mulf %381, %383 : vector<8x32xf32>
    %cst_224 = arith.constant dense<0.000000e+00> : vector<8xf32>
    %385 = vector.multi_reduction <add>, %384, %cst_224 [1] : vector<8x32xf32> to vector<8xf32>
    %386 = vector.shape_cast %385 : vector<8xf32> to vector<8x1xf32>
    %cst_225 = arith.constant 3.200000e+01 : f32
    %387 = vector.broadcast %cst_225 : f32 to vector<8x1xf32>
    %388 = arith.divf %386, %387 : vector<8x1xf32>
    %389 = vector.broadcast %379 : vector<8x1xf32> to vector<8x32xf32>
    %390 = arith.subf %375, %389 : vector<8x32xf32>
    %cst_226 = arith.constant 9.99999974E-6 : f32
    %391 = vector.broadcast %cst_226 : f32 to vector<8x1xf32>
    %392 = arith.addf %388, %391 : vector<8x1xf32>
    %393 = math.rsqrt %392 : vector<8x1xf32>
    %394 = vector.broadcast %393 : vector<8x1xf32> to vector<8x32xf32>
    %395 = arith.mulf %390, %394 : vector<8x32xf32>
    %396 = vector.broadcast %373 : vector<1x32xf32> to vector<8x32xf32>
    %397 = arith.mulf %395, %396 : vector<8x32xf32>
    %398 = vector.broadcast %374 : vector<1x32xf32> to vector<8x32xf32>
    %399 = arith.addf %397, %398 : vector<8x32xf32>
    %c0_227 = arith.constant 0 : index
    %c0_228 = arith.constant 0 : index
    %c0_229 = arith.constant 0 : index
    %400 = vector.load %arg20[%c0_227, %c0_228, %c0_229] : memref<1x8x32xf32, #tpu.memory_space<vmem>>, vector<1x8x32xf32>
    %401 = vector.shape_cast %400 : vector<1x8x32xf32> to vector<8x32xf32>
    %402 = vector.shape_cast %399 : vector<8x32xf32> to vector<1x8x32xf32>
    tpu.vector_store %arg20[%c0_227, %c0_228, %c0_229], %402 {strides = array<i32>} : memref<1x8x32xf32, #tpu.memory_space<vmem>>, vector<1x8x32xf32>,
    return
  }
  func.func @transform_0(%arg0: i32) -> (i32, i32, i32) {
    %c0_i32 = arith.constant 0 : i32
    %c0_i32_0 = arith.constant 0 : i32
    %c0_i32_1 = arith.constant 0 : i32
    return %arg0, %c0_i32, %c0_i32_0 : i32, i32, i32
  }
  func.func @transform_1(%arg0: i32) -> (i32, i32, i32) {
    %c0_i32 = arith.constant 0 : i32
    %c0_i32_0 = arith.constant 0 : i32
    %c0_i32_1 = arith.constant 0 : i32
    return %arg0, %c0_i32, %c0_i32_0 : i32, i32, i32
  }
  func.func @transform_2(%arg0: i32) -> (i32, i32) {
    %c0_i32 = arith.constant 0 : i32
    %c0_i32_0 = arith.constant 0 : i32
    %c0_i32_1 = arith.constant 0 : i32
    return %c0_i32, %c0_i32_0 : i32, i32
  }
  func.func @transform_3(%arg0: i32) -> (i32, i32) {
    %c0_i32 = arith.constant 0 : i32
    %c0_i32_0 = arith.constant 0 : i32
    %c0_i32_1 = arith.constant 0 : i32
    return %c0_i32, %c0_i32_0 : i32, i32
  }
  func.func @transform_4(%arg0: i32) -> (i32, i32) {
    %c0_i32 = arith.constant 0 : i32
    %c0_i32_0 = arith.constant 0 : i32
    %c0_i32_1 = arith.constant 0 : i32
    return %c0_i32, %c0_i32_0 : i32, i32
  }
  func.func @transform_5(%arg0: i32) -> (i32, i32) {
    %c0_i32 = arith.constant 0 : i32
    %c0_i32_0 = arith.constant 0 : i32
    %c0_i32_1 = arith.constant 0 : i32
    return %c0_i32, %c0_i32_0 : i32, i32
  }
  func.func @transform_6(%arg0: i32) -> (i32, i32) {
    %c0_i32 = arith.constant 0 : i32
    %c0_i32_0 = arith.constant 0 : i32
    %c0_i32_1 = arith.constant 0 : i32
    return %c0_i32, %c0_i32_0 : i32, i32
  }
  func.func @transform_7(%arg0: i32) -> (i32, i32) {
    %c0_i32 = arith.constant 0 : i32
    %c0_i32_0 = arith.constant 0 : i32
    %c0_i32_1 = arith.constant 0 : i32
    return %c0_i32, %c0_i32_0 : i32, i32
  }
  func.func @transform_8(%arg0: i32) -> (i32, i32) {
    %c0_i32 = arith.constant 0 : i32
    %c0_i32_0 = arith.constant 0 : i32
    %c0_i32_1 = arith.constant 0 : i32
    return %c0_i32, %c0_i32_0 : i32, i32
  }
  func.func @transform_9(%arg0: i32) -> (i32, i32) {
    %c0_i32 = arith.constant 0 : i32
    %c0_i32_0 = arith.constant 0 : i32
    %c0_i32_1 = arith.constant 0 : i32
    return %c0_i32, %c0_i32_0 : i32, i32
  }
  func.func @transform_10(%arg0: i32) -> (i32, i32) {
    %c0_i32 = arith.constant 0 : i32
    %c0_i32_0 = arith.constant 0 : i32
    %c0_i32_1 = arith.constant 0 : i32
    return %c0_i32, %c0_i32_0 : i32, i32
  }
  func.func @transform_11(%arg0: i32) -> (i32, i32) {
    %c0_i32 = arith.constant 0 : i32
    %c0_i32_0 = arith.constant 0 : i32
    %c0_i32_1 = arith.constant 0 : i32
    return %c0_i32, %c0_i32_0 : i32, i32
  }
  func.func @transform_12(%arg0: i32) -> (i32, i32) {
    %c0_i32 = arith.constant 0 : i32
    %c0_i32_0 = arith.constant 0 : i32
    %c0_i32_1 = arith.constant 0 : i32
    return %c0_i32, %c0_i32_0 : i32, i32
  }
  func.func @transform_13(%arg0: i32) -> (i32, i32) {
    %c0_i32 = arith.constant 0 : i32
    %c0_i32_0 = arith.constant 0 : i32
    %c0_i32_1 = arith.constant 0 : i32
    return %c0_i32, %c0_i32_0 : i32, i32
  }
  func.func @transform_14(%arg0: i32) -> (i32, i32) {
    %c0_i32 = arith.constant 0 : i32
    %c0_i32_0 = arith.constant 0 : i32
    %c0_i32_1 = arith.constant 0 : i32
    return %c0_i32, %c0_i32_0 : i32, i32
  }
  func.func @transform_15(%arg0: i32) -> (i32, i32) {
    %c0_i32 = arith.constant 0 : i32
    %c0_i32_0 = arith.constant 0 : i32
    %c0_i32_1 = arith.constant 0 : i32
    return %c0_i32, %c0_i32_0 : i32, i32
  }
  func.func @transform_16(%arg0: i32) -> (i32, i32) {
    %c0_i32 = arith.constant 0 : i32
    %c0_i32_0 = arith.constant 0 : i32
    %c0_i32_1 = arith.constant 0 : i32
    return %c0_i32, %c0_i32_0 : i32, i32
  }
  func.func @transform_17(%arg0: i32) -> (i32, i32) {
    %c0_i32 = arith.constant 0 : i32
    %c0_i32_0 = arith.constant 0 : i32
    %c0_i32_1 = arith.constant 0 : i32
    return %c0_i32, %c0_i32_0 : i32, i32
  }
  func.func @transform_18(%arg0: i32) -> (i32, i32) {
    %c0_i32 = arith.constant 0 : i32
    %c0_i32_0 = arith.constant 0 : i32
    %c0_i32_1 = arith.constant 0 : i32
    return %c0_i32, %c0_i32_0 : i32, i32
  }
  func.func @transform_19(%arg0: i32) -> (i32, i32, i32) {
    %c0_i32 = arith.constant 0 : i32
    %c0_i32_0 = arith.constant 0 : i32
    %c0_i32_1 = arith.constant 0 : i32
    return %arg0, %c0_i32, %c0_i32_0 : i32, i32, i32
  }
}

</mosaic_0001>

<bundles_post_ra>
// kernel: transformer_decoder_forward.5
= control target key start
LH: loop header
LB: loop body
LE: loop exit
PB: predicated region body
PF: predicated region fallthrough
CT: control target
= control target key end

     0   :  { %vm28_vm0 = vcmask 261120   ;;  %s240_s0 = inlined_call_operand.vmem [shape: f32[16,32], index: 0, kind: input, shape index: {}]   ;;  %s241_s1 = inlined_call_operand.vmem [shape: f32[32,16], index: 1, kind: input, shape index: {}]   ;;  %s242_s2 = inlined_call_operand.vmem [shape: f32[1,16], index: 2, kind: input, shape index: {}]   ;;  %s243_s3 = inlined_call_operand.hbm [shape: f32[16,16], index: 3, kind: output, shape index: {}]  }
   0x1   :  { %v17_v0 = vld [vmem:[%s241_s1] sm:$0xff]  ;;  %v18_v1 = vld [vmem:[%s241_s1 + $0x8] sm:$0xff]  ;;  %v19_v2 = vld [vmem:[%s241_s1 + $0x10] sm:$0xff] }
   0x2   :  { %v149_v3 = vpack.c.bf16 %v18_v1, %v17_v0  ;;  %v20_v4 = vld [vmem:[%s241_s1 + $0x18] sm:$0xff]  ;;  %v15_v5 = vld [vmem:[%s240_s0] sm:$0xff] }
   0x3   :  { %v153_v6 = vpack.c.bf16 %v20_v4, %v19_v2  ;;  %146 = vmatprep.mubr.msk.f32.mxu0 %vm28_vm0, %v15_v5 }
   0x4   :  { %8 = vsyncpa [#allocation3], 0  ;;  %150 = vmatprep.subr.bf16.mxu0 %v149_v3  ;;  %v16_v7 = vld [vmem:[%s240_s0 + $0x8] sm:$0xff]  ;;  %v129_v8 = vld [vmem:[%s242_s2] ss:$0 sm:$0xff]  ;;  %s184_s1 = smov [#allocation2]  }
   0x5   :  { %152 = vmatpush3.bf16.msra.mxu0 %v149_v3  ;;  %s118_s26 = sshll.u32 %s184_s1, 4  ;;  %vm110_vm1 = vcmask 130048   ;;  %s119_s26 = int_to_ptr.vmem [resolvable:$true] %s118_s26 }
   0x6   :  { %154 = vmatprep.subr.bf16.mxu0 %v153_v6  ;;  %s160_s27 = scalar_lea.vmem %s119_s26, 256  ;;  %p165_p1 = scmp.lt.s32.totalorder %s119_s26, %s119_s26 }
   0x7   :  { %p161_p0 = scmp.ne.s32.totalorder %s119_s26, %s160_s27  ;;  %p166_p2 = scmp.lt.s32.totalorder %s160_s27, %s160_s27 }
   0x9   :  { %156 = vmatpush3.bf16.msra.mxu0 %v153_v6  ;;  %p167_p3 = por %p166_p2, %p165_p1 }
   0xb   :  { %p168_p4 = pnand %p167_p3, %p161_p0 }
   0xc   :  { %147 = vmatmul.mubr.msk.f32.vlgmr.msra.gmra.mrb[0].mxu0 %vm28_vm0, %v16_v7 }
  0xdf   :  { %v148_v9 = vpop.f32.mrb[0].mxu0 }
  0xe0   :  { %v107_v10 = vadd.f32 %v148_v9, %v129_v8  ;;  %v101_v11 = vpop.f32.mrb[1].mxu0 }
  0xe1   :  { %v102_v12 = vadd.f32 %v129_v8, %v101_v11 }
  0xe2   :  { %112 = vst.msk [vmem:[#allocation2 + $0x8] sm:$0xff] %vm110_vm1, %v107_v10 }
  0xe3   :  { %111 = vst.msk [vmem:[#allocation2] sm:$0xff] %vm110_vm1, %v102_v12 }
  0xe4   :  { %171 = shalt.err (!%p168_p4)
}
  0xe5   :  { %s172_s2 = scalar_lea.hbm %s243_s3, 256 }
  0xe6   :  { %p173_p5 = scmp.ne.s32.totalorder %s243_s3, %s172_s2  ;;  %p176_p6 = scmp.lt.u32.totalorder %s172_s2, %s243_s3 }
  0xe8   :  { %p178_p7 = pnand %p176_p6, %p173_p5 }
  0xea   :  { %181 = shalt.err (!%p178_p7)
}
  0xeb   :  { %s185_s6 = smov 128   ;;  %s186_s7 = smov 8  }
  0xec   :  { %124 = dma.vmem_to_hbm [thread:$0]  %s119_s26, 256, %s243_s3, [#allocation3], %s185_s6, %s185_s6, %s186_s7  }
  0xed   :  { %182 = dma.done.wait [#allocation3], 256  }
  0xee   :  { %183 = vsyncadd [#allocation3], 4294967040 }
  0xef   :  { %128 = vsyncpa [#allocation3], 1 }

// kernel: transformer_decoder_forward.3
= control target key start
LH: loop header
LB: loop body
LE: loop exit
PB: predicated region body
PF: predicated region fallthrough
CT: control target
= control target key end

     0   :  { %s6384_s0 = inlined_call_operand.vmem [shape: f32[2,8,32], index: 0, kind: input, shape index: {}]   ;;  %s6385_s1 = inlined_call_operand.vmem [shape: f32[2,1,32], index: 1, kind: input, shape index: {}]   ;;  %s6386_s2 = inlined_call_operand.vmem [shape: f32[32,96], index: 2, kind: input, shape index: {}]   ;;  %s6387_s3 = inlined_call_operand.vmem [shape: f32[32,32], index: 3, kind: input, shape index: {}]   ;;  %s6388_s4 = inlined_call_operand.vmem [shape: f32[1,32], index: 4, kind: input, shape index: {}]   ;;  %s6389_s5 = inlined_call_operand.vmem [shape: f32[1,32], index: 5, kind: input, shape index: {}]   ;;  %s6390_s6 = inlined_call_operand.vmem [shape: f32[1,32], index: 6, kind: input, shape index: {}]   ;;  %s6391_s7 = inlined_call_operand.vmem [shape: f32[32,32], index: 7, kind: input, shape index: {}]   ;;  %s6392_s8 = inlined_call_operand.vmem [shape: f32[32,64], index: 8, kind: input, shape index: {}]   ;;  %s6393_s9 = inlined_call_operand.vmem [shape: f32[32,32], index: 9, kind: input, shape index: {}]   ;;  %s6394_s10 = inlined_call_operand.vmem [shape: f32[1,32], index: 10, kind: input, shape index: {}]   ;;  %s6395_s11 = inlined_call_operand.vmem [shape: f32[1,32], index: 11, kind: input, shape index: {}]   ;;  %s6396_s12 = inlined_call_operand.vmem [shape: f32[1,32], index: 12, kind: input, shape index: {}]   ;;  %s6397_s13 = inlined_call_operand.vmem [shape: f32[32,2048], index: 13, kind: input, shape index: {}]   ;;  %s6398_s14 = inlined_call_operand.vmem [shape: f32[1,2048], index: 14, kind: input, shape index: {}]   ;;  %s6399_s15 = inlined_call_operand.vmem [shape: f32[2048,32], index: 15, kind: input, shape index: {}]   ;;  %s6400_s16 = inlined_call_operand.vmem [shape: f32[1,32], index: 16, kind: input, shape index: {}]   ;;  %s6401_s17 = inlined_call_operand.vmem [shape: f32[1,32], index: 17, kind: input, shape index: {}]   ;;  %s6402_s18 = inlined_call_operand.vmem [shape: f32[1,32], index: 18, kind: input, shape index: {}]   ;;  %s6403_s19 = inlined_call_operand.vmem [shape: f32[2,8,32], index: 19, kind: output, shape index: {}]  }
   0x1   :  { %6421 = sst [smem:[#allocation3_spill]] %s6384_s0  ;;  %s4947_s0 = smov 0  }
   0x2   :  { %6422 = sst [smem:[#allocation4_spill]] %s6385_s1 }
   0x3   :  { %6423 = sst [smem:[#allocation5_spill]] %s6386_s2 }
   0x4   :  { %6424 = sst [smem:[#allocation6_spill]] %s6387_s3 }
   0x5 LB: > { %s3914_s30 = sadd.s32 4294967295, %s4828_s0   ;;  %p3918_p0 = scmp.ge.s32.totalorder %s4828_s0, 1  ;;  %s4828_s0 = sphi %s4947_s0, %s29_s0  }
   0x6   : > { %p544_p1 = scmp.lt.s32.totalorder %s4828_s0, 3 }
   0x8   : > { %p545_p2 = pnand %p3918_p0, %p544_p1 }
   0x9   : > { %s6425_s1 = sld [smem:[#allocation5_spill]] (!%p545_p2)  ;;  %v4830_v3 = vmov (!%p545_p2), 0.0|0.0   ;;  %vm4831_vm0 = vmmov (!%p545_p2), 0   ;;  %v4832_v6 = vmov (!%p545_p2), 0.0   ;;  %p601_p3 = scmp.lt.s32.totalorder (!%p545_p2), %s3914_s30, 1  ;;  %vm618_vm1 = vcmask (!%p545_p2), 261120  }
   0xa   : > { %548 = sbr.rel (%p545_p2) target bundleno = 4213 (0x1075), region = 96  ;;  %4409 = vmatprep.subr.bf16.mxu0 (!%p545_p2), %v4830_v3  ;;  %4302 = vmatprep.mubr.msk.f32.mxu0 (!%p545_p2), %vm4831_vm0, %v4832_v6  ;;  %s6426_s29 = sld [smem:[#allocation3_spill]] (!%p545_p2)  ;;  %vm696_vm2 = vcmask (!%p545_p2), 64512   ;;  %v772_v20 = vlaneseq (!%p545_p2)  ;;  %vm865_vm4 = vcmask (!%p545_p2), 57344   ;;  %vm883_vm5 = vcmask (!%p545_p2), 61444  }
   0xb   : > { %4305 = vmatprep.subr.mxu1 (!%p545_p2), %v4832_v6  ;;  %4307 = vmatprep.mubr.msk.f32.mxu1 (!%p545_p2), %vm4831_vm0, %v4832_v6  ;;  %s4833_s21 = smov (!%p545_p2), 64   ;;  %s6410_s22 = smov (!%p545_p2), 96   ;;  %vm871_vm6 = vcmask (!%p545_p2), 123969   ;;  %vm885_vm7 = vcmask (!%p545_p2), 128069   ;;  %vm876_vm8 = vcmask (!%p545_p2), 190594   ;;  %vm887_vm9 = vcmask (!%p545_p2), 194694  }
   0xc   : > { %s6407_s2 = smov (!%p545_p2), 88   ;;  %s6418_s23 = smov (!%p545_p2), 120   ;;  %v5020_v21 = vshrl.u32 (!%p545_p2), %v772_v20, 7  ;;  %v5022_v22 = vand.u32 (!%p545_p2), 127, %v772_v20  ;;  %vm881_vm10 = vcmask (!%p545_p2), 257219   ;;  %vm889_vm11 = vcmask (!%p545_p2), 261319  }
   0xd   : > { %s6409_s24 = smov (!%p545_p2), 80   ;;  %s6419_s25 = smov (!%p545_p2), 112   ;;  %vm1733_vm12 = vcmask (!%p545_p2), 1040384   ;;  %vm1729_vm13 = vcmask (!%p545_p2), 7168  }
   0xe   : > { %s6408_s3 = smov (!%p545_p2), 72   ;;  %s6411_s27 = smov (!%p545_p2), 104   ;;  %vm776_vm3 = vcmp.le.s32.totalorder (!%p545_p2), %v5022_v22, %v5020_v21 }
   0xf   : > { %v614_v0 = vld [vmem:[%s6425_s1] sm:$0xff] (!%p545_p2)  ;;  %v615_v1 = vld [vmem:[%s6425_s1 + $0x8] sm:$0xff] (!%p545_p2)  ;;  %v616_v2 = vld [vmem:[%s6425_s1 + $0x10] sm:$0xff] (!%p545_p2)  ;;  %s4841_s28 = smov (!%p545_p2), 56  }
  0x10   : > { %v4410_v4 = vpack.c.bf16 (!%p545_p2), %v615_v1, %v614_v0  ;;  %v617_v5 = vld [vmem:[%s6425_s1 + $0x18] sm:$0xff] (!%p545_p2)  ;;  %s6437_s1 = smov (!%p545_p2), 16  }
  0x11   : > { %v4413_v7 = vpack.c.bf16 %v617_v5, %v616_v2  ;;  %s6441_s30 = smov (!%p601_p3, %s3914_s30), 1 }
  0x12   : > { %4411 = vmatpush3.bf16.msra.mxu0 %v4410_v4  ;;  %s6406_s26 = sshll.u32 %s6441_s30, 3 }
  0x13   : > { %4412 = vmatprep.subr.bf16.mxu0 %v4830_v3  ;;  %s604_s20 = scalar_lea.vmem %s6426_s29, %s6406_s26  ;;  %s4842_s29 = smov 40  }
  0x14   : > { %v4982_v8 = vld [vmem:[%s604_s20] sm:$0xff]  ;;  %s6416_s20 = smov 8   ;;  %s6431_s26 = smov 104  }
  0x16   : > { %4414 = vmatpush3.bf16.msra.mxu0 %v4413_v7 }
  0x17   : > { %4325 = vmatprep.subr.mxu0 %v4832_v6 }
  0x19   : > { %4303 = vmatmul.mubr.msk.f32.vlgmr.msra.gmra.mrb[0].mxu0 %vm618_vm1, %v4982_v8 }
  0x1a   : > { %4327 = vmatprep.mubr.msk.f32.mxu0 %vm4831_vm0, %v4832_v6 }
  0xec   : > { %v4989_v9 = vpop.f32.mrb[0].mxu0 }
  0xed   : > { %787 = vrot.lane.b32.xlu1 %v4989_v9, %s4833_s21  ;;  %694 = vrot.lane.b32.xlu0 %v4989_v9, %s6410_s22  ;;  %v4304_v10 = vpop.f32.mrb[1].mxu0  ;;  %v692_v11 = vmul.f32 0.35355338, %v4989_v9  ;;  %s4844_s21 = smov 48   ;;  %s6433_s22 = smov 80  }
  0xf1   : > { %893 = vrot.lane.b32.xlu1 %v4989_v9, %s6407_s2  ;;  %s6427_s2 = sld [smem:[#allocation6_spill]] }
  0xf5   : > { %891 = vrot.lane.b32.xlu1 %v692_v11, %s6418_s23 }
  0xf9   : > { %1077 = vrot.lane.b32.xlu1 %v4989_v9, %s6409_s24  ;;  %s6434_s24 = smov 72  }
  0xfd   : > { %1075 = vrot.lane.b32.xlu1 %v692_v11, %s6419_s25  ;;  %s6438_s25 = smov 24  }
 0x101   : > { %1261 = vrot.lane.b32.xlu1 %v4989_v9, %s6408_s3  ;;  %s6429_s3 = smov 112  }
 0x105   : > { %1259 = vrot.lane.b32.xlu1 %v692_v11, %s6411_s27  ;;  %s6430_s27 = smov 120  }
 0x15f   : > { %v788_v12 = vpop.permute.xlu1 %787  ;;  %v695_v13 = vpop.permute.xlu0 %694 }
 0x160   : > { %4306 = vmatpush3.xpose.msk.msra.mxu1 %vm696_vm2, %v695_v13 }
 0x161   : > { %4310 = vmatprep.subr.mxu1 %v4832_v6 }
 0x163   : > { %v894_v14 = vpop.permute.xlu1 %893  ;;  %4308 = vmatmul.mubr.msk.f32.vlgmr.msra.gmra.mrb[0].mxu1 %vm696_vm2, %v692_v11 }
 0x164   : > { %4311 = vmatpush3.msra.mxu1 %v788_v12  ;;  %4312 = vmatprep.mubr.msk.f32.mxu1 %vm4831_vm0, %v4832_v6 }
 0x165   : > { %4315 = vmatprep.subr.mxu1 %v4832_v6 }
 0x167   : > { %v892_v15 = vpop.permute.xlu1 %891 }
 0x16b   : > { %v1078_v16 = vpop.permute.xlu1 %1077 }
 0x16c   : > { %4326 = vmatpush3.xpose.msk.msra.mxu0 %vm696_vm2, %v1078_v16 }
 0x16d   : > { %4335 = vmatprep.subr.mxu0 %v4832_v6 }
 0x16f   : > { %v1076_v17 = vpop.permute.xlu1 %1075 }
 0x170   : > { %4328 = vmatmul.mubr.msk.f32.vlgmr.msra.gmra.mrb[2].mxu0 %vm696_vm2, %v1076_v17 }
 0x171   : > { %4337 = vmatprep.mubr.msk.f32.mxu0 %vm4831_vm0, %v4832_v6 }
 0x173   : > { %v1262_v18 = vpop.permute.xlu1 %1261 }
 0x174   : > { %4336 = vmatpush3.xpose.msk.msra.mxu0 %vm696_vm2, %v1262_v18 }
 0x175   : > { %4415 = vmatprep.subr.bf16.mxu0 %v4830_v3 }
 0x177   : > { %v1260_v19 = vpop.permute.xlu1 %1259 }
 0x178   : > { %4338 = vmatmul.mubr.msk.f32.vlgmr.msra.gmra.mrb[4].mxu0 %vm696_vm2, %v1260_v19 }
 0x179   : > { %4353 = vmatprep.mubr.msk.f32.mxu0 %vm4831_vm0, %v4832_v6 }
 0x236   : > { %v768_v23 = vpop.f32.mrb[0].mxu1 }
 0x237   : > { %v777_v24 = vsel %vm776_vm3, %v768_v23, -1e+08  ;;  %v4309_v25 = vpop.f32.mrb[1].mxu1 }
 0x238   : > { %v778_v26 = vsel %vm696_vm2, %v777_v24, -inf  ;;  %v1444_v25 = vld [vmem:[%s6427_s2] sm:$0xff] }
 0x239   : > { %779 = vmax.xlane.f32.xlu0 %v778_v26  ;;  %v1445_v26 = vld [vmem:[%s6427_s2 + $0x8] sm:$0xff] }
 0x243   : > { %v1149_v27 = vpop.f32.mrb[2].mxu0 }
 0x244   : > { %v4329_v28 = vpop.f32.mrb[3].mxu0  ;;  %v1153_v31 = vsel %vm776_vm3, %v1149_v27, -1e+08  ;;  %v4416_v27 = vpack.c.bf16 %v1445_v26, %v1444_v25 }
 0x245   : > { %v1154_v32 = vsel %vm696_vm2, %v1153_v31, -inf  ;;  %v1446_v28 = vld [vmem:[%s6427_s2 + $0x10] sm:$0xff] }
 0x246   : > { %4417 = vmatpush3.bf16.msra.mxu0 %v4416_v27 }
 0x247   : > { %4418 = vmatprep.subr.bf16.mxu0 %v4830_v3 }
 0x24b   : > { %v1333_v29 = vpop.f32.mrb[4].mxu0 }
 0x24c   : > { %v4339_v30 = vpop.f32.mrb[5].mxu0  ;;  %v1337_v33 = vsel %vm776_vm3, %v1333_v29, -1e+08  ;;  %v1447_v29 = vld [vmem:[%s6427_s2 + $0x18] sm:$0xff] }
 0x24d   : > { %v1338_v34 = vsel %vm696_vm2, %v1337_v33, -inf  ;;  %v4419_v30 = vpack.c.bf16 %v1447_v29, %v1446_v28 }
 0x24f   : > { %979 = vrot.lane.b32.xlu0 %v4989_v9, %s4841_s28  ;;  %s6414_s28 = smov 16   ;;  %4420 = vmatpush3.bf16.msra.mxu0 %v4419_v30 }
 0x250   : > { %4427 = vmatprep.subr.bf16.mxu0 %v4830_v3 }
 0x26e   : > { %1155 = vmax.xlane.f32.xlu0 %v1154_v32 }
 0x272   : > { %1339 = vmax.xlane.f32.xlu0 %v1338_v34 }
 0x288   : > { %1347 = vrot.lane.b32.xlu0 %v4989_v9, %s4842_s29  ;;  %s6412_s29 = smov 24  }
 0x2c6   : > { %v780_v35 = vpop.xlane.xlu0 %779 }
 0x2c7   : > { %v781_v36 = vsub.f32 %v777_v24, %v780_v35 }
 0x2c9   : > { %v782_v37 = vmul.f32 1.442695, %v781_v36 }
 0x2ca   : > { %v980_v40 = vpop.permute.xlu0 %979 }
 0x2cb   : > { %4784 = vpow2.f32 %v782_v37 }
 0x2d5   : > { %v4785_v38 = vpop.eup %4784 }
 0x2d6   : > { %4313 = vmatmul.mubr.msk.f32.vlgmr.msra.gmra.mrb[2].mxu1 %vm696_vm2, %v4785_v38  ;;  %v784_v39 = vsel %vm696_vm2, %v4785_v38, 0.0 }
 0x2d7   : > { %4316 = vmatpush3.xpose.msk.msra.mxu1 %vm696_vm2, %v894_v14  ;;  %785 = vadd.xlane.f32.xlu0 %v784_v39 }
 0x2d8   : > { %4317 = vmatprep.mubr.msk.f32.mxu1 %vm4831_vm0, %v4832_v6  ;;  %4320 = vmatprep.subr.mxu1 %v4832_v6 }
 0x2da   : > { %4318 = vmatmul.mubr.msk.f32.vlgmr.msra.gmra.mrb[4].mxu1 %vm696_vm2, %v892_v15 }
 0x2db   : > { %4321 = vmatpush3.msra.mxu1 %v980_v40  ;;  %4322 = vmatprep.mubr.msk.f32.mxu1 %vm4831_vm0, %v4832_v6 }
 0x2dc   : > { %4330 = vmatprep.subr.mxu1 %v4832_v6 }
 0x2fb   : > { %v1156_v41 = vpop.xlane.xlu0 %1155 }
 0x2fc   : > { %v1157_v42 = vsub.f32 %v1153_v31, %v1156_v41  ;;  %v3934_v41 = vld [vmem:[%s6388_s4] ss:$0 sm:$0xff] }
 0x2fe   : > { %v1158_v43 = vmul.f32 1.442695, %v1157_v42 }
 0x2ff   : > { %v1340_v44 = vpop.xlane.xlu0 %1339 }
 0x300   : > { %4786 = vpow2.f32 %v1158_v43  ;;  %v1341_v45 = vsub.f32 %v1337_v33, %v1340_v44 }
 0x302   : > { %v1342_v46 = vmul.f32 1.442695, %v1341_v45 }
 0x303   : > { %v1348_v51 = vpop.permute.xlu0 %1347 }
 0x304   : > { %4788 = vpow2.f32 %v1342_v46 }
 0x30a   : > { %v4787_v47 = vpop.eup %4786 }
 0x30b   : > { %v1160_v48 = vsel %vm696_vm2, %v4787_v47, 0.0 }
 0x30c   : > { %1161 = vadd.xlane.f32.xlu0 %v1160_v48 }
 0x30e   : > { %v4789_v49 = vpop.eup %4788 }
 0x30f   : > { %v1344_v50 = vsel %vm696_vm2, %v4789_v49, 0.0 }
 0x310   : > { %1345 = vadd.xlane.f32.xlu0 %v1344_v50 }
 0x364   : > { %v786_v52 = vpop.xlane.xlu0 %785 }
 0x365   : > { %4790 = vrcp.f32 %v786_v52  ;;  %v1636_v52 = vld [vmem:[%s6392_s8] sm:$0xff] }
 0x36f   : > { %v4791_v53 = vpop.eup %4790 }
 0x399   : > { %v1162_v61 = vpop.xlane.xlu0 %1161 }
 0x39d   : > { %v1346_v62 = vpop.xlane.xlu0 %1345 }
 0x3a9   : > { %v859_v54 = vpop.f32.mrb[2].mxu1 }
 0x3aa   : > { %v864_v55 = vmul.f32 %v4791_v53, %v859_v54  ;;  %v4314_v56 = vpop.f32.mrb[3].mxu1  ;;  %v1637_v53 = vld [vmem:[%s6392_s8 + $0x8] sm:$0xff]  ;;  %v1559_v54 = vld [vmem:[%s6391_s7] sm:$0xff] }
 0x3ac   : > { %868 = vrot.lane.b32.xlu0 %v864_v55, %s6416_s20  ;;  %866 = vst.msk [vmem:[#allocation2] sm:$0x1] %vm865_vm4, %v864_v55 }
 0x3ad   : > { %884 = vst.msk [vmem:[#allocation2 - $0x3] sm:$0x10] %vm883_vm5, %v864_v55  ;;  %v965_v57 = vpop.f32.mrb[4].mxu1 }
 0x3ae   : > { %v969_v58 = vsel %vm776_vm3, %v965_v57, -1e+08  ;;  %v4319_v59 = vpop.f32.mrb[5].mxu1  ;;  %v1638_v57 = vld [vmem:[%s6392_s8 + $0x10] sm:$0xff] }
 0x3af   : > { %v970_v60 = vsel %vm696_vm2, %v969_v58, -inf  ;;  %v1561_v59 = vld [vmem:[%s6391_s7 + $0x10] sm:$0xff] }
 0x3b0   : > { %971 = vmax.xlane.f32.xlu1 %v970_v60 }
 0x3c1   : > { %1163 = vrot.lane.b32.xlu1 %v4989_v9, %s4844_s21  ;;  %s6432_s21 = smov 96  }
 0x41e   : > { %v869_v63 = vpop.permute.xlu0 %868 }
 0x41f   : > { %872 = vst.msk [vmem:[#allocation2 - $0x1] sm:$0x2] %vm871_vm6, %v869_v63 }
 0x420   : > { %886 = vst.msk [vmem:[#allocation2 - $0x4] sm:$0x20] %vm885_vm7, %v869_v63 }
 0x43d   : > { %v972_v0 = vpop.xlane.xlu1 %971 }
 0x43e   : > { %v973_v1 = vsub.f32 %v969_v58, %v972_v0  ;;  %v1639_v58 = vld [vmem:[%s6392_s8 + $0x18] sm:$0xff] }
 0x43f   : > { %v4431_v60 = vpack.c.bf16 %v1639_v58, %v1638_v57 }
 0x440   : > { %v974_v2 = vmul.f32 1.442695, %v973_v1 }
 0x441   : > { %v1164_v5 = vpop.permute.xlu1 %1163 }
 0x442   : > { %4792 = vpow2.f32 %v974_v2 }
 0x44c   : > { %v4793_v4 = vpop.eup %4792 }
 0x44d   : > { %4323 = vmatmul.mubr.msk.f32.vlgmr.msra.gmra.mrb[6].mxu1 %vm696_vm2, %v4793_v4  ;;  %v976_v7 = vsel %vm696_vm2, %v4793_v4, 0.0 }
 0x44e   : > { %4331 = vmatpush3.msra.mxu1 %v1164_v5  ;;  %977 = vadd.xlane.f32.xlu1 %v976_v7  ;;  %v3936_v5 = vld [vmem:[%s6389_s5] ss:$0 sm:$0xff] }
 0x44f   : > { %4332 = vmatprep.mubr.msk.f32.mxu1 %vm4831_vm0, %v4832_v6  ;;  %4340 = vmatprep.subr.mxu1 %v4832_v6 }
 0x451   : > { %4333 = vmatmul.mubr.msk.f32.vlgmr.msra.gmra.mrb[8].mxu1 %vm696_vm2, %v4787_v47 }
 0x452   : > { %4341 = vmatpush3.msra.mxu1 %v1348_v51  ;;  %4342 = vmatprep.mubr.msk.f32.mxu1 %vm4831_vm0, %v4832_v6 }
 0x453   : > { %4421 = vmatprep.subr.bf16.mxu1 %v4830_v3 }
 0x455   : > { %4343 = vmatmul.mubr.msk.f32.vlgmr.msra.gmra.mrb[10].mxu1 %vm696_vm2, %v4789_v49 }
 0x456   : > { %4364 = vmatprep.mubr.msk.f32.mxu1 %vm4831_vm0, %v4832_v6 }
 0x45f   : > { %873 = vrot.lane.b32.xlu1 %v864_v55, %s6414_s28 }
 0x463   : > { %878 = vrot.lane.b32.xlu1 %v864_v55, %s6412_s29  ;;  %v1560_v55 = vld [vmem:[%s6391_s7 + $0x8] sm:$0xff] }
 0x464   : > { %v4422_v56 = vpack.c.bf16 %v1560_v55, %v1559_v54 }
 0x466   : > { %4423 = vmatpush3.bf16.msra.mxu1 %v4422_v56 }
 0x467   : > { %4424 = vmatprep.subr.bf16.mxu1 %v4830_v3 }
 0x4db   : > { %v978_v9 = vpop.xlane.xlu1 %977 }
 0x4dc   : > { %4794 = vrcp.f32 %v978_v9  ;;  %v3937_v9 = vld [vmem:[%s6390_s6] ss:$0 sm:$0xff] }
 0x4dd   : > { %4796 = vrcp.f32 %v1162_v61  ;;  %v1562_v61 = vld [vmem:[%s6391_s7 + $0x18] sm:$0xff] }
 0x4de   : > { %4798 = vrcp.f32 %v1346_v62  ;;  %v4425_v62 = vpack.c.bf16 %v1562_v61, %v1561_v59 }
 0x4df   : > { %v874_v10 = vpop.permute.xlu1 %873 }
 0x4e0   : > { %877 = vst.msk [vmem:[#allocation2 - $0x2] sm:$0x4] %vm876_vm8, %v874_v10  ;;  %4426 = vmatpush3.bf16.msra.mxu1 %v4425_v62 }
 0x4e1   : > { %888 = vst.msk [vmem:[#allocation2 - $0x5] sm:$0x40] %vm887_vm9, %v874_v10  ;;  %4378 = vmatprep.subr.mxu1 %v4832_v6 }
 0x4e3   : > { %v879_v11 = vpop.permute.xlu1 %878 }
 0x4e4   : > { %882 = vst.msk [vmem:[#allocation2 - $0x3] sm:$0x8] %vm881_vm10, %v879_v11 }
 0x4e5   : > { %890 = vst.msk [vmem:[#allocation2 - $0x6] sm:$0x80] %vm889_vm11, %v879_v11 }
 0x4e6   : > { %v4795_v12 = vpop.eup %4794 }
 0x4e7   : > { %v4797_v16 = vpop.eup %4796 }
 0x4e8   : > { %v4799_v20 = vpop.eup %4798 }
 0x520   : > { %v1051_v13 = vpop.f32.mrb[6].mxu1 }
 0x521   : > { %v1056_v14 = vmul.f32 %v4795_v12, %v1051_v13  ;;  %v4324_v15 = vpop.f32.mrb[7].mxu1 }
 0x523   : > { %1057 = vst.msk [vmem:[#allocation2 + $0x2] sm:$0x1] %vm865_vm4, %v1056_v14  ;;  %1059 = vrot.lane.b32.xlu1 %v1056_v14, %s6416_s20  ;;  %1063 = vrot.lane.b32.xlu0 %v1056_v14, %s6414_s28 }
 0x524   : > { %1071 = vst.msk [vmem:[#allocation2 - $0x1] sm:$0x10] %vm883_vm5, %v1056_v14  ;;  %v1235_v17 = vpop.f32.mrb[8].mxu1 }
 0x525   : > { %v1240_v18 = vmul.f32 %v4797_v16, %v1235_v17  ;;  %v4334_v19 = vpop.f32.mrb[9].mxu1 }
 0x527   : > { %1241 = vst.msk [vmem:[#allocation2 + $0x4] sm:$0x1] %vm865_vm4, %v1240_v18  ;;  %1067 = vrot.lane.b32.xlu0 %v1056_v14, %s6412_s29  ;;  %1247 = vrot.lane.b32.xlu1 %v1240_v18, %s6414_s28  ;;  %v5184_v14 = vsub.s32 0, %v5020_v21 }
 0x528   : > { %1255 = vst.msk [vmem:[#allocation2 + $0x1] sm:$0x10] %vm883_vm5, %v1240_v18  ;;  %v1419_v22 = vpop.f32.mrb[10].mxu1 }
 0x529   : > { %v1424_v23 = vmul.f32 %v4799_v20, %v1419_v22  ;;  %v4344_v24 = vpop.f32.mrb[11].mxu1 }
 0x52b   : > { %1425 = vst.msk [vmem:[#allocation2 + $0x6] sm:$0x1] %vm865_vm4, %v1424_v23  ;;  %1251 = vrot.lane.b32.xlu1 %v1240_v18, %s6412_s29  ;;  %1243 = vrot.lane.b32.xlu0 %v1240_v18, %s6416_s20 }
 0x52c   : > { %1439 = vst.msk [vmem:[#allocation2 + $0x3] sm:$0x10] %vm883_vm5, %v1424_v23 }
 0x52f   : > { %1427 = vrot.lane.b32.xlu0 %v1424_v23, %s6416_s20 }
 0x533   : > { %1431 = vrot.lane.b32.xlu0 %v1424_v23, %s6414_s28  ;;  %s6435_s28 = smov 88  }
 0x537   : > { %1435 = vrot.lane.b32.xlu0 %v1424_v23, %s6412_s29  ;;  %s6428_s29 = sld [smem:[#allocation4_spill]] }
 0x53d   : > { %s607_s23 = scalar_lea.vmem %s6428_s29, %s6441_s30  ;;  %s6436_s29 = smov 8  }
 0x53e   : > { %v613_v63 = vld [vmem:[%s607_s23] sm:$0x1] }
 0x595   : > { %v1060_v31 = vpop.permute.xlu1 %1059  ;;  %v1064_v32 = vpop.permute.xlu0 %1063 }
 0x596   : > { %1062 = vst.msk [vmem:[#allocation2 + $0x1] sm:$0x2] %vm871_vm6, %v1060_v31 }
 0x597   : > { %1072 = vst.msk [vmem:[#allocation2 - $0x2] sm:$0x20] %vm885_vm7, %v1060_v31 }
 0x598   : > { %1066 = vst.msk [vmem:[#allocation2] sm:$0x4] %vm876_vm8, %v1064_v32 }
 0x599   : > { %1073 = vst.msk [vmem:[#allocation2 - $0x3] sm:$0x40] %vm887_vm9, %v1064_v32  ;;  %v1248_v33 = vpop.permute.xlu1 %1247  ;;  %v1068_v34 = vpop.permute.xlu0 %1067 }
 0x59a   : > { %1070 = vst.msk [vmem:[#allocation2 - $0x1] sm:$0x8] %vm881_vm10, %v1068_v34 }
 0x59b   : > { %1074 = vst.msk [vmem:[#allocation2 - $0x4] sm:$0x80] %vm889_vm11, %v1068_v34 }
 0x59d   : > { %v1244_v35 = vpop.permute.xlu0 %1243  ;;  %v1252_v36 = vpop.permute.xlu1 %1251 }
 0x59e   : > { %1246 = vst.msk [vmem:[#allocation2 + $0x3] sm:$0x2] %vm871_vm6, %v1244_v35 }
 0x59f   : > { %1256 = vst.msk [vmem:[#allocation2] sm:$0x20] %vm885_vm7, %v1244_v35 }
 0x5a0   : > { %1250 = vst.msk [vmem:[#allocation2 + $0x2] sm:$0x4] %vm876_vm8, %v1248_v33 }
 0x5a1   : > { %1257 = vst.msk [vmem:[#allocation2 - $0x1] sm:$0x40] %vm887_vm9, %v1248_v33  ;;  %v1428_v37 = vpop.permute.xlu0 %1427 }
 0x5a2   : > { %1254 = vst.msk [vmem:[#allocation2 + $0x1] sm:$0x8] %vm881_vm10, %v1252_v36 }
 0x5a3   : > { %1258 = vst.msk [vmem:[#allocation2 - $0x2] sm:$0x80] %vm889_vm11, %v1252_v36 }
 0x5a4   : > { %1430 = vst.msk [vmem:[#allocation2 + $0x5] sm:$0x2] %vm871_vm6, %v1428_v37 }
 0x5a5   : > { %1440 = vst.msk [vmem:[#allocation2 + $0x2] sm:$0x20] %vm885_vm7, %v1428_v37  ;;  %v1432_v38 = vpop.permute.xlu0 %1431 }
 0x5a6   : > { %1434 = vst.msk [vmem:[#allocation2 + $0x4] sm:$0x4] %vm876_vm8, %v1432_v38 }
 0x5a7   : > { %1441 = vst.msk [vmem:[#allocation2 + $0x1] sm:$0x40] %vm887_vm9, %v1432_v38 }
 0x5a9   : > { %v1436_v39 = vpop.permute.xlu0 %1435 }
 0x5aa   : > { %1438 = vst.msk [vmem:[#allocation2 + $0x3] sm:$0x8] %vm881_vm10, %v1436_v39 }
 0x5ab   : > { %1442 = vst.msk [vmem:[#allocation2] sm:$0x80] %vm889_vm11, %v1436_v39 }
 0x5b2   : > { %v1443_v40 = vld [vmem:[#allocation2] sm:$0xff] }
 0x5b3   : > { %4354 = vmatmul.mubr.msk.f32.vlgmr.msra.gmra.mrb[6].mxu0 %vm618_vm1, %v1443_v40 }
 0x5b4   : > { %4375 = vmatprep.mubr.msk.f32.mxu0 %vm4831_vm0, %v4832_v6 }
 0x686   : > { %v1524_v42 = vpop.f32.mrb[6].mxu0 }
 0x687   : > { %v1525_v43 = vadd.f32 %v3934_v41, %v1524_v42  ;;  %v4355_v44 = vpop.f32.mrb[7].mxu0 }
 0x689   : > { %v1530_v45 = vadd.f32 %v1525_v43, %v4982_v8  ;;  %v4428_v8 = vpack.c.bf16 %v1637_v53, %v1636_v52 }
 0x68b   : > { %v1531_v46 = vsel %vm618_vm1, %v1530_v45, 0.0  ;;  %4429 = vmatpush3.bf16.msra.mxu0 %v4428_v8 }
 0x68c   : > { %1532 = vadd.xlane.f32.xlu1 %v1531_v46  ;;  %4430 = vmatprep.subr.bf16.mxu0 %v4830_v3 }
 0x68f   : > { %4432 = vmatpush3.bf16.msra.mxu0 %v4431_v60 }
 0x690   : > { %4388 = vmatprep.subr.mxu0 %v4832_v6 }
 0x692   : > { %4376 = vmatmul.mubr.msk.f32.vlgmr.msra.gmra.mrb[8].mxu0 %vm618_vm1, %v613_v63  ;;  %v2149_v63 = vld [vmem:[%s6393_s9] sm:$0xff] }
 0x693   : > { %4390 = vmatprep.mubr.msk.f32.mxu0 %vm4831_vm0, %v4832_v6 }
 0x719   : > { %v1533_v47 = vpop.xlane.xlu1 %1532 }
 0x71a   : > { %v1535_v48 = vmul.f32 0.03125, %v1533_v47 }
 0x71c   : > { %v1536_v49 = vsub.f32 %v1530_v45, %v1535_v48 }
 0x71e   : > { %v1537_v50 = vmul.f32 %v1536_v49, %v1536_v49 }
 0x720   : > { %v1538_v51 = vsel %vm618_vm1, %v1537_v50, 0.0 }
 0x721   : > { %1539 = vadd.xlane.f32.xlu0 %v1538_v51 }
 0x765   : > { %v1709_v12 = vpop.f32.mrb[8].mxu0 }
 0x766   : > { %v4377_v13 = vpop.f32.mrb[9].mxu0  ;;  %v1717_v15 = vrot.slane %v1709_v12, %v5184_v14 }
 0x7ae   : > { %v1540_v0 = vpop.xlane.xlu0 %1539 }
 0x7af   : > { %v1541_v1 = vmul.f32 0.03125, %v1540_v0  ;;  %v2150_v0 = vld [vmem:[%s6393_s9 + $0x8] sm:$0xff] }
 0x7b1   : > { %v1542_v2 = vadd.f32 1e-05, %v1541_v1  ;;  %v4434_v1 = vpack.c.bf16 %v2150_v0, %v2149_v63 }
 0x7b3   : > { %4800 = vrsqrt.f32 %v1542_v2  ;;  %v2151_v2 = vld [vmem:[%s6393_s9 + $0x10] sm:$0xff] }
 0x7bd   : > { %v4801_v4 = vpop.eup %4800 }
 0x7be   : > { %v1544_v7 = vmul.f32 %v4801_v4, %v1536_v49  ;;  %v2152_v4 = vld [vmem:[%s6393_s9 + $0x18] sm:$0xff] }
 0x7c0   : > { %v1551_v10 = vmul.f32 %v3936_v5, %v1544_v7  ;;  %v4437_v5 = vpack.c.bf16 %v2152_v4, %v2151_v2  ;;  %v3951_v4 = vld [vmem:[%s6396_s12] ss:$0 sm:$0xff] }
 0x7c2   : > { %v5177_v11 = vadd.f32 %v3937_v9, %v1551_v10 }
 0x7c4   : > { %4365 = vmatmul.mubr.msk.f32.vlgmr.msra.gmra.mrb[12].mxu1 %vm618_vm1, %v5177_v11 }
 0x7c5   : > { %4380 = vmatprep.mubr.msk.f32.mxu1 %vm4831_vm0, %v4832_v6 }
 0x897   : > { %v1632_v16 = vpop.f32.mrb[12].mxu1 }
 0x898   : > { %v1713_v17 = vmul.f32 0.35355338, %v1632_v16  ;;  %v4366_v18 = vpop.f32.mrb[13].mxu1 }
 0x89a   : > { %v1718_v19 = vmul.f32 %v1717_v15, %v1713_v17 }
 0x89c   : > { %1934 = vrot.lane.b32.xlu1 %v1718_v19, %s6429_s3  ;;  %1827 = vrot.lane.b32.xlu0 %v1718_v19, %s6430_s27  ;;  %v1719_v20 = vsel %vm696_vm2, %v1718_v19, 0.0 }
 0x8a0   : > { %2041 = vrot.lane.b32.xlu1 %v1718_v19, %s6431_s26  ;;  %s6439_s26 = sshll.u32 %s6441_s30, 3 }
 0x8a4   : > { %1727 = vrot.lane.b32.xlu1 %v1709_v12, %s6432_s21 }
 0x8bb   : > { %1720 = vadd.xlane.f32.xlu0 %v1719_v20 }
 0x90e   : > { %v1935_v22 = vpop.permute.xlu1 %1934  ;;  %v1828_v23 = vpop.permute.xlu0 %1827 }
 0x90f   : > { %v1830_v24 = vsel %vm696_vm2, %v1828_v23, 0.0  ;;  %v1937_v25 = vsel %vm696_vm2, %v1935_v22, 0.0  ;;  %v3948_v23 = vld [vmem:[%s6394_s10] ss:$0 sm:$0xff] }
 0x910   : > { %1831 = vadd.xlane.f32.xlu1 %v1830_v24  ;;  %1938 = vadd.xlane.f32.xlu0 %v1937_v25 }
 0x912   : > { %v2042_v26 = vpop.permute.xlu1 %2041 }
 0x913   : > { %v2044_v27 = vsel %vm696_vm2, %v2042_v26, 0.0 }
 0x914   : > { %2045 = vadd.xlane.f32.xlu0 %v2044_v27 }
 0x916   : > { %v1728_v28 = vpop.permute.xlu1 %1727 }
 0x917   : > { %4379 = vmatpush3.msk.msra.mxu1 %vm1733_vm12, %v1728_v28 }
 0x918   : > { %4383 = vmatprep.subr.mxu1 %v4832_v6 }
 0x921   : > { %1944 = vrot.lane.b32.xlu1 %v1709_v12, %s6433_s22 }
 0x925   : > { %2051 = vrot.lane.b32.xlu1 %v1709_v12, %s6434_s24  ;;  %s611_s24 = scalar_lea.vmem %s6403_s19, %s6439_s26 }
 0x92a   : > { %1837 = vrot.lane.b32.xlu0 %v1709_v12, %s6435_s28 }
 0x948   : > { %v1721_v29 = vpop.xlane.xlu0 %1720 }
 0x949   : > { %v1722_v30 = vsub.f32 %v1721_v29, %v1721_v29 }
 0x94b   : > { %v1723_v31 = vmul.f32 1.442695, %v1722_v30 }
 0x94d   : > { %4802 = vpow2.f32 %v1723_v31 }
 0x957   : > { %v4803_v32 = vpop.eup %4802 }
 0x958   : > { %4381 = vmatmul.mubr.msk.f32.vlgmr.msra.gmra.mrb[14].mxu1 %vm1729_vm13, %v4803_v32 }
 0x959   : > { %4385 = vmatprep.mubr.msk.f32.mxu1 %vm4831_vm0, %v4832_v6 }
 0x99d   : > { %v1832_v33 = vpop.xlane.xlu1 %1831  ;;  %v1939_v34 = vpop.xlane.xlu0 %1938 }
 0x99e   : > { %v1833_v35 = vsub.f32 %v1832_v33, %v1832_v33  ;;  %v1940_v36 = vsub.f32 %v1939_v34, %v1939_v34  ;;  %v2264_v34 = vld [vmem:[%s6397_s13 + $0x8] sm:$0xff] }
 0x9a0   : > { %v1834_v37 = vmul.f32 1.442695, %v1833_v35  ;;  %v1941_v38 = vmul.f32 1.442695, %v1940_v36  ;;  %v2280_v35 = vld [vmem:[%s6397_s13 + $0x88] sm:$0xff] }
 0x9a1   : > { %v1945_v39 = vpop.permute.xlu1 %1944  ;;  %v2046_v40 = vpop.xlane.xlu0 %2045  ;;  %v4439_v36 = vpack.c.bf16 %v2280_v35, %v2264_v34  ;;  %v2271_v34 = vld [vmem:[%s6397_s13 + $0x40] sm:$0xff] }
 0x9a2   : > { %4804 = vpow2.f32 %v1834_v37  ;;  %v2047_v41 = vsub.f32 %v2046_v40, %v2046_v40  ;;  %4389 = vmatpush3.msk.msra.mxu0 %vm1733_vm12, %v1945_v39  ;;  %v2282_v37 = vld [vmem:[%s6397_s13 + $0x98] sm:$0xff]  ;;  %v2279_v39 = vld [vmem:[%s6397_s13 + $0x80] sm:$0xff] }
 0x9a3   : > { %4806 = vpow2.f32 %v1941_v38  ;;  %4433 = vmatprep.subr.bf16.mxu0 %v4830_v3  ;;  %v2263_v38 = vld [vmem:[%s6397_s13] sm:$0xff] }
 0x9a4   : > { %v2048_v42 = vmul.f32 1.442695, %v2047_v41  ;;  %v4441_v41 = vpack.c.bf16 %v2279_v39, %v2263_v38  ;;  %v2287_v35 = vld [vmem:[%s6397_s13 + $0xc0] sm:$0xff]  ;;  %v2289_v38 = vld [vmem:[%s6397_s13 + $0xd0] sm:$0xff]  ;;  %v2304_v39 = vld [vmem:[%s6397_s13 + $0x148] sm:$0xff] }
 0x9a5   : > { %v1838_v43 = vpop.permute.xlu0 %1837  ;;  %v2052_v46 = vpop.permute.xlu1 %2051 }
 0x9a6   : > { %4808 = vpow2.f32 %v2048_v42  ;;  %4384 = vmatpush3.msk.msra.mxu1 %vm1733_vm12, %v1838_v43  ;;  %v2265_v42 = vld [vmem:[%s6397_s13 + $0x10] sm:$0xff] }
 0x9a7   : > { %4393 = vmatprep.subr.mxu1 %v4832_v6  ;;  %4810 = vrcp.f32 %v4803_v32  ;;  %v2281_v43 = vld [vmem:[%s6397_s13 + $0x90] sm:$0xff] }
 0x9ac   : > { %v4805_v44 = vpop.eup %4804 }
 0x9ad   : > { %v4807_v45 = vpop.eup %4806  ;;  %4386 = vmatmul.mubr.msk.f32.vlgmr.msra.gmra.mrb[16].mxu1 %vm1729_vm13, %v4805_v44  ;;  %4812 = vrcp.f32 %v4805_v44  ;;  %v4449_v44 = vpack.c.bf16 %v2281_v43, %v2265_v42  ;;  %v2322_v42 = vld [vmem:[%s6397_s13 + $0x1d8] sm:$0xff]  ;;  %v4473_v43 = vpack.c.bf16 %v2287_v35, %v2271_v34 }
 0x9ae   : > { %4391 = vmatmul.mubr.msk.f32.vlgmr.msra.gmra.mrb[10].mxu0 %vm1729_vm13, %v4807_v45  ;;  %4394 = vmatpush3.msk.msra.mxu1 %vm1733_vm12, %v2052_v46  ;;  %4814 = vrcp.f32 %v4807_v45  ;;  %v2296_v45 = vld [vmem:[%s6397_s13 + $0x108] sm:$0xff]  ;;  %v3001_v34 = vld [vmem:[%s6399_s15 + $0x18] sm:$0xff] }
 0x9af   : > { %4395 = vmatprep.mubr.msk.f32.mxu1 %vm4831_vm0, %v4832_v6  ;;  %4406 = vmatprep.mubr.msk.f32.mxu0 %vm4831_vm0, %v4832_v6  ;;  %v2312_v46 = vld [vmem:[%s6397_s13 + $0x188] sm:$0xff] }
 0x9b0   : > { %v4809_v47 = vpop.eup %4808  ;;  %4435 = vmatpush3.bf16.msra.mxu0 %v4434_v1  ;;  %4440 = vmatprep.subr.bf16.mxu1 %v4439_v36  ;;  %v3950_v1 = vld [vmem:[%s6395_s11] ss:$0 sm:$0xff] }
 0x9b1   : > { %4396 = vmatmul.mubr.msk.f32.vlgmr.msra.gmra.mrb[18].mxu1 %vm1729_vm13, %v4809_v47  ;;  %v4811_v48 = vpop.eup %4810  ;;  %4816 = vrcp.f32 %v4809_v47  ;;  %4436 = vmatprep.subr.bf16.mxu0 %v4830_v3  ;;  %v2298_v47 = vld [vmem:[%s6397_s13 + $0x118] sm:$0xff] }
 0x9b2   : > { %2478 = vmatprep.mubr.f32.mxu1 %v4832_v6  ;;  %4442 = vmatpush1.bf16.msra.mxu1 %v4441_v41  ;;  %v2306_v41 = vld [vmem:[%s6397_s13 + $0x158] sm:$0xff] }
 0x9b4   : > { %4438 = vmatpush3.bf16.msra.mxu0 %v4437_v5  ;;  %v2267_v5 = vld [vmem:[%s6397_s13 + $0x20] sm:$0xff] }
 0x9b7   : > { %v4813_v52 = vpop.eup %4812 }
 0x9b8   : > { %v4815_v8 = vpop.eup %4814 }
 0x9bb   : > { %v4817_v59 = vpop.eup %4816 }
 0xa2b   : > { %v1802_v49 = vpop.f32.mrb[14].mxu1 }
 0xa2c   : > { %v1807_v50 = vmul.f32 %v4811_v48, %v1802_v49  ;;  %v4382_v51 = vpop.f32.mrb[15].mxu1  ;;  %v4443_v48 = vpack.c.bf16 %v2312_v46, %v2296_v45  ;;  %v2314_v49 = vld [vmem:[%s6397_s13 + $0x198] sm:$0xff]  ;;  %v2303_v45 = vld [vmem:[%s6397_s13 + $0x140] sm:$0xff] }
 0xa2d   : > { %v2311_v51 = vld [vmem:[%s6397_s13 + $0x180] sm:$0xff] }
 0xa2e   : > { %1808 = vst.msk [vmem:[#allocation2] sm:$0x1] %vm865_vm4, %v1807_v50  ;;  %1810 = vrot.lane.b32.xlu0 %v1807_v50, %s6436_s29  ;;  %4444 = vmatprep.subr.bf16.mxu1 %v4443_v48  ;;  %v2319_v46 = vld [vmem:[%s6397_s13 + $0x1c0] sm:$0xff]  ;;  %v4483_v48 = vpack.c.bf16 %v2322_v42, %v2306_v41  ;;  %v3051_v41 = vld [vmem:[%s6399_s15 + $0x1a8] sm:$0xff] }
 0xa2f   : > { %1822 = vst.msk [vmem:[#allocation2 - $0x3] sm:$0x10] %vm883_vm5, %v1807_v50 }
 0xa32   : > { %1814 = vrot.lane.b32.xlu0 %v1807_v50, %s6437_s1 }
 0xa36   : > { %1818 = vrot.lane.b32.xlu0 %v1807_v50, %s6438_s25  ;;  %v2295_v50 = vld [vmem:[%s6397_s13 + $0x100] sm:$0xff] }
 0xa80   : > { %v1910_v53 = vpop.f32.mrb[16].mxu1 }
 0xa81   : > { %v1915_v54 = vmul.f32 %v4813_v52, %v1910_v53  ;;  %v2017_v55 = vpop.f32.mrb[10].mxu0  ;;  %v4387_v56 = vpop.f32.mrb[17].mxu1  ;;  %v4451_v52 = vpack.c.bf16 %v2314_v49, %v2298_v47  ;;  %v4445_v53 = vpack.c.bf16 %v2311_v51, %v2295_v50  ;;  %v2305_v49 = vld [vmem:[%s6397_s13 + $0x150] sm:$0xff]  ;;  %v2276_v51 = vld [vmem:[%s6397_s13 + $0x68] sm:$0xff] }
 0xa82   : > { %v2022_v57 = vmul.f32 %v4815_v8, %v2017_v55  ;;  %v4392_v58 = vpop.f32.mrb[11].mxu0  ;;  %v2297_v8 = vld [vmem:[%s6397_s13 + $0x110] sm:$0xff]  ;;  %v2268_v56 = vld [vmem:[%s6397_s13 + $0x28] sm:$0xff] }
 0xa83   : > { %1916 = vst.msk [vmem:[#allocation2 + $0x2] sm:$0x1] %vm865_vm4, %v1915_v54  ;;  %1918 = vrot.lane.b32.xlu1 %v1915_v54, %s6436_s29  ;;  %4446 = vmatpush1.bf16.msra.mxu1 %v4445_v53  ;;  %v2270_v58 = vld [vmem:[%s6397_s13 + $0x38] sm:$0xff]  ;;  %v2321_v50 = vld [vmem:[%s6397_s13 + $0x1d0] sm:$0xff] }
 0xa84   : > { %1930 = vst.msk [vmem:[#allocation2 - $0x1] sm:$0x10] %vm883_vm5, %v1915_v54  ;;  %2037 = vst.msk [vmem:[#allocation2 + $0x1] sm:$0x10] %vm883_vm5, %v2022_v57  ;;  %2025 = vrot.lane.b32.xlu0 %v2022_v57, %s6436_s29  ;;  %v2124_v60 = vpop.f32.mrb[18].mxu1  ;;  %v2278_v53 = vld [vmem:[%s6397_s13 + $0x78] sm:$0xff] }
 0xa85   : > { %2023 = vst.msk [vmem:[#allocation2 + $0x4] sm:$0x1] %vm865_vm4, %v2022_v57  ;;  %v2129_v61 = vmul.f32 %v4817_v59, %v2124_v60  ;;  %v4397_v62 = vpop.f32.mrb[19].mxu1  ;;  %v2286_v60 = vld [vmem:[%s6397_s13 + $0xb8] sm:$0xff] }
 0xa87   : > { %2130 = vst.msk [vmem:[#allocation2 + $0x6] sm:$0x1] %vm865_vm4, %v2129_v61  ;;  %1922 = vrot.lane.b32.xlu1 %v1915_v54, %s6437_s1 }
 0xa88   : > { %2144 = vst.msk [vmem:[#allocation2 + $0x3] sm:$0x10] %vm883_vm5, %v2129_v61  ;;  %2029 = vrot.lane.b32.xlu0 %v2022_v57, %s6437_s1 }
 0xa8b   : > { %1926 = vrot.lane.b32.xlu1 %v1915_v54, %s6438_s25  ;;  %v2313_v54 = vld [vmem:[%s6397_s13 + $0x190] sm:$0xff] }
 0xa8c   : > { %2033 = vrot.lane.b32.xlu0 %v2022_v57, %s6438_s25  ;;  %v4453_v55 = vpack.c.bf16 %v2313_v54, %v2297_v8  ;;  %v2284_v57 = vld [vmem:[%s6397_s13 + $0xa8] sm:$0xff]  ;;  %v2294_v8 = vld [vmem:[%s6397_s13 + $0xf8] sm:$0xff]  ;;  %v4477_v54 = vpack.c.bf16 %v2319_v46, %v2303_v45 }
 0xa8d   : > { %v4455_v59 = vpack.c.bf16 %v2284_v57, %v2268_v56  ;;  %v2275_v56 = vld [vmem:[%s6397_s13 + $0x60] sm:$0xff]  ;;  %v3003_v45 = vld [vmem:[%s6399_s15 + $0x28] sm:$0xff] }
 0xa8e   : > { %v2291_v57 = vld [vmem:[%s6397_s13 + $0xe0] sm:$0xff] }
 0xa8f   : > { %2132 = vrot.lane.b32.xlu1 %v2129_v61, %s6436_s29  ;;  %4456 = vmatprep.subr.bf16.mxu1 %v4455_v59  ;;  %v4495_v59 = vpack.c.bf16 %v2294_v8, %v2278_v53  ;;  %v3053_v53 = vld [vmem:[%s6399_s15 + $0x1b8] sm:$0xff] }
 0xa93   : > { %2136 = vrot.lane.b32.xlu1 %v2129_v61, %s6437_s1 }
 0xa97   : > { %2140 = vrot.lane.b32.xlu1 %v2129_v61, %s6438_s25  ;;  %v4463_v61 = vpack.c.bf16 %v2286_v60, %v2270_v58  ;;  %v2277_v60 = vld [vmem:[%s6397_s13 + $0x70] sm:$0xff] }
 0xaa0   : > { %v1811_v7 = vpop.permute.xlu0 %1810 }
 0xaa1   : > { %1813 = vst.msk [vmem:[#allocation2 - $0x1] sm:$0x2] %vm871_vm6, %v1811_v7 }
 0xaa2   : > { %1823 = vst.msk [vmem:[#allocation2 - $0x4] sm:$0x20] %vm885_vm7, %v1811_v7  ;;  %v2283_v7 = vld [vmem:[%s6397_s13 + $0xa0] sm:$0xff] }
 0xaa4   : > { %v1815_v9 = vpop.permute.xlu0 %1814 }
 0xaa5   : > { %1817 = vst.msk [vmem:[#allocation2 - $0x2] sm:$0x4] %vm876_vm8, %v1815_v9 }
 0xaa6   : > { %1824 = vst.msk [vmem:[#allocation2 - $0x5] sm:$0x40] %vm887_vm9, %v1815_v9 }
 0xaa8   : > { %v1819_v10 = vpop.permute.xlu0 %1818 }
 0xaa9   : > { %1821 = vst.msk [vmem:[#allocation2 - $0x3] sm:$0x8] %vm881_vm10, %v1819_v10 }
 0xaaa   : > { %1825 = vst.msk [vmem:[#allocation2 - $0x6] sm:$0x80] %vm889_vm11, %v1819_v10  ;;  %v2269_v10 = vld [vmem:[%s6397_s13 + $0x30] sm:$0xff] }
 0xaf5   : > { %v1919_v3 = vpop.permute.xlu1 %1918 }
 0xaf6   : > { %1921 = vst.msk [vmem:[#allocation2 + $0x1] sm:$0x2] %vm871_vm6, %v1919_v3  ;;  %v2026_v12 = vpop.permute.xlu0 %2025 }
 0xaf7   : > { %1931 = vst.msk [vmem:[#allocation2 - $0x2] sm:$0x20] %vm885_vm7, %v1919_v3  ;;  %2038 = vst.msk [vmem:[#allocation2] sm:$0x20] %vm885_vm7, %v2026_v12  ;;  %v2285_v3 = vld [vmem:[%s6397_s13 + $0xb0] sm:$0xff] }
 0xaf8   : > { %2028 = vst.msk [vmem:[#allocation2 + $0x3] sm:$0x2] %vm871_vm6, %v2026_v12  ;;  %v2300_v12 = vld [vmem:[%s6397_s13 + $0x128] sm:$0xff] }
 0xaf9   : > { %v1923_v13 = vpop.permute.xlu1 %1922 }
 0xafa   : > { %1925 = vst.msk [vmem:[#allocation2] sm:$0x4] %vm876_vm8, %v1923_v13  ;;  %v2030_v15 = vpop.permute.xlu0 %2029 }
 0xafb   : > { %1932 = vst.msk [vmem:[#allocation2 - $0x3] sm:$0x40] %vm887_vm9, %v1923_v13  ;;  %2039 = vst.msk [vmem:[#allocation2 - $0x1] sm:$0x40] %vm887_vm9, %v2030_v15  ;;  %v2316_v13 = vld [vmem:[%s6397_s13 + $0x1a8] sm:$0xff] }
 0xafc   : > { %2032 = vst.msk [vmem:[#allocation2 + $0x2] sm:$0x4] %vm876_vm8, %v2030_v15  ;;  %v2302_v15 = vld [vmem:[%s6397_s13 + $0x138] sm:$0xff] }
 0xafd   : > { %v1927_v16 = vpop.permute.xlu1 %1926 }
 0xafe   : > { %1929 = vst.msk [vmem:[#allocation2 - $0x1] sm:$0x8] %vm881_vm10, %v1927_v16  ;;  %v2034_v17 = vpop.permute.xlu0 %2033 }
 0xaff   : > { %1933 = vst.msk [vmem:[#allocation2 - $0x4] sm:$0x80] %vm889_vm11, %v1927_v16  ;;  %2040 = vst.msk [vmem:[#allocation2 - $0x2] sm:$0x80] %vm889_vm11, %v2034_v17  ;;  %v2318_v16 = vld [vmem:[%s6397_s13 + $0x1b8] sm:$0xff] }
 0xb00   : > { %2036 = vst.msk [vmem:[#allocation2 + $0x1] sm:$0x8] %vm881_vm10, %v2034_v17 }
 0xb01   : > { %v2133_v18 = vpop.permute.xlu1 %2132 }
 0xb02   : > { %2135 = vst.msk [vmem:[#allocation2 + $0x5] sm:$0x2] %vm871_vm6, %v2133_v18 }
 0xb03   : > { %2145 = vst.msk [vmem:[#allocation2 + $0x2] sm:$0x20] %vm885_vm7, %v2133_v18  ;;  %v4457_v18 = vpack.c.bf16 %v2283_v7, %v2267_v5  ;;  %v2307_v5 = vld [vmem:[%s6397_s13 + $0x160] sm:$0xff] }
 0xb04   : > { %v2323_v7 = vld [vmem:[%s6397_s13 + $0x1e0] sm:$0xff] }
 0xb05   : > { %v2137_v19 = vpop.permute.xlu1 %2136 }
 0xb06   : > { %2139 = vst.msk [vmem:[#allocation2 + $0x4] sm:$0x4] %vm876_vm8, %v2137_v19 }
 0xb07   : > { %2146 = vst.msk [vmem:[#allocation2 + $0x1] sm:$0x40] %vm887_vm9, %v2137_v19  ;;  %v4465_v19 = vpack.c.bf16 %v2285_v3, %v2269_v10  ;;  %v2309_v3 = vld [vmem:[%s6397_s13 + $0x170] sm:$0xff] }
 0xb09   : > { %v2141_v20 = vpop.permute.xlu1 %2140 }
 0xb0a   : > { %2143 = vst.msk [vmem:[#allocation2 + $0x3] sm:$0x8] %vm881_vm10, %v2141_v20 }
 0xb0b   : > { %2147 = vst.msk [vmem:[#allocation2] sm:$0x80] %vm889_vm11, %v2141_v20  ;;  %v2299_v20 = vld [vmem:[%s6397_s13 + $0x120] sm:$0xff] }
 0xb12   : > { %v2148_v22 = vld [vmem:[#allocation2] sm:$0xff] }
 0xb13   : > { %4407 = vmatmul.mubr.msk.f32.vlgmr.msra.gmra.mrb[12].mxu0 %vm618_vm1, %v2148_v22  ;;  %v2315_v22 = vld [vmem:[%s6397_s13 + $0x1a0] sm:$0xff] }
 0xb14   : > { %2549 = vmatprep.mubr.f32.mxu0 %v4832_v6 }
 0xbe6   : > { %v2229_v24 = vpop.f32.mrb[12].mxu0 }
 0xbe7   : > { %v2230_v25 = vadd.f32 %v3948_v23, %v2229_v24  ;;  %v4408_v26 = vpop.f32.mrb[13].mxu0  ;;  %v4459_v24 = vpack.c.bf16 %v2316_v13, %v2300_v12  ;;  %v2325_v12 = vld [vmem:[%s6397_s13 + $0x1f0] sm:$0xff]  ;;  %v3014_v13 = vld [vmem:[%s6399_s15 + $0x80] sm:$0xff] }
 0xbe8   : > { %v2301_v26 = vld [vmem:[%s6397_s13 + $0x130] sm:$0xff] }
 0xbe9   : > { %v2235_v27 = vadd.f32 %v2230_v25, %v5177_v11  ;;  %v2266_v11 = vld [vmem:[%s6397_s13 + $0x18] sm:$0xff]  ;;  %v4467_v25 = vpack.c.bf16 %v2318_v16, %v2302_v15  ;;  %v3015_v15 = vld [vmem:[%s6399_s15 + $0x88] sm:$0xff]  ;;  %v3046_v16 = vld [vmem:[%s6399_s15 + $0x180] sm:$0xff] }
 0xbea   : > { %v4447_v40 = vpack.c.bf16 %v2282_v37, %v2266_v11  ;;  %v2273_v37 = vld [vmem:[%s6397_s13 + $0x50] sm:$0xff] }
 0xbeb   : > { %v2236_v28 = vsel %vm618_vm1, %v2235_v27, 0.0 }
 0xbec   : > { %2237 = vadd.xlane.f32.xlu0 %v2236_v28  ;;  %4448 = vmatprep.subr.bf16.mxu0 %v4447_v40  ;;  %v2272_v28 = vld [vmem:[%s6397_s13 + $0x48] sm:$0xff] }
 0xbed   : > { %4450 = vmatpush1.bf16.msra.mxu0 %v4449_v44  ;;  %v2320_v40 = vld [vmem:[%s6397_s13 + $0x1c8] sm:$0xff]  ;;  %v4481_v44 = vpack.c.bf16 %v2289_v38, %v2273_v37  ;;  %v3033_v37 = vld [vmem:[%s6399_s15 + $0x118] sm:$0xff]  ;;  %v3018_v38 = vld [vmem:[%s6399_s15 + $0xa0] sm:$0xff] }
 0xbee   : > { %4452 = vmatprep.subr.bf16.mxu0 %v4451_v52  ;;  %v4475_v47 = vpack.c.bf16 %v2320_v40, %v2304_v39  ;;  %v2292_v52 = vld [vmem:[%s6397_s13 + $0xe8] sm:$0xff]  ;;  %v3050_v40 = vld [vmem:[%s6399_s15 + $0x1a0] sm:$0xff] }
 0xbef   : > { %v4487_v58 = vpack.c.bf16 %v2292_v52, %v2276_v51  ;;  %v3019_v39 = vld [vmem:[%s6399_s15 + $0xa8] sm:$0xff]  ;;  %v3021_v51 = vld [vmem:[%s6399_s15 + $0xb8] sm:$0xff]  ;;  %v3052_v52 = vld [vmem:[%s6399_s15 + $0x1b0] sm:$0xff] }
 0xbf0   : > { %v4511_v46 = vpack.c.bf16 %v3019_v39, %v3018_v38  ;;  %v3028_v39 = vld [vmem:[%s6399_s15 + $0xf0] sm:$0xff] }
 0xbf1   : > { %4454 = vmatpush1.bf16.msra.mxu0 %v4453_v55  ;;  %v4485_v55 = vpack.c.bf16 %v2321_v50, %v2305_v49  ;;  %v3035_v49 = vld [vmem:[%s6399_s15 + $0x128] sm:$0xff]  ;;  %v3020_v50 = vld [vmem:[%s6399_s15 + $0xb0] sm:$0xff] }
 0xbf2   : > { %4464 = vmatprep.subr.bf16.mxu0 %v4463_v61  ;;  %v2293_v61 = vld [vmem:[%s6397_s13 + $0xf0] sm:$0xff] }
 0xc79   : > { %v2238_v29 = vpop.xlane.xlu0 %2237 }
 0xc7a   : > { %v2239_v30 = vmul.f32 0.03125, %v2238_v29  ;;  %v2288_v29 = vld [vmem:[%s6397_s13 + $0xc8] sm:$0xff] }
 0xc7b   : > { %v4471_v11 = vpack.c.bf16 %v2288_v29, %v2272_v28  ;;  %v3016_v28 = vld [vmem:[%s6399_s15 + $0x90] sm:$0xff]  ;;  %v3017_v29 = vld [vmem:[%s6399_s15 + $0x98] sm:$0xff] }
 0xc7c   : > { %v2240_v31 = vsub.f32 %v2235_v27, %v2239_v30  ;;  %v2317_v27 = vld [vmem:[%s6397_s13 + $0x1b0] sm:$0xff]  ;;  %v2274_v30 = vld [vmem:[%s6397_s13 + $0x58] sm:$0xff]  ;;  %v4507_v35 = vpack.c.bf16 %v3017_v29, %v3016_v28  ;;  %v3027_v28 = vld [vmem:[%s6399_s15 + $0xe8] sm:$0xff] }
 0xc7d   : > { %v3058_v29 = vld [vmem:[%s6399_s15 + $0x1e0] sm:$0xff] }
 0xc7e   : > { %v2241_v32 = vmul.f32 %v2240_v31, %v2240_v31 }
 0xc80   : > { %v2242_v33 = vsel %vm618_vm1, %v2241_v32, 0.0  ;;  %v4461_v32 = vpack.c.bf16 %v2315_v22, %v2299_v20  ;;  %v2998_v20 = vld [vmem:[%s6399_s15] sm:$0xff]  ;;  %v2999_v22 = vld [vmem:[%s6399_s15 + $0x8] sm:$0xff] }
 0xc81   : > { %2243 = vadd.xlane.f32.xlu1 %v2242_v33  ;;  %v4469_v33 = vpack.c.bf16 %v2317_v27, %v2301_v26  ;;  %v3030_v26 = vld [vmem:[%s6399_s15 + $0x100] sm:$0xff]  ;;  %v3031_v27 = vld [vmem:[%s6399_s15 + $0x108] sm:$0xff] }
 0xd0e   : > { %v2244_v62 = vpop.xlane.xlu1 %2243 }
 0xd0f   : > { %v2245_v63 = vmul.f32 0.03125, %v2244_v62  ;;  %v2308_v62 = vld [vmem:[%s6397_s13 + $0x168] sm:$0xff] }
 0xd11   : > { %v2246_v0 = vadd.f32 1e-05, %v2245_v63  ;;  %v2324_v63 = vld [vmem:[%s6397_s13 + $0x1e8] sm:$0xff] }
 0xd13   : > { %4818 = vrsqrt.f32 %v2246_v0  ;;  %v2310_v0 = vld [vmem:[%s6397_s13 + $0x178] sm:$0xff] }
 0xd1d   : > { %v4819_v2 = vpop.eup %4818 }
 0xd1e   : > { %v2248_v9 = vmul.f32 %v4819_v2, %v2240_v31  ;;  %v2290_v31 = vld [vmem:[%s6397_s13 + $0xd8] sm:$0xff]  ;;  %v4489_v2 = vpack.c.bf16 %v2291_v57, %v2275_v56  ;;  %v4515_v57 = vpack.c.bf16 %v3021_v51, %v3020_v50  ;;  %v3078_v51 = vld [vmem:[%s6399_s15 + $0x280] sm:$0xff] }
 0xd1f   : > { %v4479_v36 = vpack.c.bf16 %v2290_v31, %v2274_v30  ;;  %v3048_v30 = vld [vmem:[%s6399_s15 + $0x190] sm:$0xff]  ;;  %v3049_v31 = vld [vmem:[%s6399_s15 + $0x198] sm:$0xff] }
 0xd20   : > { %v2255_v17 = vmul.f32 %v3950_v1, %v2248_v9  ;;  %v2326_v1 = vld [vmem:[%s6397_s13 + $0x1f8] sm:$0xff]  ;;  %v4491_v9 = vpack.c.bf16 %v2324_v63, %v2308_v62  ;;  %v3023_v62 = vld [vmem:[%s6399_s15 + $0xc8] sm:$0xff]  ;;  %v3054_v63 = vld [vmem:[%s6399_s15 + $0x1c0] sm:$0xff] }
 0xd21   : > { %v4499_v10 = vpack.c.bf16 %v2326_v1, %v2310_v0  ;;  %v3005_v56 = vld [vmem:[%s6399_s15 + $0x38] sm:$0xff]  ;;  %v3055_v0 = vld [vmem:[%s6399_s15 + $0x1c8] sm:$0xff] }
 0xd22   : > { %v5377_v23 = vadd.f32 %v3951_v4, %v2255_v17  ;;  %v4497_v4 = vpack.c.bf16 %v2293_v61, %v2277_v60  ;;  %v3047_v17 = vld [vmem:[%s6399_s15 + $0x188] sm:$0xff]  ;;  %v3037_v60 = vld [vmem:[%s6399_s15 + $0x138] sm:$0xff]  ;;  %v3022_v61 = vld [vmem:[%s6399_s15 + $0xc0] sm:$0xff] }
 0xd24   : > { %3952 = vmatmul.mubr.msk.f32.vlgmr.msra.gmra.mrb[20].mxu1 %vm618_vm1, %v5377_v23  ;;  %3953 = vmatmul.mubr.msk.f32.vlgmr.msra.gmra.mrb[14].mxu0 %vm618_vm1, %v5377_v23 }
 0xd25   : > { %4458 = vmatpush1.bf16.msra.mxu1 %v4457_v18  ;;  %4466 = vmatpush1.bf16.msra.mxu0 %v4465_v19  ;;  %v4493_v18 = vpack.c.bf16 %v2323_v7, %v2307_v5  ;;  %v4501_v19 = vpack.c.bf16 %v2325_v12, %v2309_v3  ;;  %v3007_v5 = vld [vmem:[%s6399_s15 + $0x48] sm:$0xff]  ;;  %v4519_v7 = vpack.c.bf16 %v3023_v62, %v3022_v61  ;;  %v3024_v12 = vld [vmem:[%s6399_s15 + $0xd0] sm:$0xff]  ;;  %v2337_v61 = vsub.s32 1, %v5020_v21 }
 0xd26   : > { %4460 = vmatprep.subr.bf16.mxu1 %v4459_v24  ;;  %4468 = vmatprep.subr.bf16.mxu0 %v4467_v25  ;;  %v4503_v24 = vpack.c.bf16 %v3015_v15, %v3014_v13  ;;  %v4535_v25 = vpack.c.bf16 %v3047_v17, %v3046_v16  ;;  %v3039_v3 = vld [vmem:[%s6399_s15 + $0x148] sm:$0xff]  ;;  %v3025_v13 = vld [vmem:[%s6399_s15 + $0xd8] sm:$0xff]  ;;  %v3056_v15 = vld [vmem:[%s6399_s15 + $0x1d0] sm:$0xff]  ;;  %v2345_v62 = vsub.s32 3, %v5020_v21 }
 0xd27   : > { %2620 = vmatprep.mubr.f32.mxu1 %v4832_v6  ;;  %2691 = vmatprep.mubr.f32.mxu0 %v4832_v6  ;;  %v3057_v16 = vld [vmem:[%s6399_s15 + $0x1d8] sm:$0xff] }
 0xd29   : > { %4462 = vmatpush1.bf16.msra.mxu1 %v4461_v32  ;;  %4470 = vmatpush1.bf16.msra.mxu0 %v4469_v33  ;;  %v4505_v32 = vpack.c.bf16 %v2999_v22, %v2998_v20  ;;  %v4537_v33 = vpack.c.bf16 %v3031_v27, %v3030_v26  ;;  %v3009_v20 = vld [vmem:[%s6399_s15 + $0x58] sm:$0xff]  ;;  %v4523_v22 = vpack.c.bf16 %v3025_v13, %v3024_v12  ;;  %v3026_v27 = vld [vmem:[%s6399_s15 + $0xe0] sm:$0xff] }
 0xd2a   : > { %4472 = vmatprep.subr.bf16.mxu1 %v4471_v11  ;;  %4480 = vmatprep.subr.bf16.mxu0 %v4479_v36  ;;  %v4539_v11 = vpack.c.bf16 %v3049_v31, %v3048_v30  ;;  %v3032_v36 = vld [vmem:[%s6399_s15 + $0x110] sm:$0xff]  ;;  %v3041_v26 = vld [vmem:[%s6399_s15 + $0x158] sm:$0xff]  ;;  %v3059_v30 = vld [vmem:[%s6399_s15 + $0x1e8] sm:$0xff] }
 0xd2c   : > { %3954 = vmatmul.mubr.msk.f32.vlgmr.msra.gmra.mrb[22].mxu1 %vm618_vm1, %v5377_v23  ;;  %3955 = vmatmul.mubr.msk.f32.vlgmr.msra.gmra.mrb[16].mxu0 %vm618_vm1, %v5377_v23 }
 0xd2d   : > { %4474 = vmatpush1.bf16.msra.mxu1 %v4473_v43  ;;  %4482 = vmatpush1.bf16.msra.mxu0 %v4481_v44  ;;  %v4541_v43 = vpack.c.bf16 %v3033_v37, %v3032_v36  ;;  %v3002_v44 = vld [vmem:[%s6399_s15 + $0x20] sm:$0xff]  ;;  %v3043_v36 = vld [vmem:[%s6399_s15 + $0x168] sm:$0xff] }
 0xd2e   : > { %4476 = vmatprep.subr.bf16.mxu1 %v4475_v47  ;;  %4484 = vmatprep.subr.bf16.mxu0 %v4483_v48  ;;  %v4543_v47 = vpack.c.bf16 %v3051_v41, %v3050_v40  ;;  %v3034_v48 = vld [vmem:[%s6399_s15 + $0x120] sm:$0xff]  ;;  %v4513_v8 = vpack.c.bf16 %v3003_v45, %v3002_v44  ;;  %v3029_v40 = vld [vmem:[%s6399_s15 + $0xf8] sm:$0xff]  ;;  %v3060_v41 = vld [vmem:[%s6399_s15 + $0x1f0] sm:$0xff] }
 0xd2f   : > { %2762 = vmatprep.mubr.f32.mxu1 %v4832_v6  ;;  %2833 = vmatprep.mubr.f32.mxu0 %v4832_v6  ;;  %v3012_v44 = vld [vmem:[%s6399_s15 + $0x70] sm:$0xff]  ;;  %v3013_v45 = vld [vmem:[%s6399_s15 + $0x78] sm:$0xff] }
 0xd31   : > { %4478 = vmatpush1.bf16.msra.mxu1 %v4477_v54  ;;  %4486 = vmatpush1.bf16.msra.mxu0 %v4485_v55  ;;  %v4545_v54 = vpack.c.bf16 %v3035_v49, %v3034_v48  ;;  %v3004_v55 = vld [vmem:[%s6399_s15 + $0x30] sm:$0xff]  ;;  %v3045_v49 = vld [vmem:[%s6399_s15 + $0x178] sm:$0xff] }
 0xd32   : > { %4488 = vmatprep.subr.bf16.mxu1 %v4487_v58  ;;  %4496 = vmatprep.subr.bf16.mxu0 %v4495_v59  ;;  %v4547_v58 = vpack.c.bf16 %v3053_v53, %v3052_v52  ;;  %v3036_v59 = vld [vmem:[%s6399_s15 + $0x130] sm:$0xff]  ;;  %v4517_v1 = vpack.c.bf16 %v3005_v56, %v3004_v55  ;;  %v3079_v52 = vld [vmem:[%s6399_s15 + $0x288] sm:$0xff]  ;;  %v3110_v53 = vld [vmem:[%s6399_s15 + $0x380] sm:$0xff]  ;;  %v2357_v56 = vsub.s32 6, %v5020_v21 }
 0xd33   : > { %v3044_v48 = vld [vmem:[%s6399_s15 + $0x170] sm:$0xff] }
 0xd34   : > { %3956 = vmatmul.mubr.msk.f32.vlgmr.msra.gmra.mrb[24].mxu1 %vm618_vm1, %v5377_v23  ;;  %3957 = vmatmul.mubr.msk.f32.vlgmr.msra.gmra.mrb[18].mxu0 %vm618_vm1, %v5377_v23  ;;  %v4565_v50 = vpack.c.bf16 %v3045_v49, %v3044_v48  ;;  %v3067_v48 = vld [vmem:[%s6399_s15 + $0x228] sm:$0xff] }
 0xd35   : > { %4490 = vmatpush1.bf16.msra.mxu1 %v4489_v2  ;;  %4498 = vmatpush1.bf16.msra.mxu0 %v4497_v4  ;;  %v4549_v2 = vpack.c.bf16 %v3037_v60, %v3036_v59  ;;  %v3006_v4 = vld [vmem:[%s6399_s15 + $0x40] sm:$0xff]  ;;  %v2341_v59 = vsub.s32 2, %v5020_v21 }
 0xd36   : > { %4492 = vmatprep.subr.bf16.mxu1 %v4491_v9  ;;  %4500 = vmatprep.subr.bf16.mxu0 %v4499_v10  ;;  %v4551_v9 = vpack.c.bf16 %v3055_v0, %v3054_v63  ;;  %v3038_v10 = vld [vmem:[%s6399_s15 + $0x140] sm:$0xff]  ;;  %v4521_v17 = vpack.c.bf16 %v3007_v5, %v3006_v4 }
 0xd37   : > { %2904 = vmatprep.mubr.f32.mxu1 %v4832_v6  ;;  %2975 = vmatprep.mubr.f32.mxu0 %v4832_v6  ;;  %v3000_v6 = vld [vmem:[%s6399_s15 + $0x10] sm:$0xff]  ;;  %v5722_v60 = vld [vmem:[%s6398_s14] sm:$0xff] }
 0xd38   : > { %v4509_v42 = vpack.c.bf16 %v3001_v34, %v3000_v6  ;;  %v4527_v6 = vpack.c.bf16 %v3027_v28, %v3026_v27  ;;  %v4559_v34 = vpack.c.bf16 %v3059_v30, %v3058_v29  ;;  %v2334_v63 = vrot.slane %v5722_v60, %v5184_v14 }
 0xd39   : > { %4494 = vmatpush1.bf16.msra.mxu1 %v4493_v18  ;;  %4502 = vmatpush1.bf16.msra.mxu0 %v4501_v19  ;;  %v4553_v18 = vpack.c.bf16 %v3039_v3, %v3038_v10  ;;  %v3008_v19 = vld [vmem:[%s6399_s15 + $0x50] sm:$0xff]  ;;  %v2342_v0 = vrot.slane %v5722_v60, %v2341_v59 }
 0xd3a   : > { %4504 = vmatprep.subr.bf16.mxu1 %v4503_v24  ;;  %4536 = vmatprep.subr.bf16.mxu0 %v4535_v25  ;;  %v4555_v24 = vpack.c.bf16 %v3057_v16, %v3056_v15  ;;  %v3040_v25 = vld [vmem:[%s6399_s15 + $0x150] sm:$0xff]  ;;  %v4525_v31 = vpack.c.bf16 %v3009_v20, %v3008_v19  ;;  %v3094_v15 = vld [vmem:[%s6399_s15 + $0x300] sm:$0xff]  ;;  %v3095_v16 = vld [vmem:[%s6399_s15 + $0x308] sm:$0xff]  ;;  %v2353_v20 = vsub.s32 5, %v5020_v21 }
 0xd3b   : > { %v4601_v30 = vpack.c.bf16 %v3095_v16, %v3094_v15  ;;  %v3100_v16 = vld [vmem:[%s6399_s15 + $0x330] sm:$0xff] }
 0xd3c   : > { %3958 = vmatmul.mubr.msk.f32.vlgmr.msra.gmra.mrb[26].mxu1 %vm618_vm1, %v5377_v23  ;;  %3959 = vmatmul.mubr.msk.f32.vlgmr.msra.gmra.mrb[20].mxu0 %vm618_vm1, %v5377_v23 }
 0xd3d   : > { %4506 = vmatpush3.bf16.msra.mxu1 %v4505_v32  ;;  %4538 = vmatpush3.bf16.msra.mxu0 %v4537_v33  ;;  %v4557_v32 = vpack.c.bf16 %v3041_v26, %v3040_v25  ;;  %v3010_v33 = vld [vmem:[%s6399_s15 + $0x60] sm:$0xff]  ;;  %v3112_v25 = vld [vmem:[%s6399_s15 + $0x390] sm:$0xff]  ;;  %v3113_v26 = vld [vmem:[%s6399_s15 + $0x398] sm:$0xff] }
 0xd3e   : > { %4508 = vmatprep.subr.bf16.mxu1 %v4507_v35  ;;  %4540 = vmatprep.subr.bf16.mxu0 %v4539_v11  ;;  %v3011_v35 = vld [vmem:[%s6399_s15 + $0x68] sm:$0xff]  ;;  %v3042_v11 = vld [vmem:[%s6399_s15 + $0x160] sm:$0xff] }
 0xd3f   : > { %v4529_v37 = vpack.c.bf16 %v3011_v35, %v3010_v33  ;;  %v4561_v38 = vpack.c.bf16 %v3043_v36, %v3042_v11  ;;  %v4603_v35 = vpack.c.bf16 %v3113_v26, %v3112_v25  ;;  %v3096_v11 = vld [vmem:[%s6399_s15 + $0x310] sm:$0xff]  ;;  %v3097_v36 = vld [vmem:[%s6399_s15 + $0x318] sm:$0xff] }
 0xd41   : > { %4510 = vmatpush3.bf16.msra.mxu1 %v4509_v42  ;;  %4542 = vmatpush3.bf16.msra.mxu0 %v4541_v43  ;;  %v4531_v42 = vpack.c.bf16 %v3029_v40, %v3028_v39  ;;  %v3061_v43 = vld [vmem:[%s6399_s15 + $0x1f8] sm:$0xff]  ;;  %v3083_v40 = vld [vmem:[%s6399_s15 + $0x2a8] sm:$0xff] }
 0xd42   : > { %4512 = vmatprep.subr.bf16.mxu1 %v4511_v46  ;;  %4544 = vmatprep.subr.bf16.mxu0 %v4543_v47  ;;  %v4563_v46 = vpack.c.bf16 %v3061_v43, %v3060_v41  ;;  %v4533_v47 = vpack.c.bf16 %v3013_v45, %v3012_v44  ;;  %v3114_v41 = vld [vmem:[%s6399_s15 + $0x3a0] sm:$0xff] }
 0xd45   : > { %4514 = vmatpush3.bf16.msra.mxu1 %v4513_v8  ;;  %4546 = vmatpush3.bf16.msra.mxu0 %v4545_v54  ;;  %v4567_v8 = vpack.c.bf16 %v3079_v52, %v3078_v51  ;;  %v3111_v54 = vld [vmem:[%s6399_s15 + $0x388] sm:$0xff] }
 0xd46   : > { %4516 = vmatprep.subr.bf16.mxu1 %v4515_v57  ;;  %4548 = vmatprep.subr.bf16.mxu0 %v4547_v58  ;;  %v4599_v55 = vpack.c.bf16 %v3111_v54, %v3110_v53  ;;  %v5711_v57 = vld [vmem:[%s6398_s14 + $0x8] sm:$0xff]  ;;  %v3098_v53 = vld [vmem:[%s6399_s15 + $0x320] sm:$0xff]  ;;  %v3084_v54 = vld [vmem:[%s6399_s15 + $0x2b0] sm:$0xff] }
 0xd47   : > { %v5716_v58 = vrot.slane %v5711_v57, %v2357_v56 }
 0xd49   : > { %4518 = vmatpush3.bf16.msra.mxu1 %v4517_v1  ;;  %4550 = vmatpush3.bf16.msra.mxu0 %v4549_v2  ;;  %v2338_v1 = vrot.slane %v5722_v60, %v2337_v61  ;;  %v2346_v2 = vrot.slane %v5722_v60, %v2345_v62 }
 0xd4a   : > { %4520 = vmatprep.subr.bf16.mxu1 %v4519_v7  ;;  %4552 = vmatprep.subr.bf16.mxu0 %v4551_v9  ;;  %v3062_v7 = vld [vmem:[%s6399_s15 + $0x200] sm:$0xff]  ;;  %v3063_v9 = vld [vmem:[%s6399_s15 + $0x208] sm:$0xff] }
 0xd4b   : > { %v4569_v29 = vpack.c.bf16 %v3063_v9, %v3062_v7 }
 0xd4d   : > { %4522 = vmatpush3.bf16.msra.mxu1 %v4521_v17  ;;  %4554 = vmatpush3.bf16.msra.mxu0 %v4553_v18  ;;  %v3080_v17 = vld [vmem:[%s6399_s15 + $0x290] sm:$0xff] }
 0xd4e   : > { %4524 = vmatprep.subr.bf16.mxu1 %v4523_v22  ;;  %4556 = vmatprep.subr.bf16.mxu0 %v4555_v24  ;;  %v2361_v22 = vsub.s32 7, %v5020_v21  ;;  %v3081_v24 = vld [vmem:[%s6399_s15 + $0x298] sm:$0xff] }
 0xd50   : > { %v2362_v39 = vrot.slane %v5722_v60, %v2361_v22 }
 0xd51   : > { %4526 = vmatpush3.bf16.msra.mxu1 %v4525_v31  ;;  %4558 = vmatpush3.bf16.msra.mxu0 %v4557_v32  ;;  %v3064_v31 = vld [vmem:[%s6399_s15 + $0x210] sm:$0xff]  ;;  %v3065_v32 = vld [vmem:[%s6399_s15 + $0x218] sm:$0xff] }
 0xd52   : > { %4528 = vmatprep.subr.bf16.mxu1 %v4527_v6  ;;  %4560 = vmatprep.subr.bf16.mxu0 %v4559_v34  ;;  %v4571_v34 = vpack.c.bf16 %v3081_v24, %v3080_v17  ;;  %v4573_v45 = vpack.c.bf16 %v3065_v32, %v3064_v31  ;;  %v3101_v17 = vld [vmem:[%s6399_s15 + $0x338] sm:$0xff]  ;;  %v3119_v24 = vld [vmem:[%s6399_s15 + $0x3c8] sm:$0xff] }
 0xd55   : > { %4530 = vmatpush3.bf16.msra.mxu1 %v4529_v37  ;;  %4562 = vmatpush3.bf16.msra.mxu0 %v4561_v38  ;;  %v3082_v37 = vld [vmem:[%s6399_s15 + $0x2a0] sm:$0xff]  ;;  %v2354_v38 = vrot.slane %v5722_v60, %v2353_v20 }
 0xd56   : > { %4532 = vmatprep.subr.bf16.mxu1 %v4531_v42  ;;  %4564 = vmatprep.subr.bf16.mxu0 %v4563_v46  ;;  %v3115_v42 = vld [vmem:[%s6399_s15 + $0x3a8] sm:$0xff]  ;;  %v4605_v46 = vpack.c.bf16 %v3097_v36, %v3096_v11  ;;  %v4575_v51 = vpack.c.bf16 %v3083_v40, %v3082_v37  ;;  %v3088_v36 = vld [vmem:[%s6399_s15 + $0x2d0] sm:$0xff]  ;;  %v3089_v37 = vld [vmem:[%s6399_s15 + $0x2d8] sm:$0xff]  ;;  %v2349_v40 = vsub.s32 4, %v5020_v21 }
 0xd57   : > { %v4607_v52 = vpack.c.bf16 %v3115_v42, %v3114_v41  ;;  %v3103_v11 = vld [vmem:[%s6399_s15 + $0x348] sm:$0xff] }
 0xd59   : > { %4534 = vmatpush3.bf16.msra.mxu1 %v4533_v47  ;;  %4566 = vmatpush3.bf16.msra.mxu0 %v4565_v50  ;;  %v3066_v47 = vld [vmem:[%s6399_s15 + $0x220] sm:$0xff] }
 0xd5a   : > { %4568 = vmatprep.subr.bf16.mxu1 %v4567_v8  ;;  %4600 = vmatprep.subr.bf16.mxu0 %v4599_v55  ;;  %v3099_v8 = vld [vmem:[%s6399_s15 + $0x328] sm:$0xff]  ;;  %v4577_v7 = vpack.c.bf16 %v3067_v48, %v3066_v47  ;;  %v3104_v47 = vld [vmem:[%s6399_s15 + $0x350] sm:$0xff]  ;;  %v2382_v48 = vrot.slane %v5711_v57, %v2349_v40 }
 0xd5b   : > { %v4609_v9 = vpack.c.bf16 %v3099_v8, %v3098_v53  ;;  %v3091_v53 = vld [vmem:[%s6399_s15 + $0x2e8] sm:$0xff]  ;;  %v3122_v8 = vld [vmem:[%s6399_s15 + $0x3e0] sm:$0xff] }
 0xdf7   : > { %v2480_v4 = vpop.f32.mrb[20].mxu1  ;;  %v2551_v5 = vpop.f32.mrb[14].mxu0 }
 0xdf8   : > { %v2481_v10 = vadd.f32 %v2480_v4, %v2334_v63  ;;  %v2552_v3 = vadd.f32 %v2551_v5, %v2342_v0  ;;  %v2482_v12 = vpop.f32.mrb[21].mxu1  ;;  %v2553_v13 = vpop.f32.mrb[15].mxu0  ;;  %v3085_v0 = vld [vmem:[%s6399_s15 + $0x2b8] sm:$0xff] }
 0xdf9   : > { %v2483_v18 = vadd.f32 %v2482_v12, %v2338_v1  ;;  %v2554_v19 = vadd.f32 %v2553_v13, %v2346_v2  ;;  %v3116_v1 = vld [vmem:[%s6399_s15 + $0x3b0] sm:$0xff]  ;;  %v3117_v2 = vld [vmem:[%s6399_s15 + $0x3b8] sm:$0xff]  ;;  %v2374_v12 = vrot.slane %v5711_v57, %v2341_v59  ;;  %v4579_v13 = vpack.c.bf16 %v3085_v0, %v3084_v54  ;;  %v3087_v59 = vld [vmem:[%s6399_s15 + $0x2c8] sm:$0xff] }
 0xdfa   : > { %v2982_v33 = vmax.f32 %v2481_v10, 0.0  ;;  %v2984_v6 = vmax.f32 %v2552_v3, 0.0  ;;  %v3068_v10 = vld [vmem:[%s6399_s15 + $0x230] sm:$0xff]  ;;  %v3069_v3 = vld [vmem:[%s6399_s15 + $0x238] sm:$0xff]  ;;  %v4611_v15 = vpack.c.bf16 %v3117_v2, %v3116_v1  ;;  %v3123_v54 = vld [vmem:[%s6399_s15 + $0x3e8] sm:$0xff] }
 0xdfb   : > { %v2983_v27 = vmax.f32 %v2483_v18, 0.0  ;;  %v2985_v28 = vmax.f32 %v2554_v19, 0.0  ;;  %v3086_v18 = vld [vmem:[%s6399_s15 + $0x2c0] sm:$0xff] }
 0xdfc   : > { %v3118_v19 = vld [vmem:[%s6399_s15 + $0x3c0] sm:$0xff] }
 0xdfd   : > { %3325 = vmatprep.mubr.f32.mxu1 %v2983_v27  ;;  %3395 = vmatprep.mubr.f32.mxu0 %v2985_v28  ;;  %v4581_v27 = vpack.c.bf16 %v3069_v3, %v3068_v10  ;;  %v4613_v28 = vpack.c.bf16 %v3101_v17, %v3100_v16  ;;  %v3093_v16 = vld [vmem:[%s6399_s15 + $0x2f8] sm:$0xff]  ;;  %v3124_v17 = vld [vmem:[%s6399_s15 + $0x3f0] sm:$0xff] }
 0xdfe   : > { %3326 = vmatmul.mubr.f32.vlgmr.msra.gmra.mrb[28].mxu1 %v2982_v33  ;;  %3396 = vmatmul.mubr.f32.vlgmr.msra.gmra.mrb[22].mxu0 %v2984_v6  ;;  %v4583_v6 = vpack.c.bf16 %v3087_v59, %v3086_v18  ;;  %v3125_v18 = vld [vmem:[%s6399_s15 + $0x3f8] sm:$0xff]  ;;  %v2350_v59 = vrot.slane %v5722_v60, %v2349_v40 }
 0xdff   : > { %v5793_v43 = vpop.f32.mrb[22].mxu1  ;;  %v5795_v44 = vpop.f32.mrb[16].mxu0  ;;  %4570 = vmatpush3.bf16.msra.mxu1 %v4569_v29  ;;  %4602 = vmatpush3.bf16.msra.mxu0 %v4601_v30  ;;  %v3070_v29 = vld [vmem:[%s6399_s15 + $0x240] sm:$0xff]  ;;  %v3071_v30 = vld [vmem:[%s6399_s15 + $0x248] sm:$0xff] }
 0xe00   : > { %v2624_v49 = vpop.f32.mrb[23].mxu1  ;;  %v2695_v50 = vpop.f32.mrb[17].mxu0  ;;  %4572 = vmatprep.subr.bf16.mxu1 %v4571_v34  ;;  %4604 = vmatprep.subr.bf16.mxu0 %v4603_v35  ;;  %v4615_v34 = vpack.c.bf16 %v3119_v24, %v3118_v19  ;;  %v3102_v35 = vld [vmem:[%s6399_s15 + $0x340] sm:$0xff]  ;;  %v4585_v41 = vpack.c.bf16 %v3071_v30, %v3070_v29  ;;  %v2358_v29 = vrot.slane %v5722_v60, %v2357_v56 }
 0xe01   : > { %v2625_v55 = vadd.f32 %v2624_v49, %v2354_v38  ;;  %v2696_v63 = vadd.f32 %v2695_v50, %v2362_v39  ;;  %v3120_v38 = vld [vmem:[%s6399_s15 + $0x3d0] sm:$0xff]  ;;  %v3121_v39 = vld [vmem:[%s6399_s15 + $0x3d8] sm:$0xff]  ;;  %v4617_v42 = vpack.c.bf16 %v3103_v11, %v3102_v35  ;;  %v4587_v49 = vpack.c.bf16 %v3089_v37, %v3088_v36  ;;  %v3142_v35 = vld [vmem:[%s6399_s15 + $0x480] sm:$0xff] }
 0xe02   : > { %v4619_v50 = vpack.c.bf16 %v3121_v39, %v3120_v38  ;;  %v3143_v11 = vld [vmem:[%s6399_s15 + $0x488] sm:$0xff]  ;;  %v2370_v56 = vrot.slane %v5711_v57, %v2337_v61  ;;  %v3174_v60 = vld [vmem:[%s6399_s15 + $0x580] sm:$0xff]  ;;  %v2378_v37 = vrot.slane %v5711_v57, %v2345_v62  ;;  %v2694_v61 = vadd.f32 %v5795_v44, %v2358_v29  ;;  %v3144_v44 = vld [vmem:[%s6399_s15 + $0x490] sm:$0xff] }
 0xe03   : > { %v2987_v4 = vmax.f32 %v2625_v55, 0.0  ;;  %v2989_v5 = vmax.f32 %v2696_v63, 0.0  ;;  %4574 = vmatpush3.bf16.msra.mxu1 %v4573_v45  ;;  %4606 = vmatpush3.bf16.msra.mxu0 %v4605_v46  ;;  %v3072_v45 = vld [vmem:[%s6399_s15 + $0x250] sm:$0xff]  ;;  %v3073_v46 = vld [vmem:[%s6399_s15 + $0x258] sm:$0xff]  ;;  %v3175_v36 = vld [vmem:[%s6399_s15 + $0x588] sm:$0xff]  ;;  %v4631_v40 = vpack.c.bf16 %v3143_v11, %v3142_v35 }
 0xe04   : > { %4576 = vmatprep.subr.bf16.mxu1 %v4575_v51  ;;  %4608 = vmatprep.subr.bf16.mxu0 %v4607_v52  ;;  %v3105_v51 = vld [vmem:[%s6399_s15 + $0x358] sm:$0xff]  ;;  %v3090_v52 = vld [vmem:[%s6399_s15 + $0x2e0] sm:$0xff]  ;;  %v4589_v0 = vpack.c.bf16 %v3073_v46, %v3072_v45  ;;  %v3127_v62 = vld [vmem:[%s6399_s15 + $0x408] sm:$0xff] }
 0xe05   : > { %3465 = vmatprep.mubr.f32.mxu1 %v2987_v4  ;;  %3535 = vmatprep.mubr.f32.mxu0 %v2989_v5  ;;  %v4621_v1 = vpack.c.bf16 %v3105_v51, %v3104_v47  ;;  %v4591_v2 = vpack.c.bf16 %v3091_v53, %v3090_v52  ;;  %v3074_v4 = vld [vmem:[%s6399_s15 + $0x260] sm:$0xff]  ;;  %v3075_v5 = vld [vmem:[%s6399_s15 + $0x268] sm:$0xff]  ;;  %v2988_v53 = vmax.f32 %v2694_v61, 0.0  ;;  %v3180_v29 = vld [vmem:[%s6399_s15 + $0x5b0] sm:$0xff] }
 0xe06   : > { %v4593_v19 = vpack.c.bf16 %v3075_v5, %v3074_v4  ;;  %v3126_v45 = vld [vmem:[%s6399_s15 + $0x400] sm:$0xff]  ;;  %v3147_v5 = vld [vmem:[%s6399_s15 + $0x4a8] sm:$0xff]  ;;  %v3132_v11 = vld [vmem:[%s6399_s15 + $0x430] sm:$0xff] }
 0xe07   : > { %v5848_v25 = vpop.f32.mrb[24].mxu1  ;;  %v2835_v26 = vpop.f32.mrb[18].mxu0  ;;  %4578 = vmatpush3.bf16.msra.mxu1 %v4577_v7  ;;  %4610 = vmatpush3.bf16.msra.mxu0 %v4609_v9  ;;  %v3158_v47 = vld [vmem:[%s6399_s15 + $0x500] sm:$0xff]  ;;  %v4633_v51 = vpack.c.bf16 %v3127_v62, %v3126_v45 }
 0xe08   : > { %v5856_v31 = vadd.f32 %v2835_v26, %v2374_v12  ;;  %v5858_v32 = vpop.f32.mrb[25].mxu1  ;;  %v5860_v33 = vpop.f32.mrb[19].mxu0  ;;  %4580 = vmatprep.subr.bf16.mxu1 %v4579_v13  ;;  %4612 = vmatprep.subr.bf16.mxu0 %v4611_v15  ;;  %v4623_v12 = vpack.c.bf16 %v3123_v54, %v3122_v8  ;;  %v3106_v13 = vld [vmem:[%s6399_s15 + $0x360] sm:$0xff]  ;;  %v3107_v15 = vld [vmem:[%s6399_s15 + $0x368] sm:$0xff]  ;;  %v3076_v26 = vld [vmem:[%s6399_s15 + $0x270] sm:$0xff] }
 0xe09   : > { %v4625_v24 = vpack.c.bf16 %v3107_v15, %v3106_v13  ;;  %v2767_v46 = vadd.f32 %v5858_v32, %v2370_v56  ;;  %v3176_v32 = vld [vmem:[%s6399_s15 + $0x590] sm:$0xff]  ;;  %v3129_v54 = vld [vmem:[%s6399_s15 + $0x418] sm:$0xff]  ;;  %v3146_v4 = vld [vmem:[%s6399_s15 + $0x4a0] sm:$0xff] }
 0xe0a   : > { %v3128_v8 = vld [vmem:[%s6399_s15 + $0x410] sm:$0xff]  ;;  %v3178_v13 = vld [vmem:[%s6399_s15 + $0x5a0] sm:$0xff]  ;;  %v3179_v15 = vld [vmem:[%s6399_s15 + $0x5a8] sm:$0xff] }
 0xe0b   : > { %4582 = vmatpush3.bf16.msra.mxu1 %v4581_v27  ;;  %4614 = vmatpush3.bf16.msra.mxu0 %v4613_v28  ;;  %v3077_v27 = vld [vmem:[%s6399_s15 + $0x278] sm:$0xff]  ;;  %v3108_v28 = vld [vmem:[%s6399_s15 + $0x370] sm:$0xff]  ;;  %v3134_v62 = vld [vmem:[%s6399_s15 + $0x440] sm:$0xff] }
 0xe0c   : > { %4584 = vmatprep.subr.bf16.mxu1 %v4583_v6  ;;  %4616 = vmatprep.subr.bf16.mxu0 %v4615_v34  ;;  %v4627_v6 = vpack.c.bf16 %v3125_v18, %v3124_v17  ;;  %v3109_v34 = vld [vmem:[%s6399_s15 + $0x378] sm:$0xff]  ;;  %v4597_v38 = vpack.c.bf16 %v3077_v27, %v3076_v26  ;;  %v4639_v17 = vpack.c.bf16 %v3147_v5, %v3146_v4  ;;  %v3130_v18 = vld [vmem:[%s6399_s15 + $0x420] sm:$0xff]  ;;  %v3163_v26 = vld [vmem:[%s6399_s15 + $0x528] sm:$0xff] }
 0xe0d   : > { %v4629_v39 = vpack.c.bf16 %v3109_v34, %v3108_v28  ;;  %v3148_v27 = vld [vmem:[%s6399_s15 + $0x4b0] sm:$0xff]  ;;  %v3149_v28 = vld [vmem:[%s6399_s15 + $0x4b8] sm:$0xff]  ;;  %v3187_v4 = vld [vmem:[%s6399_s15 + $0x5e8] sm:$0xff] }
 0xe0e   : > { %v4643_v35 = vpack.c.bf16 %v3149_v28, %v3148_v27  ;;  %v3133_v56 = vld [vmem:[%s6399_s15 + $0x438] sm:$0xff]  ;;  %v2366_v28 = vrot.slane %v5711_v57, %v5184_v14 }
 0xe0f   : > { %v2906_v55 = vpop.f32.mrb[26].mxu1  ;;  %v2977_v63 = vpop.f32.mrb[20].mxu0  ;;  %4586 = vmatpush3.bf16.msra.mxu1 %v4585_v41  ;;  %4618 = vmatpush3.bf16.msra.mxu0 %v4617_v42  ;;  %v2623_v41 = vadd.f32 %v5793_v43, %v2350_v59  ;;  %v4663_v42 = vpack.c.bf16 %v3175_v36, %v3174_v60  ;;  %v3159_v43 = vld [vmem:[%s6399_s15 + $0x508] sm:$0xff]  ;;  %v3164_v60 = vld [vmem:[%s6399_s15 + $0x530] sm:$0xff]  ;;  %v4645_v61 = vpack.c.bf16 %v3133_v56, %v3132_v11  ;;  %v3173_v14 = vld [vmem:[%s6399_s15 + $0x578] sm:$0xff] }
 0xe10   : > { %v5912_v7 = vadd.f32 %v2906_v55, %v2382_v48  ;;  %v5915_v9 = vadd.f32 %v2977_v63, %v5716_v58  ;;  %v5917_v10 = vpop.f32.mrb[27].mxu1  ;;  %v5919_v3 = vpop.f32.mrb[21].mxu0  ;;  %4588 = vmatprep.subr.bf16.mxu1 %v4587_v49  ;;  %4620 = vmatprep.subr.bf16.mxu0 %v4619_v50  ;;  %v3092_v58 = vld [vmem:[%s6399_s15 + $0x2f0] sm:$0xff]  ;;  %v2838_v48 = vadd.f32 %v5860_v33, %v2378_v37  ;;  %v3145_v49 = vld [vmem:[%s6399_s15 + $0x498] sm:$0xff]  ;;  %v2991_v63 = vmax.f32 %v2767_v46, 0.0  ;;  %v3131_v59 = vld [vmem:[%s6399_s15 + $0x428] sm:$0xff] }
 0xe11   : > { %v4595_v30 = vpack.c.bf16 %v3093_v16, %v3092_v58  ;;  %v3177_v50 = vld [vmem:[%s6399_s15 + $0x598] sm:$0xff]  ;;  %v2986_v52 = vmax.f32 %v2623_v41, 0.0  ;;  %v4665_v33 = vpack.c.bf16 %v3159_v43, %v3158_v47  ;;  %v3160_v55 = vld [vmem:[%s6399_s15 + $0x510] sm:$0xff]  ;;  %v4637_v58 = vpack.c.bf16 %v3129_v54, %v3128_v8  ;;  %v3183_v41 = vld [vmem:[%s6399_s15 + $0x5c8] sm:$0xff] }
 0xe12   : > { %v3165_v37 = vld [vmem:[%s6399_s15 + $0x538] sm:$0xff]  ;;  %v3135_v46 = vld [vmem:[%s6399_s15 + $0x448] sm:$0xff]  ;;  %v3166_v47 = vld [vmem:[%s6399_s15 + $0x540] sm:$0xff] }
 0xe13   : > { %4590 = vmatpush3.bf16.msra.mxu1 %v4589_v0  ;;  %4622 = vmatpush3.bf16.msra.mxu0 %v4621_v1  ;;  %v4635_v0 = vpack.c.bf16 %v3145_v49, %v3144_v44  ;;  %v4667_v1 = vpack.c.bf16 %v3177_v50, %v3176_v32  ;;  %v3167_v44 = vld [vmem:[%s6399_s15 + $0x548] sm:$0xff]  ;;  %v3153_v49 = vld [vmem:[%s6399_s15 + $0x4d8] sm:$0xff]  ;;  %v3184_v32 = vld [vmem:[%s6399_s15 + $0x5d0] sm:$0xff] }
 0xe14   : > { %4592 = vmatprep.subr.bf16.mxu1 %v4591_v2  ;;  %4624 = vmatprep.subr.bf16.mxu0 %v4623_v12  ;;  %v3161_v2 = vld [vmem:[%s6399_s15 + $0x518] sm:$0xff]  ;;  %v2993_v12 = vmax.f32 %v2838_v48, 0.0  ;;  %v3152_v48 = vld [vmem:[%s6399_s15 + $0x4d0] sm:$0xff]  ;;  %v3206_v56 = vld [vmem:[%s6399_s15 + $0x680] sm:$0xff] }
 0xe15   : > { %v4669_v16 = vpack.c.bf16 %v3161_v2, %v3160_v55  ;;  %v3185_v50 = vld [vmem:[%s6399_s15 + $0x5d8] sm:$0xff]  ;;  %v3168_v54 = vld [vmem:[%s6399_s15 + $0x550] sm:$0xff]  ;;  %v3186_v2 = vld [vmem:[%s6399_s15 + $0x5e0] sm:$0xff] }
 0xe16   : > { %v3137_v8 = vld [vmem:[%s6399_s15 + $0x458] sm:$0xff]  ;;  %v4683_v55 = vpack.c.bf16 %v3185_v50, %v3184_v32  ;;  %v3192_v32 = vld [vmem:[%s6399_s15 + $0x610] sm:$0xff] }
 0xe17   : > { %4594 = vmatpush3.bf16.msra.mxu1 %v4593_v19  ;;  %4626 = vmatpush3.bf16.msra.mxu0 %v4625_v24  ;;  %v3162_v19 = vld [vmem:[%s6399_s15 + $0x520] sm:$0xff]  ;;  %v4671_v24 = vpack.c.bf16 %v3179_v15, %v3178_v13  ;;  %v3224_v50 = vld [vmem:[%s6399_s15 + $0x710] sm:$0xff] }
 0xe18   : > { %4596 = vmatprep.subr.bf16.mxu1 %v4595_v30  ;;  %4628 = vmatprep.subr.bf16.mxu0 %v4627_v6  ;;  %v3181_v30 = vld [vmem:[%s6399_s15 + $0x5b8] sm:$0xff]  ;;  %v4641_v6 = vpack.c.bf16 %v3131_v59, %v3130_v18  ;;  %v4673_v34 = vpack.c.bf16 %v3163_v26, %v3162_v19  ;;  %v3138_v15 = vld [vmem:[%s6399_s15 + $0x460] sm:$0xff]  ;;  %v3171_v18 = vld [vmem:[%s6399_s15 + $0x568] sm:$0xff] }
 0xe19   : > { %v4675_v36 = vpack.c.bf16 %v3181_v30, %v3180_v29  ;;  %v3156_v59 = vld [vmem:[%s6399_s15 + $0x4f0] sm:$0xff]  ;;  %v3157_v19 = vld [vmem:[%s6399_s15 + $0x4f8] sm:$0xff] }
 0xe1a   : > { %v3189_v26 = vld [vmem:[%s6399_s15 + $0x5f8] sm:$0xff]  ;;  %v4659_v30 = vpack.c.bf16 %v3157_v19, %v3156_v59 }
 0xe1b   : > { %4598 = vmatpush3.bf16.msra.mxu1 %v4597_v38  ;;  %4630 = vmatpush3.bf16.msra.mxu0 %v4629_v39  ;;  %v3150_v38 = vld [vmem:[%s6399_s15 + $0x4c0] sm:$0xff]  ;;  %v3151_v39 = vld [vmem:[%s6399_s15 + $0x4c8] sm:$0xff]  ;;  %v3245_v59 = vld [vmem:[%s6399_s15 + $0x7b8] sm:$0xff] }
 0xe1c   : > { %4632 = vmatprep.subr.bf16.mxu1 %v4631_v40  ;;  %4664 = vmatprep.subr.bf16.mxu0 %v4663_v42  ;;  %v3182_v40 = vld [vmem:[%s6399_s15 + $0x5c0] sm:$0xff]  ;;  %v4677_v42 = vpack.c.bf16 %v3165_v37, %v3164_v60  ;;  %v4647_v45 = vpack.c.bf16 %v3151_v39, %v3150_v38  ;;  %v3207_v60 = vld [vmem:[%s6399_s15 + $0x688] sm:$0xff]  ;;  %v2394_v39 = vrot.slane %v5711_v57, %v2361_v22 }
 0xe1d   : > { %v4679_v43 = vpack.c.bf16 %v3183_v41, %v3182_v40  ;;  %v3238_v37 = vld [vmem:[%s6399_s15 + $0x780] sm:$0xff]  ;;  %v3239_v38 = vld [vmem:[%s6399_s15 + $0x788] sm:$0xff]  ;;  %v2765_v41 = vadd.f32 %v5848_v25, %v2366_v28  ;;  %v3197_v28 = vld [vmem:[%s6399_s15 + $0x638] sm:$0xff] }
 0xe1e   : > { %3466 = vmatmul.mubr.f32.vlgmr.msra.gmra.mrb[30].mxu1 %v2986_v52  ;;  %3536 = vmatmul.mubr.f32.vlgmr.msra.gmra.mrb[24].mxu0 %v2988_v53  ;;  %v4681_v52 = vpack.c.bf16 %v3167_v44, %v3166_v47  ;;  %v4651_v53 = vpack.c.bf16 %v3153_v49, %v3152_v48  ;;  %v4727_v21 = vpack.c.bf16 %v3239_v38, %v3238_v37  ;;  %v3223_v22 = vld [vmem:[%s6399_s15 + $0x708] sm:$0xff]  ;;  %v3240_v44 = vld [vmem:[%s6399_s15 + $0x790] sm:$0xff]  ;;  %v3198_v37 = vld [vmem:[%s6399_s15 + $0x640] sm:$0xff] }
 0xe1f   : > { %4634 = vmatpush3.bf16.msra.mxu1 %v4633_v51  ;;  %3605 = vmatprep.mubr.f32.mxu1 %v2991_v63  ;;  %v4649_v51 = vpack.c.bf16 %v3135_v46, %v3134_v62  ;;  %v3169_v63 = vld [vmem:[%s6399_s15 + $0x558] sm:$0xff]  ;;  %v3208_v62 = vld [vmem:[%s6399_s15 + $0x690] sm:$0xff]  ;;  %v2980_v47 = vadd.f32 %v5919_v3, %v2394_v39  ;;  %v2990_v48 = vmax.f32 %v2765_v41, 0.0  ;;  %v3199_v38 = vld [vmem:[%s6399_s15 + $0x648] sm:$0xff] }
 0xe20   : > { %4666 = vmatpush3.bf16.msra.mxu0 %v4665_v33  ;;  %3675 = vmatprep.mubr.f32.mxu0 %v2993_v12  ;;  %v3136_v33 = vld [vmem:[%s6399_s15 + $0x450] sm:$0xff]  ;;  %v4685_v12 = vpack.c.bf16 %v3169_v63, %v3168_v54  ;;  %v3209_v46 = vld [vmem:[%s6399_s15 + $0x698] sm:$0xff]  ;;  %v3243_v63 = vld [vmem:[%s6399_s15 + $0x7a8] sm:$0xff] }
 0xe21   : > { %4636 = vmatprep.subr.bf16.mxu1 %v4635_v0  ;;  %4668 = vmatprep.subr.bf16.mxu0 %v4667_v1  ;;  %v3154_v0 = vld [vmem:[%s6399_s15 + $0x4e0] sm:$0xff]  ;;  %v3155_v1 = vld [vmem:[%s6399_s15 + $0x4e8] sm:$0xff]  ;;  %v4653_v5 = vpack.c.bf16 %v3137_v8, %v3136_v33  ;;  %v3193_v3 = vld [vmem:[%s6399_s15 + $0x618] sm:$0xff] }
 0xe22   : > { %v4655_v13 = vpack.c.bf16 %v3155_v1, %v3154_v0  ;;  %v3210_v33 = vld [vmem:[%s6399_s15 + $0x6a0] sm:$0xff]  ;;  %v3211_v8 = vld [vmem:[%s6399_s15 + $0x6a8] sm:$0xff]  ;;  %v2997_v0 = vmax.f32 %v2980_v47, 0.0  ;;  %v4701_v1 = vpack.c.bf16 %v3193_v3, %v3192_v32 }
 0xe23   : > { %4638 = vmatpush3.bf16.msra.mxu1 %v4637_v58  ;;  %v3139_v58 = vld [vmem:[%s6399_s15 + $0x468] sm:$0xff]  ;;  %v3230_v39 = vld [vmem:[%s6399_s15 + $0x740] sm:$0xff] }
 0xe24   : > { %4670 = vmatpush3.bf16.msra.mxu0 %v4669_v16  ;;  %4640 = vmatprep.subr.bf16.mxu1 %v4639_v17  ;;  %v3170_v16 = vld [vmem:[%s6399_s15 + $0x560] sm:$0xff]  ;;  %v4687_v17 = vpack.c.bf16 %v3187_v4, %v3186_v2  ;;  %v4657_v27 = vpack.c.bf16 %v3139_v58, %v3138_v15  ;;  %v4703_v4 = vpack.c.bf16 %v3211_v8, %v3210_v33  ;;  %v3227_v58 = vld [vmem:[%s6399_s15 + $0x728] sm:$0xff] }
 0xe25   : > { %4672 = vmatprep.subr.bf16.mxu0 %v4671_v24  ;;  %v3188_v24 = vld [vmem:[%s6399_s15 + $0x5f0] sm:$0xff]  ;;  %v4689_v29 = vpack.c.bf16 %v3171_v18, %v3170_v16  ;;  %v3231_v41 = vld [vmem:[%s6399_s15 + $0x748] sm:$0xff] }
 0xe26   : > { %v4691_v11 = vpack.c.bf16 %v3189_v26, %v3188_v24  ;;  %v3212_v16 = vld [vmem:[%s6399_s15 + $0x6b0] sm:$0xff]  ;;  %v3235_v8 = vld [vmem:[%s6399_s15 + $0x768] sm:$0xff] }
 0xe27   : > { %4642 = vmatpush3.bf16.msra.mxu1 %v4641_v6  ;;  %v3140_v6 = vld [vmem:[%s6399_s15 + $0x470] sm:$0xff] }
 0xe28   : > { %4674 = vmatpush3.bf16.msra.mxu0 %v4673_v34  ;;  %4644 = vmatprep.subr.bf16.mxu1 %v4643_v35  ;;  %v3141_v34 = vld [vmem:[%s6399_s15 + $0x478] sm:$0xff]  ;;  %v3172_v35 = vld [vmem:[%s6399_s15 + $0x570] sm:$0xff] }
 0xe29   : > { %4676 = vmatprep.subr.bf16.mxu0 %v4675_v36  ;;  %v2386_v36 = vrot.slane %v5711_v57, %v2353_v20  ;;  %v4661_v40 = vpack.c.bf16 %v3141_v34, %v3140_v6  ;;  %v4695_v20 = vpack.c.bf16 %v3207_v60, %v3206_v56  ;;  %v3222_v57 = vld [vmem:[%s6399_s15 + $0x700] sm:$0xff]  ;;  %v3244_v18 = vld [vmem:[%s6399_s15 + $0x7b0] sm:$0xff]  ;;  %v3229_v6 = vld [vmem:[%s6399_s15 + $0x738] sm:$0xff] }
 0xe2a   : > { %v4729_v49 = vpack.c.bf16 %v3223_v22, %v3222_v57  ;;  %v3214_v34 = vld [vmem:[%s6399_s15 + $0x6c0] sm:$0xff]  ;;  %v4745_v57 = vpack.c.bf16 %v3231_v41, %v3230_v39 }
 0xe2b   : > { %4646 = vmatpush3.bf16.msra.mxu1 %v4645_v61  ;;  %v4693_v61 = vpack.c.bf16 %v3173_v14, %v3172_v35  ;;  %v2909_v25 = vadd.f32 %v5917_v10, %v2386_v36  ;;  %v3241_v10 = vld [vmem:[%s6399_s15 + $0x798] sm:$0xff]  ;;  %v3215_v35 = vld [vmem:[%s6399_s15 + $0x6c8] sm:$0xff] }
 0xe2c   : > { %4678 = vmatpush3.bf16.msra.mxu0 %v4677_v42  ;;  %4648 = vmatprep.subr.bf16.mxu1 %v4647_v45  ;;  %v3190_v42 = vld [vmem:[%s6399_s15 + $0x600] sm:$0xff]  ;;  %v3191_v45 = vld [vmem:[%s6399_s15 + $0x608] sm:$0xff]  ;;  %v4711_v36 = vpack.c.bf16 %v3215_v35, %v3214_v34 }
 0xe2d   : > { %4680 = vmatprep.subr.bf16.mxu0 %v4679_v43  ;;  %v4697_v43 = vpack.c.bf16 %v3191_v45, %v3190_v42  ;;  %v2995_v54 = vmax.f32 %v2909_v25, 0.0  ;;  %v3247_v14 = vld [vmem:[%s6399_s15 + $0x7c8] sm:$0xff]  ;;  %v3248_v42 = vld [vmem:[%s6399_s15 + $0x7d0] sm:$0xff]  ;;  %v3249_v45 = vld [vmem:[%s6399_s15 + $0x7d8] sm:$0xff] }
 0xe2e   : > { %v3200_v25 = vld [vmem:[%s6399_s15 + $0x650] sm:$0xff]  ;;  %v4747_v47 = vpack.c.bf16 %v3249_v45, %v3248_v42 }
 0xe2f   : > { %4650 = vmatpush3.bf16.msra.mxu1 %v4649_v51  ;;  %v2992_v51 = vmax.f32 %v5856_v31, 0.0  ;;  %v3242_v31 = vld [vmem:[%s6399_s15 + $0x7a0] sm:$0xff] }
 0xe30   : > { %4682 = vmatpush3.bf16.msra.mxu0 %v4681_v52  ;;  %4652 = vmatprep.subr.bf16.mxu1 %v4651_v53  ;;  %v4699_v52 = vpack.c.bf16 %v3209_v46, %v3208_v62  ;;  %v3225_v53 = vld [vmem:[%s6399_s15 + $0x718] sm:$0xff]  ;;  %v4735_v15 = vpack.c.bf16 %v3243_v63, %v3242_v31  ;;  %v3232_v46 = vld [vmem:[%s6399_s15 + $0x750] sm:$0xff] }
 0xe31   : > { %4684 = vmatprep.subr.bf16.mxu0 %v4683_v55  ;;  %v4731_v55 = vpack.c.bf16 %v3241_v10, %v3240_v44  ;;  %v4733_v2 = vpack.c.bf16 %v3225_v53, %v3224_v50  ;;  %v3201_v62 = vld [vmem:[%s6399_s15 + $0x658] sm:$0xff]  ;;  %v3218_v44 = vld [vmem:[%s6399_s15 + $0x6e0] sm:$0xff]  ;;  %v3219_v10 = vld [vmem:[%s6399_s15 + $0x6e8] sm:$0xff] }
 0xe32   : > { %v4717_v32 = vpack.c.bf16 %v3201_v62, %v3200_v25  ;;  %v4719_v50 = vpack.c.bf16 %v3219_v10, %v3218_v44  ;;  %v3234_v53 = vld [vmem:[%s6399_s15 + $0x760] sm:$0xff]  ;;  %v3252_v31 = vld [vmem:[%s6399_s15 + $0x7f0] sm:$0xff]  ;;  %v3253_v63 = vld [vmem:[%s6399_s15 + $0x7f8] sm:$0xff] }
 0xe33   : > { %4654 = vmatpush3.bf16.msra.mxu1 %v4653_v5  ;;  %v3194_v5 = vld [vmem:[%s6399_s15 + $0x620] sm:$0xff] }
 0xe34   : > { %4686 = vmatpush3.bf16.msra.mxu0 %v4685_v12  ;;  %4656 = vmatprep.subr.bf16.mxu1 %v4655_v13  ;;  %v3195_v12 = vld [vmem:[%s6399_s15 + $0x628] sm:$0xff]  ;;  %v3226_v13 = vld [vmem:[%s6399_s15 + $0x720] sm:$0xff] }
 0xe35   : > { %4688 = vmatprep.subr.bf16.mxu0 %v4687_v17  ;;  %v3213_v17 = vld [vmem:[%s6399_s15 + $0x6b8] sm:$0xff]  ;;  %v4705_v19 = vpack.c.bf16 %v3195_v12, %v3194_v5  ;;  %v4737_v24 = vpack.c.bf16 %v3227_v58, %v3226_v13  ;;  %v4755_v12 = vpack.c.bf16 %v3253_v63, %v3252_v31  ;;  %v3236_v13 = vld [vmem:[%s6399_s15 + $0x770] sm:$0xff] }
 0xe36   : > { %v4707_v26 = vpack.c.bf16 %v3213_v17, %v3212_v16  ;;  %v3205_v5 = vld [vmem:[%s6399_s15 + $0x678] sm:$0xff]  ;;  %v2994_v17 = vmax.f32 %v5912_v7, 0.0 }
 0xe37   : > { %4658 = vmatpush3.bf16.msra.mxu1 %v4657_v27  ;;  %v3196_v27 = vld [vmem:[%s6399_s15 + $0x630] sm:$0xff] }
 0xe38   : > { %4690 = vmatpush3.bf16.msra.mxu0 %v4689_v29  ;;  %4660 = vmatprep.subr.bf16.mxu1 %v4659_v30  ;;  %v3228_v29 = vld [vmem:[%s6399_s15 + $0x730] sm:$0xff]  ;;  %v4739_v30 = vpack.c.bf16 %v3245_v59, %v3244_v18  ;;  %v4709_v56 = vpack.c.bf16 %v3197_v28, %v3196_v27  ;;  %v2996_v18 = vmax.f32 %v5915_v9, 0.0 }
 0xe39   : > { %4692 = vmatprep.subr.bf16.mxu0 %v4691_v11  ;;  %v3246_v11 = vld [vmem:[%s6399_s15 + $0x7c0] sm:$0xff]  ;;  %v4741_v60 = vpack.c.bf16 %v3229_v6, %v3228_v29 }
 0xe3b   : > { %4662 = vmatpush3.bf16.msra.mxu1 %v4661_v40  ;;  %v4743_v40 = vpack.c.bf16 %v3247_v14, %v3246_v11 }
 0xe3c   : > { %4694 = vmatpush3.bf16.msra.mxu0 %v4693_v61  ;;  %4696 = vmatprep.subr.bf16.mxu1 %v4695_v20  ;;  %v3216_v61 = vld [vmem:[%s6399_s15 + $0x6d0] sm:$0xff]  ;;  %v3217_v20 = vld [vmem:[%s6399_s15 + $0x6d8] sm:$0xff] }
 0xe3d   : > { %4728 = vmatprep.subr.bf16.mxu0 %v4727_v21  ;;  %v4713_v21 = vpack.c.bf16 %v3199_v38, %v3198_v37  ;;  %v4715_v22 = vpack.c.bf16 %v3217_v20, %v3216_v61 }
 0xe3e   : > { %3606 = vmatmul.mubr.f32.vlgmr.msra.gmra.mrb[32].mxu1 %v2990_v48  ;;  %v3250_v48 = vld [vmem:[%s6399_s15 + $0x7e0] sm:$0xff] }
 0xe3f   : > { %3676 = vmatmul.mubr.f32.vlgmr.msra.gmra.mrb[26].mxu0 %v2992_v51  ;;  %4698 = vmatpush3.bf16.msra.mxu1 %v4697_v43  ;;  %v3233_v43 = vld [vmem:[%s6399_s15 + $0x758] sm:$0xff]  ;;  %v3202_v51 = vld [vmem:[%s6399_s15 + $0x660] sm:$0xff] }
 0xe40   : > { %3745 = vmatprep.mubr.f32.mxu1 %v2995_v54  ;;  %4730 = vmatpush3.bf16.msra.mxu0 %v4729_v49  ;;  %v3251_v49 = vld [vmem:[%s6399_s15 + $0x7e8] sm:$0xff]  ;;  %v4749_v3 = vpack.c.bf16 %v3233_v43, %v3232_v46  ;;  %v3220_v54 = vld [vmem:[%s6399_s15 + $0x6f0] sm:$0xff] }
 0xe41   : > { %3815 = vmatprep.mubr.f32.mxu0 %v2997_v0  ;;  %4700 = vmatprep.subr.bf16.mxu1 %v4699_v52  ;;  %v3203_v52 = vld [vmem:[%s6399_s15 + $0x668] sm:$0xff]  ;;  %v4751_v33 = vpack.c.bf16 %v3251_v49, %v3250_v48 }
 0xe42   : > { %4732 = vmatprep.subr.bf16.mxu0 %v4731_v55  ;;  %v3221_v55 = vld [vmem:[%s6399_s15 + $0x6f8] sm:$0xff]  ;;  %v4721_v0 = vpack.c.bf16 %v3203_v52, %v3202_v51 }
 0xe43   : > { %4702 = vmatpush3.bf16.msra.mxu1 %v4701_v1  ;;  %v4753_v1 = vpack.c.bf16 %v3235_v8, %v3234_v53 }
 0xe44   : > { %4734 = vmatpush3.bf16.msra.mxu0 %v4733_v2  ;;  %4704 = vmatprep.subr.bf16.mxu1 %v4703_v4  ;;  %v4723_v2 = vpack.c.bf16 %v3221_v55, %v3220_v54  ;;  %v3204_v4 = vld [vmem:[%s6399_s15 + $0x670] sm:$0xff] }
 0xe45   : > { %4736 = vmatprep.subr.bf16.mxu0 %v4735_v15  ;;  %v3237_v15 = vld [vmem:[%s6399_s15 + $0x778] sm:$0xff]  ;;  %v4725_v58 = vpack.c.bf16 %v3205_v5, %v3204_v4 }
 0xe46   : > { %v4757_v16 = vpack.c.bf16 %v3237_v15, %v3236_v13 }
 0xe47   : > { %4706 = vmatpush3.bf16.msra.mxu1 %v4705_v19 }
 0xe48   : > { %4738 = vmatpush3.bf16.msra.mxu0 %v4737_v24  ;;  %4708 = vmatprep.subr.bf16.mxu1 %v4707_v26  ;;  %v3960_v24 = vld [vmem:[%s6400_s16] ss:$0 sm:$0xff] }
 0xe49   : > { %4740 = vmatprep.subr.bf16.mxu0 %v4739_v30 }
 0xe4b   : > { %4710 = vmatpush3.bf16.msra.mxu1 %v4709_v56 }
 0xe4c   : > { %4742 = vmatpush3.bf16.msra.mxu0 %v4741_v60  ;;  %4712 = vmatprep.subr.bf16.mxu1 %v4711_v36 }
 0xe4d   : > { %4744 = vmatprep.subr.bf16.mxu0 %v4743_v40 }
 0xe4f   : > { %4714 = vmatpush3.bf16.msra.mxu1 %v4713_v21 }
 0xe50   : > { %4746 = vmatpush3.bf16.msra.mxu0 %v4745_v57  ;;  %4716 = vmatprep.subr.bf16.mxu1 %v4715_v22 }
 0xe51   : > { %4748 = vmatprep.subr.bf16.mxu0 %v4747_v47 }
 0xe53   : > { %4718 = vmatpush3.bf16.msra.mxu1 %v4717_v32 }
 0xe54   : > { %4750 = vmatpush3.bf16.msra.mxu0 %v4749_v3  ;;  %4720 = vmatprep.subr.bf16.mxu1 %v4719_v50 }
 0xe55   : > { %4752 = vmatprep.subr.bf16.mxu0 %v4751_v33  ;;  %v3962_v33 = vld [vmem:[%s6402_s18] ss:$0 sm:$0xff] }
 0xe57   : > { %4722 = vmatpush3.bf16.msra.mxu1 %v4721_v0 }
 0xe58   : > { %4754 = vmatpush3.bf16.msra.mxu0 %v4753_v1  ;;  %4724 = vmatprep.subr.bf16.mxu1 %v4723_v2 }
 0xe59   : > { %4756 = vmatprep.subr.bf16.mxu0 %v4755_v12 }
 0xe5b   : > { %4726 = vmatpush3.bf16.msra.mxu1 %v4725_v58 }
 0xe5c   : > { %4758 = vmatpush3.bf16.msra.mxu0 %v4757_v16 }
 0xe5e   : > { %3746 = vmatmul.mubr.f32.vlgmr.msra.gmra.mrb[34].mxu1 %v2994_v17 }
 0xe5f   : > { %3816 = vmatmul.mubr.f32.vlgmr.msra.gmra.mrb[28].mxu0 %v2996_v18 }
 0xed1   : > { %v4046_v59 = vpop.f32.mrb[28].mxu1  ;;  %v4081_v19 = vpop.f32.mrb[22].mxu0 }
 0xed2   : > { %v4047_v26 = vpop.f32.mrb[29].mxu1  ;;  %v4082_v27 = vpop.f32.mrb[23].mxu0 }
 0xed3   : > { %v4048_v28 = vadd.f32 %v4047_v26, %v4046_v59  ;;  %v4083_v29 = vadd.f32 %v4082_v27, %v4081_v19 }
 0xed5   : > { %v3328_v30 = vadd.f32 %v4048_v28, %v3960_v24 }
 0xed7   : > { %v3398_v6 = vadd.f32 %v4083_v29, %v3328_v30 }
 0xef1   : > { %v4116_v34 = vpop.f32.mrb[30].mxu1  ;;  %v4151_v35 = vpop.f32.mrb[24].mxu0 }
 0xef2   : > { %v4117_v7 = vpop.f32.mrb[31].mxu1  ;;  %v4152_v11 = vpop.f32.mrb[25].mxu0 }
 0xef3   : > { %v4118_v14 = vadd.f32 %v4117_v7, %v4116_v34  ;;  %v4153_v9 = vadd.f32 %v4152_v11, %v4151_v35 }
 0xef5   : > { %v3468_v56 = vadd.f32 %v4118_v14, %v3398_v6 }
 0xef7   : > { %v3538_v60 = vadd.f32 %v4153_v9, %v3468_v56 }
 0xf11   : > { %v4186_v36 = vpop.f32.mrb[32].mxu1 }
 0xf12   : > { %v4221_v37 = vpop.f32.mrb[26].mxu0  ;;  %v4187_v38 = vpop.f32.mrb[33].mxu1 }
 0xf13   : > { %v4188_v39 = vadd.f32 %v4187_v38, %v4186_v36  ;;  %v4222_v40 = vpop.f32.mrb[27].mxu0 }
 0xf14   : > { %v4223_v41 = vadd.f32 %v4222_v40, %v4221_v37 }
 0xf15   : > { %v3608_v61 = vadd.f32 %v4188_v39, %v3538_v60 }
 0xf17   : > { %v3678_v20 = vadd.f32 %v4223_v41, %v3608_v61 }
 0xf31   : > { %v4256_v42 = vpop.f32.mrb[34].mxu1 }
 0xf32   : > { %v4291_v45 = vpop.f32.mrb[28].mxu0  ;;  %v4257_v21 = vpop.f32.mrb[35].mxu1 }
 0xf33   : > { %v4258_v57 = vadd.f32 %v4257_v21, %v4256_v42  ;;  %v4292_v22 = vpop.f32.mrb[29].mxu0 }
 0xf34   : > { %v4293_v25 = vadd.f32 %v4292_v22, %v4291_v45 }
 0xf35   : > { %v3748_v62 = vadd.f32 %v4258_v57, %v3678_v20 }
 0xf37   : > { %v3818_v46 = vadd.f32 %v4293_v25, %v3748_v62 }
 0xf39   : > { %v3823_v47 = vadd.f32 %v3818_v46, %v5377_v23  ;;  %v3961_v23 = vld [vmem:[%s6401_s17] ss:$0 sm:$0xff] }
 0xf3b   : > { %v3824_v43 = vsel %vm618_vm1, %v3823_v47, 0.0 }
 0xf3c   : > { %3825 = vadd.xlane.f32.xlu0 %v3824_v43 }
 0xfc9   : > { %v3826_v44 = vpop.xlane.xlu0 %3825 }
 0xfca   : > { %v3827_v10 = vmul.f32 0.03125, %v3826_v44 }
 0xfcc   : > { %v3828_v48 = vsub.f32 %v3823_v47, %v3827_v10 }
 0xfce   : > { %v3829_v49 = vmul.f32 %v3828_v48, %v3828_v48 }
 0xfd0   : > { %v3830_v32 = vsel %vm618_vm1, %v3829_v49, 0.0 }
 0xfd1   : > { %3831 = vadd.xlane.f32.xlu0 %v3830_v32 }
0x105e   : > { %v3832_v3 = vpop.xlane.xlu0 %3831 }
0x105f   : > { %v3833_v50 = vmul.f32 0.03125, %v3832_v3 }
0x1061   : > { %v3834_v51 = vadd.f32 1e-05, %v3833_v50 }
0x1063   : > { %4820 = vrsqrt.f32 %v3834_v51 }
0x106d   : > { %v4821_v52 = vpop.eup %4820 }
0x106e   : > { %v3836_v53 = vmul.f32 %v4821_v52, %v3828_v48 }
0x1070   : > { %v3843_v8 = vmul.f32 %v3961_v23, %v3836_v53 }
0x1072   : > { %v3850_v54 = vadd.f32 %v3962_v33, %v3843_v8 }
0x1074   : > { %3851 = vst.msk [vmem:[%s611_s24] sm:$0xff] %vm618_vm1, %v3850_v54 }
0x1075 PF: > { %s29_s0 = sadd.s32 1, %s4828_s0  }
0x1076   : > { %p26_p4 = scmp.ge.s32.totalorder %s29_s0, 4  }
0x1078   :  { %28 = sbr.rel (!%p26_p4) target bundleno = 5 (0x5), region = 129 }

</bundles_post_ra>
